<compile_context>
chip_gen: v5e
topology: v5e:2x2
jax: 0.10.0
libtpu: 0.0.40
codegen_flags: <defaults>
</compile_context>

<pallas_src>
import functools

import numpy as np
import jax
import jax.numpy as jnp
from jax import lax
from jax.experimental import pallas as pl
from jax.experimental.pallas import tpu as pltpu

_BN_EPS = 1e-5
_CP = 128                       # lane-padded channel width
_TH = 8                         # target output rows per grid step
_VMEM_LIMIT = 32 * 1024 * 1024  # valid on v5e/v6e and within v7x's 64 MiB


def _cparams(sem):
    return pltpu.CompilerParams(dimension_semantics=sem,
                                vmem_limit_bytes=_VMEM_LIMIT)


def _pick_tile(extent, target=_TH):
    """Largest divisor of `extent` that is <= target (keeps blocks exact)."""
    t = min(target, extent)
    while extent % t:
        t -= 1
    return t


# ----------------------------------------------------------------------------
# Pallas kernels
# ----------------------------------------------------------------------------
def _conv3x3_s1_kernel(x_ref, w_ref, b_ref, o_ref):
    """Dense 3x3 stride-1 conv over TH output rows.

    x_ref : (1, Hp, Wp, CP) resident padded image (bf16)
    w_ref : (9, CP, CP) folded-BN weights (bf16)
    b_ref : (1, CP) folded-BN bias (f32)
    o_ref : (1, TH, W, CP) output rows (bf16)
    9 MXU matmuls of (TH*W, CP) x (CP, CP), f32 accumulate, bias + ReLU.
    """
    th, w, cp = o_ref.shape[1], o_ref.shape[2], o_ref.shape[3]
    r0 = pl.multiple_of(pl.program_id(1) * th, th)
    acc = None
    for di in range(3):
        rows = x_ref[0, pl.ds(r0 + di, th), :, :]            # (TH, Wp, CP)
        for dj in range(3):
            xs = rows[:, dj:dj + w, :].reshape(th * w, cp)    # (TH*W, CP)
            p = jnp.dot(xs, w_ref[3 * di + dj],
                        preferred_element_type=jnp.float32)
            acc = p if acc is None else acc + p
    y = jnp.maximum(acc + b_ref[...], 0.0).reshape(th, w, cp)
    o_ref[0] = y.astype(o_ref.dtype)


def _dw3x3_s1_kernel(x_ref, w_ref, b_ref, o_ref, *, relu):
    """Depthwise 3x3 stride-1 conv over TH output rows (VPU MAC)."""
    th, w, cp = o_ref.shape[1], o_ref.shape[2], o_ref.shape[3]
    r0 = pl.multiple_of(pl.program_id(1) * th, th)
    acc = None
    for di in range(3):
        rows = x_ref[0, pl.ds(r0 + di, th), :, :].astype(jnp.float32)
        for dj in range(3):
            p = rows[:, dj:dj + w, :] * w_ref[3 * di + dj]    # (TH,W,CP)*(1,CP)
            acc = p if acc is None else acc + p
    y = acc + b_ref[...]
    if relu:
        y = jnp.maximum(y, 0.0)
    o_ref[0] = y.astype(o_ref.dtype)


def _dw3x3_s2_kernel(e_ref, o_in_ref, w_ref, b_ref, out_ref, *, relu):
    """Depthwise 3x3 stride-2 conv over TH output rows.

    e_ref / o_in_ref : (1, Hp/2, 2, Wo+1, CP) even/odd column planes of the
    padded input, row-parity split by a free host reshape (padded row
    p = 2a + b).  All in-kernel reads are contiguous slices.
    """
    th, wo, cp = out_ref.shape[1], out_ref.shape[2], out_ref.shape[3]
    r0 = pl.multiple_of(pl.program_id(1) * th, th)
    # padded rows 2r (a=r,b=0), 2r+1 (a=r,b=1), 2r+2 (a=r+1,b=0)
    ev = (e_ref[0, pl.ds(r0, th), 0, :, :].astype(jnp.float32),
          e_ref[0, pl.ds(r0, th), 1, :, :].astype(jnp.float32),
          e_ref[0, pl.ds(r0 + 1, th), 0, :, :].astype(jnp.float32))
    od = (o_in_ref[0, pl.ds(r0, th), 0, :, :].astype(jnp.float32),
          o_in_ref[0, pl.ds(r0, th), 1, :, :].astype(jnp.float32),
          o_in_ref[0, pl.ds(r0 + 1, th), 0, :, :].astype(jnp.float32))
    acc = None
    for di in range(3):
        p = ev[di][:, 0:wo, :] * w_ref[3 * di + 0]        # col 2j   -> dj = 0
        acc = p if acc is None else acc + p
        acc = acc + od[di][:, 0:wo, :] * w_ref[3 * di + 1]     # col 2j+1
        acc = acc + ev[di][:, 1:wo + 1, :] * w_ref[3 * di + 2]  # col 2j+2
    y = acc + b_ref[...]
    if relu:
        y = jnp.maximum(y, 0.0)
    out_ref[0] = y.astype(out_ref.dtype)


def _head_kernel(a_ref, s_ref, w2_ref, ws_ref, b_ref, o_ref):
    """conv2 (1x1) + shortcut 1x1 + residual add + ReLU, fused & M-tiled."""
    acc = jnp.dot(a_ref[...], w2_ref[...], preferred_element_type=jnp.float32)
    acc = acc + jnp.dot(s_ref[...], ws_ref[...],
                        preferred_element_type=jnp.float32)
    o_ref[...] = jnp.maximum(acc + b_ref[...], 0.0).astype(o_ref.dtype)


# ----------------------------------------------------------------------------
# pallas_call wrappers
# ----------------------------------------------------------------------------
def conv3x3_s1_bn_relu(xp, w9, bias):
    n, hp, wp, cp = xp.shape
    h, w = hp - 2, wp - 2
    th = _pick_tile(h)
    return pl.pallas_call(
        _conv3x3_s1_kernel,
        out_shape=jax.ShapeDtypeStruct((n, h, w, cp), jnp.bfloat16),
        grid=(n, h // th),
        in_specs=[pl.BlockSpec((1, hp, wp, cp), lambda i, j: (i, 0, 0, 0)),
                  pl.BlockSpec((9, cp, cp), lambda i, j: (0, 0, 0)),
                  pl.BlockSpec((1, cp), lambda i, j: (0, 0))],
        out_specs=pl.BlockSpec((1, th, w, cp), lambda i, j: (i, j, 0, 0)),
        compiler_params=_cparams(("parallel", "parallel")),
    )(xp, w9, bias)


def dw3x3_s1_bn(xp, w9, bias, relu):
    n, hp, wp, cp = xp.shape
    h, w = hp - 2, wp - 2
    th = _pick_tile(h)
    kernel = functools.partial(_dw3x3_s1_kernel, relu=relu)
    return pl.pallas_call(
        kernel,
        out_shape=jax.ShapeDtypeStruct((n, h, w, cp), jnp.bfloat16),
        grid=(n, h // th),
        in_specs=[pl.BlockSpec((1, hp, wp, cp), lambda i, j: (i, 0, 0, 0)),
                  pl.BlockSpec((9, 1, cp), lambda i, j: (0, 0, 0)),
                  pl.BlockSpec((1, cp), lambda i, j: (0, 0))],
        out_specs=pl.BlockSpec((1, th, w, cp), lambda i, j: (i, j, 0, 0)),
        compiler_params=_cparams(("parallel", "parallel")),
    )(xp, w9, bias)


def dw3x3_s2_bn(xp, w9, bias, relu):
    n, hp, wp, cp = xp.shape
    h, w = hp - 2, wp - 2
    assert h % 2 == 0 and w % 2 == 0, "stride-2 path assumes even H, W"
    ho, wo = h // 2, w // 2
    # Even/odd COLUMN split (host) + free row-parity reshape (metadata only).
    # TODO(synk): fold the column deinterleave into the kernel as well.
    xpe = xp[:, :, 0::2, :].reshape(n, hp // 2, 2, wo + 1, cp)
    xpo = xp[:, :, 1::2, :].reshape(n, hp // 2, 2, wo + 1, cp)
    th = _pick_tile(ho)
    kernel = functools.partial(_dw3x3_s2_kernel, relu=relu)
    plane_spec = pl.BlockSpec((1, hp // 2, 2, wo + 1, cp),
                              lambda i, j: (i, 0, 0, 0, 0))
    return pl.pallas_call(
        kernel,
        out_shape=jax.ShapeDtypeStruct((n, ho, wo, cp), jnp.bfloat16),
        grid=(n, ho // th),
        in_specs=[plane_spec, plane_spec,
                  pl.BlockSpec((9, 1, cp), lambda i, j: (0, 0, 0)),
                  pl.BlockSpec((1, cp), lambda i, j: (0, 0))],
        out_specs=pl.BlockSpec((1, th, wo, cp), lambda i, j: (i, j, 0, 0)),
        compiler_params=_cparams(("parallel", "parallel")),
    )(xpe, xpo, w9, bias)


def fused_1x1_add_relu(a, s, w2, ws, bias, tm=1024):
    n, ho, wo, cp = a.shape
    m = n * ho * wo
    a2 = a.reshape(m, cp)
    s2 = s.reshape(m, cp)
    tm = min(tm, m)
    out = pl.pallas_call(
        _head_kernel,
        out_shape=jax.ShapeDtypeStruct((m, cp), jnp.bfloat16),
        grid=(pl.cdiv(m, tm),),
        in_specs=[pl.BlockSpec((tm, cp), lambda i: (i, 0)),
                  pl.BlockSpec((tm, cp), lambda i: (i, 0)),
                  pl.BlockSpec((cp, cp), lambda i: (0, 0)),   # resident W2
                  pl.BlockSpec((cp, cp), lambda i: (0, 0)),   # resident Ws
                  pl.BlockSpec((1, cp), lambda i: (0, 0))],
        out_specs=pl.BlockSpec((tm, cp), lambda i: (i, 0)),
        compiler_params=_cparams(("parallel",)),
    )(a2, s2, w2, ws, bias)
    return out.reshape(n, ho, wo, cp)


# ----------------------------------------------------------------------------
# Parameter init (deterministic synthetic) and BN/weight folding
# ----------------------------------------------------------------------------
def _init_conv_bn(key, cout, cin_per_group, ks):
    k1, k2, k3, k4, k5 = jax.random.split(key, 5)
    fan_in = cin_per_group * ks * ks
    w = jax.random.normal(k1, (cout, cin_per_group, ks, ks), jnp.float32)
    w = w / np.sqrt(fan_in)
    gamma = 1.0 + 0.1 * jax.random.normal(k2, (cout,), jnp.float32)
    beta = 0.1 * jax.random.normal(k3, (cout,), jnp.float32)
    mean = 0.1 * jax.random.normal(k4, (cout,), jnp.float32)
    var = jnp.abs(1.0 + 0.1 * jax.random.normal(k5, (cout,), jnp.float32))
    return dict(w=w, gamma=gamma, beta=beta, mean=mean, var=var)


def init_gelayer_s2(key, in_chan, out_chan, exp_ratio=6):
    mid = in_chan * exp_ratio
    ks = jax.random.split(key, 6)
    return dict(
        conv1=_init_conv_bn(ks[0], in_chan, in_chan, 3),    # dense 3x3 s1
        dwconv1=_init_conv_bn(ks[1], mid, 1, 3),            # dw 3x3 s2 (xE)
        dwconv2=_init_conv_bn(ks[2], mid, 1, 3),            # dw 3x3 s1
        conv2=_init_conv_bn(ks[3], out_chan, mid, 1),       # 1x1
        sc_dw=_init_conv_bn(ks[4], in_chan, 1, 3),          # shortcut dw s2
        sc_pw=_init_conv_bn(ks[5], out_chan, in_chan, 1),   # shortcut 1x1
    )


def _fold_bn(p):
    scale = p["gamma"] / jnp.sqrt(p["var"] + _BN_EPS)
    bias = p["beta"] - p["mean"] * scale
    return scale, bias


def prepare_kernel_params(p, in_chan, out_chan, exp_ratio):
    """Fold BN into weights/bias, fold dwconv1's group expansion into conv1,
    and zero-pad every channel dim to the 128-lane width."""
    mid = in_chan * exp_ratio
    if not (in_chan <= _CP and mid <= _CP and out_chan <= _CP):
        raise ValueError(
            "This single-lane-tile implementation requires in_chan, "
            f"in_chan*exp_ratio and out_chan <= {_CP}; got "
            f"{in_chan}, {mid}, {out_chan}.")

    # conv1: (in,in,3,3) -> (3,3,cin,cout), fold BN scale, replicate each
    # output channel exp_ratio times (group expansion of dwconv1).
    s1, b1 = _fold_bn(p["conv1"])
    w1 = jnp.transpose(p["conv1"]["w"], (2, 3, 1, 0)) * s1
    w1 = jnp.repeat(w1, exp_ratio, axis=-1)                    # (3,3,in,mid)
    b1 = jnp.repeat(b1, exp_ratio)                             # (mid,)
    w1_pad = jnp.zeros((9, _CP, _CP), jnp.float32)
    w1_pad = w1_pad.at[:, :in_chan, :mid].set(w1.reshape(9, in_chan, mid))
    b1_pad = jnp.zeros((1, _CP), jnp.float32).at[0, :mid].set(b1)

    def dw_fold(pdw, c):
        s, b = _fold_bn(pdw)
        wk = pdw["w"][:, 0] * s[:, None, None]                 # (c,3,3)
        wk = jnp.transpose(wk, (1, 2, 0)).reshape(9, c)        # (9,c)
        w_pad = jnp.zeros((9, 1, _CP), jnp.float32).at[:, 0, :c].set(wk)
        b_pad = jnp.zeros((1, _CP), jnp.float32).at[0, :c].set(b)
        return w_pad, b_pad

    wd1, bd1 = dw_fold(p["dwconv1"], mid)
    wd2, bd2 = dw_fold(p["dwconv2"], mid)
    wsd, bsd = dw_fold(p["sc_dw"], in_chan)

    s2, b2 = _fold_bn(p["conv2"])
    w2 = jnp.transpose(p["conv2"]["w"][:, :, 0, 0], (1, 0)) * s2   # (mid,out)
    w2_pad = jnp.zeros((_CP, _CP), jnp.float32).at[:mid, :out_chan].set(w2)

    ss, bs = _fold_bn(p["sc_pw"])
    ws = jnp.transpose(p["sc_pw"]["w"][:, :, 0, 0], (1, 0)) * ss   # (in,out)
    ws_pad = jnp.zeros((_CP, _CP), jnp.float32).at[:in_chan, :out_chan].set(ws)

    bh_pad = jnp.zeros((1, _CP), jnp.float32).at[0, :out_chan].set(b2 + bs)

    return dict(
        w1=w1_pad.astype(jnp.bfloat16), b1=b1_pad,
        wd1=wd1, bd1=bd1, wd2=wd2, bd2=bd2, wsd=wsd, bsd=bsd,
        w2=w2_pad.astype(jnp.bfloat16), ws=ws_pad.astype(jnp.bfloat16),
        bh=bh_pad,
    )


# ----------------------------------------------------------------------------
# GELayerS2 forward (Pallas)
# ----------------------------------------------------------------------------
def gelayer_s2_forward(x_nchw, kp, out_chan):
    n, c, h, w = x_nchw.shape
    # TODO(synk): if the surrounding model is NHWC, drop these layout passes.
    x = jnp.transpose(x_nchw, (0, 2, 3, 1)).astype(jnp.bfloat16)   # NHWC bf16
    x = jnp.pad(x, ((0, 0), (0, 0), (0, 0), (0, _CP - c)))
    xp = jnp.pad(x, ((0, 0), (1, 1), (1, 1), (0, 0)))   # single pad, reused
    # conv1 (3x3 s1) + BN + ReLU, output already group-replicated to mid chans
    feat = conv3x3_s1_bn_relu(xp, kp["w1"], kp["b1"])
    # dwconv1: depthwise 3x3 s2 + BN (no ReLU)
    featp = jnp.pad(feat, ((0, 0), (1, 1), (1, 1), (0, 0)))
    feat = dw3x3_s2_bn(featp, kp["wd1"], kp["bd1"], relu=False)
    # dwconv2: depthwise 3x3 s1 + BN + ReLU
    featp = jnp.pad(feat, ((0, 0), (1, 1), (1, 1), (0, 0)))
    feat = dw3x3_s1_bn(featp, kp["wd2"], kp["bd2"], relu=True)
    # shortcut: depthwise 3x3 s2 + BN (no ReLU), reuses xp
    sc = dw3x3_s2_bn(xp, kp["wsd"], kp["bsd"], relu=False)
    # conv2 (1x1)+BN, shortcut 1x1+BN, residual add, final ReLU — fused kernel
    out = fused_1x1_add_relu(feat, sc, kp["w2"], kp["ws"], kp["bh"])
    out = out[:, :, :, :out_chan].astype(jnp.float32)
    return jnp.transpose(out, (0, 3, 1, 2))                        # NCHW


# ----------------------------------------------------------------------------
# Pure-JAX f32 reference (for a correctness check)
# ----------------------------------------------------------------------------
def _ref_conv_bn(x, p, stride, pad, groups, relu):
    w = jnp.transpose(p["w"], (2, 3, 1, 0))        # (kh, kw, cin/groups, cout)
    y = lax.conv_general_dilated(
        x, w, window_strides=(stride, stride),
        padding=((pad, pad), (pad, pad)),
        dimension_numbers=("NHWC", "HWIO", "NHWC"),
        feature_group_count=groups,
        precision=lax.Precision.HIGHEST)
    scale = p["gamma"] / jnp.sqrt(p["var"] + _BN_EPS)
    bias = p["beta"] - p["mean"] * scale
    y = y * scale + bias
    return jnp.maximum(y, 0.0) if relu else y


def gelayer_s2_reference(x_nchw, p, in_chan, exp_ratio):
    mid = in_chan * exp_ratio
    x = jnp.transpose(x_nchw, (0, 2, 3, 1))
    feat = _ref_conv_bn(x, p["conv1"], 1, 1, 1, True)
    feat = _ref_conv_bn(feat, p["dwconv1"], 2, 1, in_chan, False)
    feat = _ref_conv_bn(feat, p["dwconv2"], 1, 1, mid, True)
    feat = _ref_conv_bn(feat, p["conv2"], 1, 0, 1, False)
    sc = _ref_conv_bn(x, p["sc_dw"], 2, 1, in_chan, False)
    sc = _ref_conv_bn(sc, p["sc_pw"], 1, 0, 1, False)
    out = jnp.maximum(feat + sc, 0.0)
    return jnp.transpose(out, (0, 3, 1, 2))


if __name__ == "__main__":
    key = jax.random.PRNGKey(0)
    k_param, k_x = jax.random.split(key)

    in_chan, out_chan, exp_ratio = 4, 8, 6
    n, h, w = 2, 16, 16

    params = init_gelayer_s2(k_param, in_chan, out_chan, exp_ratio)
    kparams = prepare_kernel_params(params, in_chan, out_chan, exp_ratio)
    x = jax.random.normal(k_x, (n, in_chan, h, w), jnp.float32)   # NCHW

    fwd = jax.jit(gelayer_s2_forward, static_argnums=(2,))
    out = jax.block_until_ready(fwd(x, kparams, out_chan))

    ref = jax.block_until_ready(
        gelayer_s2_reference(x, params, in_chan, exp_ratio))

    assert out.shape == (n, out_chan, h // 2, w // 2), out.shape
    # kernels run bf16 on the MXU/VPU (f32 accumulate); reference is f32.
    assert jnp.allclose(out, ref, rtol=1e-1, atol=1e-1), \
        float(jnp.max(jnp.abs(out - ref)))
    print("KERNEL_OK")
</pallas_src>

<mosaic_0001>
module attributes {stable_mosaic.version = 11 : i64} {
  func.func @_conv3x3_s1_kernel(%arg0: i32, %arg1: i32, %arg2: memref<1x18x18x128xbf16, #tpu.memory_space<vmem>>, %arg3: memref<9x128x128xbf16, #tpu.memory_space<vmem>>, %arg4: memref<1x128xf32, #tpu.memory_space<vmem>>, %arg5: memref<1x8x16x128xbf16, #tpu.memory_space<vmem>>) attributes {dimension_semantics = [#tpu.dimension_semantics<parallel>, #tpu.dimension_semantics<parallel>], iteration_bounds = array<i64: 2, 2>, scalar_prefetch = 0 : i64, scratch_operands = 0 : i64, tpu.core_type = #tpu.core_type<tc>, window_params = [{transform_indices = @transform_0, window_bounds = array<i64: 1, 18, 18, 128>}, {pipeline_mode = #tpu.pipeline_mode<synchronous>, transform_indices = @transform_1, window_bounds = array<i64: 9, 128, 128>}, {pipeline_mode = #tpu.pipeline_mode<synchronous>, transform_indices = @transform_2, window_bounds = array<i64: 1, 128>}, {transform_indices = @transform_3, window_bounds = array<i64: 1, 8, 16, 128>}]} {
    %c8_i32 = arith.constant 8 : i32
    %0 = arith.muli %arg1, %c8_i32 : i32
    %1 = tpu.assume_multiple %0, 8 : i32
    %c0_i32 = arith.constant 0 : i32
    %2 = arith.addi %1, %c0_i32 : i32
    %c0 = arith.constant 0 : index
    %3 = arith.index_cast %2 : i32 to index
    %c0_0 = arith.constant 0 : index
    %c0_1 = arith.constant 0 : index
    %4 = vector.load %arg2[%c0, %3, %c0_0, %c0_1] : memref<1x18x18x128xbf16, #tpu.memory_space<vmem>>, vector<1x8x18x128xbf16>
    %5 = vector.shape_cast %4 : vector<1x8x18x128xbf16> to vector<8x18x128xbf16>
    %6 = vector.extract_strided_slice %5 {offsets = [0, 0, 0], sizes = [8, 16, 128], strides = [1, 1, 1]} : vector<8x18x128xbf16> to vector<8x16x128xbf16>
    %7 = vector.shape_cast %6 : vector<8x16x128xbf16> to vector<128x128xbf16>
    %c0_2 = arith.constant 0 : index
    %c0_3 = arith.constant 0 : index
    %c0_4 = arith.constant 0 : index
    %8 = vector.load %arg3[%c0_2, %c0_3, %c0_4] : memref<9x128x128xbf16, #tpu.memory_space<vmem>>, vector<1x128x128xbf16>
    %9 = vector.shape_cast %8 : vector<1x128x128xbf16> to vector<128x128xbf16>
    %cst = arith.constant dense<0.000000e+00> : vector<128x128xf32>
    %10 = tpu.matmul %7, %9, %cst {dimension_numbers = #tpu.dot_dimension_numbers<[1], [0], [0], [1], [0, 0, 1, 1], [], []>} : vector<128x128xbf16>, vector<128x128xbf16>, vector<128x128xf32> -> vector<128x128xf32>
    %11 = vector.extract_strided_slice %5 {offsets = [0, 1, 0], sizes = [8, 16, 128], strides = [1, 1, 1]} : vector<8x18x128xbf16> to vector<8x16x128xbf16>
    %12 = vector.shape_cast %11 : vector<8x16x128xbf16> to vector<128x128xbf16>
    %c1 = arith.constant 1 : index
    %c0_5 = arith.constant 0 : index
    %c0_6 = arith.constant 0 : index
    %13 = vector.load %arg3[%c1, %c0_5, %c0_6] : memref<9x128x128xbf16, #tpu.memory_space<vmem>>, vector<1x128x128xbf16>
    %14 = vector.shape_cast %13 : vector<1x128x128xbf16> to vector<128x128xbf16>
    %cst_7 = arith.constant dense<0.000000e+00> : vector<128x128xf32>
    %15 = tpu.matmul %12, %14, %cst_7 {dimension_numbers = #tpu.dot_dimension_numbers<[1], [0], [0], [1], [0, 0, 1, 1], [], []>} : vector<128x128xbf16>, vector<128x128xbf16>, vector<128x128xf32> -> vector<128x128xf32>
    %16 = arith.addf %10, %15 : vector<128x128xf32>
    %17 = vector.extract_strided_slice %5 {offsets = [0, 2, 0], sizes = [8, 16, 128], strides = [1, 1, 1]} : vector<8x18x128xbf16> to vector<8x16x128xbf16>
    %18 = vector.shape_cast %17 : vector<8x16x128xbf16> to vector<128x128xbf16>
    %c2 = arith.constant 2 : index
    %c0_8 = arith.constant 0 : index
    %c0_9 = arith.constant 0 : index
    %19 = vector.load %arg3[%c2, %c0_8, %c0_9] : memref<9x128x128xbf16, #tpu.memory_space<vmem>>, vector<1x128x128xbf16>
    %20 = vector.shape_cast %19 : vector<1x128x128xbf16> to vector<128x128xbf16>
    %cst_10 = arith.constant dense<0.000000e+00> : vector<128x128xf32>
    %21 = tpu.matmul %18, %20, %cst_10 {dimension_numbers = #tpu.dot_dimension_numbers<[1], [0], [0], [1], [0, 0, 1, 1], [], []>} : vector<128x128xbf16>, vector<128x128xbf16>, vector<128x128xf32> -> vector<128x128xf32>
    %22 = arith.addf %16, %21 : vector<128x128xf32>
    %c1_i32 = arith.constant 1 : i32
    %23 = arith.addi %1, %c1_i32 : i32
    %c0_11 = arith.constant 0 : index
    %24 = arith.index_cast %23 : i32 to index
    %c0_12 = arith.constant 0 : index
    %c0_13 = arith.constant 0 : index
    %25 = vector.load %arg2[%c0_11, %24, %c0_12, %c0_13] : memref<1x18x18x128xbf16, #tpu.memory_space<vmem>>, vector<1x8x18x128xbf16>
    %26 = vector.shape_cast %25 : vector<1x8x18x128xbf16> to vector<8x18x128xbf16>
    %27 = vector.extract_strided_slice %26 {offsets = [0, 0, 0], sizes = [8, 16, 128], strides = [1, 1, 1]} : vector<8x18x128xbf16> to vector<8x16x128xbf16>
    %28 = vector.shape_cast %27 : vector<8x16x128xbf16> to vector<128x128xbf16>
    %c3 = arith.constant 3 : index
    %c0_14 = arith.constant 0 : index
    %c0_15 = arith.constant 0 : index
    %29 = vector.load %arg3[%c3, %c0_14, %c0_15] : memref<9x128x128xbf16, #tpu.memory_space<vmem>>, vector<1x128x128xbf16>
    %30 = vector.shape_cast %29 : vector<1x128x128xbf16> to vector<128x128xbf16>
    %cst_16 = arith.constant dense<0.000000e+00> : vector<128x128xf32>
    %31 = tpu.matmul %28, %30, %cst_16 {dimension_numbers = #tpu.dot_dimension_numbers<[1], [0], [0], [1], [0, 0, 1, 1], [], []>} : vector<128x128xbf16>, vector<128x128xbf16>, vector<128x128xf32> -> vector<128x128xf32>
    %32 = arith.addf %22, %31 : vector<128x128xf32>
    %33 = vector.extract_strided_slice %26 {offsets = [0, 1, 0], sizes = [8, 16, 128], strides = [1, 1, 1]} : vector<8x18x128xbf16> to vector<8x16x128xbf16>
    %34 = vector.shape_cast %33 : vector<8x16x128xbf16> to vector<128x128xbf16>
    %c4 = arith.constant 4 : index
    %c0_17 = arith.constant 0 : index
    %c0_18 = arith.constant 0 : index
    %35 = vector.load %arg3[%c4, %c0_17, %c0_18] : memref<9x128x128xbf16, #tpu.memory_space<vmem>>, vector<1x128x128xbf16>
    %36 = vector.shape_cast %35 : vector<1x128x128xbf16> to vector<128x128xbf16>
    %cst_19 = arith.constant dense<0.000000e+00> : vector<128x128xf32>
    %37 = tpu.matmul %34, %36, %cst_19 {dimension_numbers = #tpu.dot_dimension_numbers<[1], [0], [0], [1], [0, 0, 1, 1], [], []>} : vector<128x128xbf16>, vector<128x128xbf16>, vector<128x128xf32> -> vector<128x128xf32>
    %38 = arith.addf %32, %37 : vector<128x128xf32>
    %39 = vector.extract_strided_slice %26 {offsets = [0, 2, 0], sizes = [8, 16, 128], strides = [1, 1, 1]} : vector<8x18x128xbf16> to vector<8x16x128xbf16>
    %40 = vector.shape_cast %39 : vector<8x16x128xbf16> to vector<128x128xbf16>
    %c5 = arith.constant 5 : index
    %c0_20 = arith.constant 0 : index
    %c0_21 = arith.constant 0 : index
    %41 = vector.load %arg3[%c5, %c0_20, %c0_21] : memref<9x128x128xbf16, #tpu.memory_space<vmem>>, vector<1x128x128xbf16>
    %42 = vector.shape_cast %41 : vector<1x128x128xbf16> to vector<128x128xbf16>
    %cst_22 = arith.constant dense<0.000000e+00> : vector<128x128xf32>
    %43 = tpu.matmul %40, %42, %cst_22 {dimension_numbers = #tpu.dot_dimension_numbers<[1], [0], [0], [1], [0, 0, 1, 1], [], []>} : vector<128x128xbf16>, vector<128x128xbf16>, vector<128x128xf32> -> vector<128x128xf32>
    %44 = arith.addf %38, %43 : vector<128x128xf32>
    %c2_i32 = arith.constant 2 : i32
    %45 = arith.addi %1, %c2_i32 : i32
    %c0_23 = arith.constant 0 : index
    %46 = arith.index_cast %45 : i32 to index
    %c0_24 = arith.constant 0 : index
    %c0_25 = arith.constant 0 : index
    %47 = vector.load %arg2[%c0_23, %46, %c0_24, %c0_25] : memref<1x18x18x128xbf16, #tpu.memory_space<vmem>>, vector<1x8x18x128xbf16>
    %48 = vector.shape_cast %47 : vector<1x8x18x128xbf16> to vector<8x18x128xbf16>
    %49 = vector.extract_strided_slice %48 {offsets = [0, 0, 0], sizes = [8, 16, 128], strides = [1, 1, 1]} : vector<8x18x128xbf16> to vector<8x16x128xbf16>
    %50 = vector.shape_cast %49 : vector<8x16x128xbf16> to vector<128x128xbf16>
    %c6 = arith.constant 6 : index
    %c0_26 = arith.constant 0 : index
    %c0_27 = arith.constant 0 : index
    %51 = vector.load %arg3[%c6, %c0_26, %c0_27] : memref<9x128x128xbf16, #tpu.memory_space<vmem>>, vector<1x128x128xbf16>
    %52 = vector.shape_cast %51 : vector<1x128x128xbf16> to vector<128x128xbf16>
    %cst_28 = arith.constant dense<0.000000e+00> : vector<128x128xf32>
    %53 = tpu.matmul %50, %52, %cst_28 {dimension_numbers = #tpu.dot_dimension_numbers<[1], [0], [0], [1], [0, 0, 1, 1], [], []>} : vector<128x128xbf16>, vector<128x128xbf16>, vector<128x128xf32> -> vector<128x128xf32>
    %54 = arith.addf %44, %53 : vector<128x128xf32>
    %55 = vector.extract_strided_slice %48 {offsets = [0, 1, 0], sizes = [8, 16, 128], strides = [1, 1, 1]} : vector<8x18x128xbf16> to vector<8x16x128xbf16>
    %56 = vector.shape_cast %55 : vector<8x16x128xbf16> to vector<128x128xbf16>
    %c7 = arith.constant 7 : index
    %c0_29 = arith.constant 0 : index
    %c0_30 = arith.constant 0 : index
    %57 = vector.load %arg3[%c7, %c0_29, %c0_30] : memref<9x128x128xbf16, #tpu.memory_space<vmem>>, vector<1x128x128xbf16>
    %58 = vector.shape_cast %57 : vector<1x128x128xbf16> to vector<128x128xbf16>
    %cst_31 = arith.constant dense<0.000000e+00> : vector<128x128xf32>
    %59 = tpu.matmul %56, %58, %cst_31 {dimension_numbers = #tpu.dot_dimension_numbers<[1], [0], [0], [1], [0, 0, 1, 1], [], []>} : vector<128x128xbf16>, vector<128x128xbf16>, vector<128x128xf32> -> vector<128x128xf32>
    %60 = arith.addf %54, %59 : vector<128x128xf32>
    %61 = vector.extract_strided_slice %48 {offsets = [0, 2, 0], sizes = [8, 16, 128], strides = [1, 1, 1]} : vector<8x18x128xbf16> to vector<8x16x128xbf16>
    %62 = vector.shape_cast %61 : vector<8x16x128xbf16> to vector<128x128xbf16>
    %c8 = arith.constant 8 : index
    %c0_32 = arith.constant 0 : index
    %c0_33 = arith.constant 0 : index
    %63 = vector.load %arg3[%c8, %c0_32, %c0_33] : memref<9x128x128xbf16, #tpu.memory_space<vmem>>, vector<1x128x128xbf16>
    %64 = vector.shape_cast %63 : vector<1x128x128xbf16> to vector<128x128xbf16>
    %cst_34 = arith.constant dense<0.000000e+00> : vector<128x128xf32>
    %65 = tpu.matmul %62, %64, %cst_34 {dimension_numbers = #tpu.dot_dimension_numbers<[1], [0], [0], [1], [0, 0, 1, 1], [], []>} : vector<128x128xbf16>, vector<128x128xbf16>, vector<128x128xf32> -> vector<128x128xf32>
    %66 = arith.addf %60, %65 : vector<128x128xf32>
    %c0_35 = arith.constant 0 : index
    %c0_36 = arith.constant 0 : index
    %67 = vector.load %arg4[%c0_35, %c0_36] : memref<1x128xf32, #tpu.memory_space<vmem>>, vector<1x128xf32>
    %68 = vector.broadcast %67 : vector<1x128xf32> to vector<128x128xf32>
    %69 = arith.addf %66, %68 : vector<128x128xf32>
    %cst_37 = arith.constant 0.000000e+00 : f32
    %70 = vector.broadcast %cst_37 : f32 to vector<128x128xf32>
    %71 = arith.maximumf %69, %70 : vector<128x128xf32>
    %72 = vector.shape_cast %71 : vector<128x128xf32> to vector<8x16x128xf32>
    %73 = arith.truncf %72 : vector<8x16x128xf32> to vector<8x16x128xbf16>
    %c0_38 = arith.constant 0 : index
    %c0_39 = arith.constant 0 : index
    %c0_40 = arith.constant 0 : index
    %c0_41 = arith.constant 0 : index
    %74 = vector.load %arg5[%c0_38, %c0_39, %c0_40, %c0_41] : memref<1x8x16x128xbf16, #tpu.memory_space<vmem>>, vector<1x8x16x128xbf16>
    %75 = vector.shape_cast %74 : vector<1x8x16x128xbf16> to vector<8x16x128xbf16>
    %76 = vector.shape_cast %73 : vector<8x16x128xbf16> to vector<1x8x16x128xbf16>
    tpu.vector_store %arg5[%c0_38, %c0_39, %c0_40, %c0_41], %76 {strides = array<i32>} : memref<1x8x16x128xbf16, #tpu.memory_space<vmem>>, vector<1x8x16x128xbf16>,
    return
  }
  func.func @transform_0(%arg0: i32, %arg1: i32) -> (i32, i32, i32, i32) {
    %c0_i32 = arith.constant 0 : i32
    %c0_i32_0 = arith.constant 0 : i32
    %c0_i32_1 = arith.constant 0 : i32
    %c0_i32_2 = arith.constant 0 : i32
    return %arg0, %c0_i32, %c0_i32_0, %c0_i32_1 : i32, i32, i32, i32
  }
  func.func @transform_1(%arg0: i32, %arg1: i32) -> (i32, i32, i32) {
    %c0_i32 = arith.constant 0 : i32
    %c0_i32_0 = arith.constant 0 : i32
    %c0_i32_1 = arith.constant 0 : i32
    %c0_i32_2 = arith.constant 0 : i32
    return %c0_i32, %c0_i32_0, %c0_i32_1 : i32, i32, i32
  }
  func.func @transform_2(%arg0: i32, %arg1: i32) -> (i32, i32) {
    %c0_i32 = arith.constant 0 : i32
    %c0_i32_0 = arith.constant 0 : i32
    %c0_i32_1 = arith.constant 0 : i32
    return %c0_i32, %c0_i32_0 : i32, i32
  }
  func.func @transform_3(%arg0: i32, %arg1: i32) -> (i32, i32, i32, i32) {
    %c0_i32 = arith.constant 0 : i32
    %c0_i32_0 = arith.constant 0 : i32
    %c0_i32_1 = arith.constant 0 : i32
    return %arg0, %arg1, %c0_i32, %c0_i32_0 : i32, i32, i32, i32
  }
}

module attributes {stable_mosaic.version = 11 : i64} {
  func.func @_dw3x3_s2_kernel(%arg0: i32, %arg1: i32, %arg2: memref<1x9x2x9x128xbf16, #tpu.memory_space<vmem>>, %arg3: memref<1x9x2x9x128xbf16, #tpu.memory_space<vmem>>, %arg4: memref<9x1x128xf32, #tpu.memory_space<vmem>>, %arg5: memref<1x128xf32, #tpu.memory_space<vmem>>, %arg6: memref<1x8x8x128xbf16, #tpu.memory_space<vmem>>) attributes {dimension_semantics = [#tpu.dimension_semantics<parallel>, #tpu.dimension_semantics<parallel>], iteration_bounds = array<i64: 2, 1>, scalar_prefetch = 0 : i64, scratch_operands = 0 : i64, tpu.core_type = #tpu.core_type<tc>, window_params = [{transform_indices = @transform_0, window_bounds = array<i64: 1, 9, 2, 9, 128>}, {transform_indices = @transform_1, window_bounds = array<i64: 1, 9, 2, 9, 128>}, {pipeline_mode = #tpu.pipeline_mode<synchronous>, transform_indices = @transform_2, window_bounds = array<i64: 9, 1, 128>}, {pipeline_mode = #tpu.pipeline_mode<synchronous>, transform_indices = @transform_3, window_bounds = array<i64: 1, 128>}, {transform_indices = @transform_4, window_bounds = array<i64: 1, 8, 8, 128>}]} {
    %c8_i32 = arith.constant 8 : i32
    %0 = arith.muli %arg1, %c8_i32 : i32
    %1 = tpu.assume_multiple %0, 8 : i32
    %c0 = arith.constant 0 : index
    %2 = arith.index_cast %1 : i32 to index
    %c0_0 = arith.constant 0 : index
    %c0_1 = arith.constant 0 : index
    %c0_2 = arith.constant 0 : index
    %3 = vector.load %arg2[%c0, %2, %c0_0, %c0_1, %c0_2] : memref<1x9x2x9x128xbf16, #tpu.memory_space<vmem>>, vector<1x8x1x9x128xbf16>
    %4 = vector.shape_cast %3 : vector<1x8x1x9x128xbf16> to vector<8x9x128xbf16>
    %5 = arith.extf %4 : vector<8x9x128xbf16> to vector<8x9x128xf32>
    %c0_3 = arith.constant 0 : index
    %6 = arith.index_cast %1 : i32 to index
    %c1 = arith.constant 1 : index
    %c0_4 = arith.constant 0 : index
    %c0_5 = arith.constant 0 : index
    %7 = vector.load %arg2[%c0_3, %6, %c1, %c0_4, %c0_5] : memref<1x9x2x9x128xbf16, #tpu.memory_space<vmem>>, vector<1x8x1x9x128xbf16>
    %8 = vector.shape_cast %7 : vector<1x8x1x9x128xbf16> to vector<8x9x128xbf16>
    %9 = arith.extf %8 : vector<8x9x128xbf16> to vector<8x9x128xf32>
    %c1_i32 = arith.constant 1 : i32
    %10 = arith.addi %1, %c1_i32 : i32
    %c0_6 = arith.constant 0 : index
    %11 = arith.index_cast %10 : i32 to index
    %c0_7 = arith.constant 0 : index
    %c0_8 = arith.constant 0 : index
    %c0_9 = arith.constant 0 : index
    %12 = vector.load %arg2[%c0_6, %11, %c0_7, %c0_8, %c0_9] : memref<1x9x2x9x128xbf16, #tpu.memory_space<vmem>>, vector<1x8x1x9x128xbf16>
    %13 = vector.shape_cast %12 : vector<1x8x1x9x128xbf16> to vector<8x9x128xbf16>
    %14 = arith.extf %13 : vector<8x9x128xbf16> to vector<8x9x128xf32>
    %c0_10 = arith.constant 0 : index
    %15 = arith.index_cast %1 : i32 to index
    %c0_11 = arith.constant 0 : index
    %c0_12 = arith.constant 0 : index
    %c0_13 = arith.constant 0 : index
    %16 = vector.load %arg3[%c0_10, %15, %c0_11, %c0_12, %c0_13] : memref<1x9x2x9x128xbf16, #tpu.memory_space<vmem>>, vector<1x8x1x9x128xbf16>
    %17 = vector.shape_cast %16 : vector<1x8x1x9x128xbf16> to vector<8x9x128xbf16>
    %18 = arith.extf %17 : vector<8x9x128xbf16> to vector<8x9x128xf32>
    %c0_14 = arith.constant 0 : index
    %19 = arith.index_cast %1 : i32 to index
    %c1_15 = arith.constant 1 : index
    %c0_16 = arith.constant 0 : index
    %c0_17 = arith.constant 0 : index
    %20 = vector.load %arg3[%c0_14, %19, %c1_15, %c0_16, %c0_17] : memref<1x9x2x9x128xbf16, #tpu.memory_space<vmem>>, vector<1x8x1x9x128xbf16>
    %21 = vector.shape_cast %20 : vector<1x8x1x9x128xbf16> to vector<8x9x128xbf16>
    %22 = arith.extf %21 : vector<8x9x128xbf16> to vector<8x9x128xf32>
    %c1_i32_18 = arith.constant 1 : i32
    %23 = arith.addi %1, %c1_i32_18 : i32
    %c0_19 = arith.constant 0 : index
    %24 = arith.index_cast %23 : i32 to index
    %c0_20 = arith.constant 0 : index
    %c0_21 = arith.constant 0 : index
    %c0_22 = arith.constant 0 : index
    %25 = vector.load %arg3[%c0_19, %24, %c0_20, %c0_21, %c0_22] : memref<1x9x2x9x128xbf16, #tpu.memory_space<vmem>>, vector<1x8x1x9x128xbf16>
    %26 = vector.shape_cast %25 : vector<1x8x1x9x128xbf16> to vector<8x9x128xbf16>
    %27 = arith.extf %26 : vector<8x9x128xbf16> to vector<8x9x128xf32>
    %28 = vector.extract_strided_slice %5 {offsets = [0, 0, 0], sizes = [8, 8, 128], strides = [1, 1, 1]} : vector<8x9x128xf32> to vector<8x8x128xf32>
    %c0_23 = arith.constant 0 : index
    %c0_24 = arith.constant 0 : index
    %c0_25 = arith.constant 0 : index
    %29 = vector.load %arg4[%c0_23, %c0_24, %c0_25] : memref<9x1x128xf32, #tpu.memory_space<vmem>>, vector<1x1x128xf32>
    %30 = vector.shape_cast %29 : vector<1x1x128xf32> to vector<1x128xf32>
    %31 = vector.shape_cast %30 : vector<1x128xf32> to vector<1x1x128xf32>
    %32 = vector.broadcast %31 : vector<1x1x128xf32> to vector<8x8x128xf32>
    %33 = arith.mulf %28, %32 : vector<8x8x128xf32>
    %34 = vector.extract_strided_slice %18 {offsets = [0, 0, 0], sizes = [8, 8, 128], strides = [1, 1, 1]} : vector<8x9x128xf32> to vector<8x8x128xf32>
    %c1_26 = arith.constant 1 : index
    %c0_27 = arith.constant 0 : index
    %c0_28 = arith.constant 0 : index
    %35 = vector.load %arg4[%c1_26, %c0_27, %c0_28] : memref<9x1x128xf32, #tpu.memory_space<vmem>>, vector<1x1x128xf32>
    %36 = vector.shape_cast %35 : vector<1x1x128xf32> to vector<1x128xf32>
    %37 = vector.shape_cast %36 : vector<1x128xf32> to vector<1x1x128xf32>
    %38 = vector.broadcast %37 : vector<1x1x128xf32> to vector<8x8x128xf32>
    %39 = arith.mulf %34, %38 : vector<8x8x128xf32>
    %40 = arith.addf %33, %39 : vector<8x8x128xf32>
    %41 = vector.extract_strided_slice %5 {offsets = [0, 1, 0], sizes = [8, 8, 128], strides = [1, 1, 1]} : vector<8x9x128xf32> to vector<8x8x128xf32>
    %c2 = arith.constant 2 : index
    %c0_29 = arith.constant 0 : index
    %c0_30 = arith.constant 0 : index
    %42 = vector.load %arg4[%c2, %c0_29, %c0_30] : memref<9x1x128xf32, #tpu.memory_space<vmem>>, vector<1x1x128xf32>
    %43 = vector.shape_cast %42 : vector<1x1x128xf32> to vector<1x128xf32>
    %44 = vector.shape_cast %43 : vector<1x128xf32> to vector<1x1x128xf32>
    %45 = vector.broadcast %44 : vector<1x1x128xf32> to vector<8x8x128xf32>
    %46 = arith.mulf %41, %45 : vector<8x8x128xf32>
    %47 = arith.addf %40, %46 : vector<8x8x128xf32>
    %48 = vector.extract_strided_slice %9 {offsets = [0, 0, 0], sizes = [8, 8, 128], strides = [1, 1, 1]} : vector<8x9x128xf32> to vector<8x8x128xf32>
    %c3 = arith.constant 3 : index
    %c0_31 = arith.constant 0 : index
    %c0_32 = arith.constant 0 : index
    %49 = vector.load %arg4[%c3, %c0_31, %c0_32] : memref<9x1x128xf32, #tpu.memory_space<vmem>>, vector<1x1x128xf32>
    %50 = vector.shape_cast %49 : vector<1x1x128xf32> to vector<1x128xf32>
    %51 = vector.shape_cast %50 : vector<1x128xf32> to vector<1x1x128xf32>
    %52 = vector.broadcast %51 : vector<1x1x128xf32> to vector<8x8x128xf32>
    %53 = arith.mulf %48, %52 : vector<8x8x128xf32>
    %54 = arith.addf %47, %53 : vector<8x8x128xf32>
    %55 = vector.extract_strided_slice %22 {offsets = [0, 0, 0], sizes = [8, 8, 128], strides = [1, 1, 1]} : vector<8x9x128xf32> to vector<8x8x128xf32>
    %c4 = arith.constant 4 : index
    %c0_33 = arith.constant 0 : index
    %c0_34 = arith.constant 0 : index
    %56 = vector.load %arg4[%c4, %c0_33, %c0_34] : memref<9x1x128xf32, #tpu.memory_space<vmem>>, vector<1x1x128xf32>
    %57 = vector.shape_cast %56 : vector<1x1x128xf32> to vector<1x128xf32>
    %58 = vector.shape_cast %57 : vector<1x128xf32> to vector<1x1x128xf32>
    %59 = vector.broadcast %58 : vector<1x1x128xf32> to vector<8x8x128xf32>
    %60 = arith.mulf %55, %59 : vector<8x8x128xf32>
    %61 = arith.addf %54, %60 : vector<8x8x128xf32>
    %62 = vector.extract_strided_slice %9 {offsets = [0, 1, 0], sizes = [8, 8, 128], strides = [1, 1, 1]} : vector<8x9x128xf32> to vector<8x8x128xf32>
    %c5 = arith.constant 5 : index
    %c0_35 = arith.constant 0 : index
    %c0_36 = arith.constant 0 : index
    %63 = vector.load %arg4[%c5, %c0_35, %c0_36] : memref<9x1x128xf32, #tpu.memory_space<vmem>>, vector<1x1x128xf32>
    %64 = vector.shape_cast %63 : vector<1x1x128xf32> to vector<1x128xf32>
    %65 = vector.shape_cast %64 : vector<1x128xf32> to vector<1x1x128xf32>
    %66 = vector.broadcast %65 : vector<1x1x128xf32> to vector<8x8x128xf32>
    %67 = arith.mulf %62, %66 : vector<8x8x128xf32>
    %68 = arith.addf %61, %67 : vector<8x8x128xf32>
    %69 = vector.extract_strided_slice %14 {offsets = [0, 0, 0], sizes = [8, 8, 128], strides = [1, 1, 1]} : vector<8x9x128xf32> to vector<8x8x128xf32>
    %c6 = arith.constant 6 : index
    %c0_37 = arith.constant 0 : index
    %c0_38 = arith.constant 0 : index
    %70 = vector.load %arg4[%c6, %c0_37, %c0_38] : memref<9x1x128xf32, #tpu.memory_space<vmem>>, vector<1x1x128xf32>
    %71 = vector.shape_cast %70 : vector<1x1x128xf32> to vector<1x128xf32>
    %72 = vector.shape_cast %71 : vector<1x128xf32> to vector<1x1x128xf32>
    %73 = vector.broadcast %72 : vector<1x1x128xf32> to vector<8x8x128xf32>
    %74 = arith.mulf %69, %73 : vector<8x8x128xf32>
    %75 = arith.addf %68, %74 : vector<8x8x128xf32>
    %76 = vector.extract_strided_slice %27 {offsets = [0, 0, 0], sizes = [8, 8, 128], strides = [1, 1, 1]} : vector<8x9x128xf32> to vector<8x8x128xf32>
    %c7 = arith.constant 7 : index
    %c0_39 = arith.constant 0 : index
    %c0_40 = arith.constant 0 : index
    %77 = vector.load %arg4[%c7, %c0_39, %c0_40] : memref<9x1x128xf32, #tpu.memory_space<vmem>>, vector<1x1x128xf32>
    %78 = vector.shape_cast %77 : vector<1x1x128xf32> to vector<1x128xf32>
    %79 = vector.shape_cast %78 : vector<1x128xf32> to vector<1x1x128xf32>
    %80 = vector.broadcast %79 : vector<1x1x128xf32> to vector<8x8x128xf32>
    %81 = arith.mulf %76, %80 : vector<8x8x128xf32>
    %82 = arith.addf %75, %81 : vector<8x8x128xf32>
    %83 = vector.extract_strided_slice %14 {offsets = [0, 1, 0], sizes = [8, 8, 128], strides = [1, 1, 1]} : vector<8x9x128xf32> to vector<8x8x128xf32>
    %c8 = arith.constant 8 : index
    %c0_41 = arith.constant 0 : index
    %c0_42 = arith.constant 0 : index
    %84 = vector.load %arg4[%c8, %c0_41, %c0_42] : memref<9x1x128xf32, #tpu.memory_space<vmem>>, vector<1x1x128xf32>
    %85 = vector.shape_cast %84 : vector<1x1x128xf32> to vector<1x128xf32>
    %86 = vector.shape_cast %85 : vector<1x128xf32> to vector<1x1x128xf32>
    %87 = vector.broadcast %86 : vector<1x1x128xf32> to vector<8x8x128xf32>
    %88 = arith.mulf %83, %87 : vector<8x8x128xf32>
    %89 = arith.addf %82, %88 : vector<8x8x128xf32>
    %c0_43 = arith.constant 0 : index
    %c0_44 = arith.constant 0 : index
    %90 = vector.load %arg5[%c0_43, %c0_44] : memref<1x128xf32, #tpu.memory_space<vmem>>, vector<1x128xf32>
    %91 = vector.shape_cast %90 : vector<1x128xf32> to vector<1x1x128xf32>
    %92 = vector.broadcast %91 : vector<1x1x128xf32> to vector<8x8x128xf32>
    %93 = arith.addf %89, %92 : vector<8x8x128xf32>
    %94 = arith.truncf %93 : vector<8x8x128xf32> to vector<8x8x128xbf16>
    %c0_45 = arith.constant 0 : index
    %c0_46 = arith.constant 0 : index
    %c0_47 = arith.constant 0 : index
    %c0_48 = arith.constant 0 : index
    %95 = vector.load %arg6[%c0_45, %c0_46, %c0_47, %c0_48] : memref<1x8x8x128xbf16, #tpu.memory_space<vmem>>, vector<1x8x8x128xbf16>
    %96 = vector.shape_cast %95 : vector<1x8x8x128xbf16> to vector<8x8x128xbf16>
    %97 = vector.shape_cast %94 : vector<8x8x128xbf16> to vector<1x8x8x128xbf16>
    tpu.vector_store %arg6[%c0_45, %c0_46, %c0_47, %c0_48], %97 {strides = array<i32>} : memref<1x8x8x128xbf16, #tpu.memory_space<vmem>>, vector<1x8x8x128xbf16>,
    return
  }
  func.func @transform_0(%arg0: i32, %arg1: i32) -> (i32, i32, i32, i32, i32) {
    %c0_i32 = arith.constant 0 : i32
    %c0_i32_0 = arith.constant 0 : i32
    %c0_i32_1 = arith.constant 0 : i32
    %c0_i32_2 = arith.constant 0 : i32
    %c0_i32_3 = arith.constant 0 : i32
    return %arg0, %c0_i32, %c0_i32_0, %c0_i32_1, %c0_i32_2 : i32, i32, i32, i32, i32
  }
  func.func @transform_1(%arg0: i32, %arg1: i32) -> (i32, i32, i32, i32, i32) {
    %c0_i32 = arith.constant 0 : i32
    %c0_i32_0 = arith.constant 0 : i32
    %c0_i32_1 = arith.constant 0 : i32
    %c0_i32_2 = arith.constant 0 : i32
    %c0_i32_3 = arith.constant 0 : i32
    return %arg0, %c0_i32, %c0_i32_0, %c0_i32_1, %c0_i32_2 : i32, i32, i32, i32, i32
  }
  func.func @transform_2(%arg0: i32, %arg1: i32) -> (i32, i32, i32) {
    %c0_i32 = arith.constant 0 : i32
    %c0_i32_0 = arith.constant 0 : i32
    %c0_i32_1 = arith.constant 0 : i32
    %c0_i32_2 = arith.constant 0 : i32
    return %c0_i32, %c0_i32_0, %c0_i32_1 : i32, i32, i32
  }
  func.func @transform_3(%arg0: i32, %arg1: i32) -> (i32, i32) {
    %c0_i32 = arith.constant 0 : i32
    %c0_i32_0 = arith.constant 0 : i32
    %c0_i32_1 = arith.constant 0 : i32
    return %c0_i32, %c0_i32_0 : i32, i32
  }
  func.func @transform_4(%arg0: i32, %arg1: i32) -> (i32, i32, i32, i32) {
    %c0_i32 = arith.constant 0 : i32
    %c0_i32_0 = arith.constant 0 : i32
    %c0_i32_1 = arith.constant 0 : i32
    return %arg0, %arg1, %c0_i32, %c0_i32_0 : i32, i32, i32, i32
  }
}

module attributes {stable_mosaic.version = 11 : i64} {
  func.func @_dw3x3_s1_kernel(%arg0: i32, %arg1: i32, %arg2: memref<1x10x10x128xbf16, #tpu.memory_space<vmem>>, %arg3: memref<9x1x128xf32, #tpu.memory_space<vmem>>, %arg4: memref<1x128xf32, #tpu.memory_space<vmem>>, %arg5: memref<1x8x8x128xbf16, #tpu.memory_space<vmem>>) attributes {dimension_semantics = [#tpu.dimension_semantics<parallel>, #tpu.dimension_semantics<parallel>], iteration_bounds = array<i64: 2, 1>, scalar_prefetch = 0 : i64, scratch_operands = 0 : i64, tpu.core_type = #tpu.core_type<tc>, window_params = [{transform_indices = @transform_0, window_bounds = array<i64: 1, 10, 10, 128>}, {pipeline_mode = #tpu.pipeline_mode<synchronous>, transform_indices = @transform_1, window_bounds = array<i64: 9, 1, 128>}, {pipeline_mode = #tpu.pipeline_mode<synchronous>, transform_indices = @transform_2, window_bounds = array<i64: 1, 128>}, {transform_indices = @transform_3, window_bounds = array<i64: 1, 8, 8, 128>}]} {
    %c8_i32 = arith.constant 8 : i32
    %0 = arith.muli %arg1, %c8_i32 : i32
    %1 = tpu.assume_multiple %0, 8 : i32
    %c0_i32 = arith.constant 0 : i32
    %2 = arith.addi %1, %c0_i32 : i32
    %c0 = arith.constant 0 : index
    %3 = arith.index_cast %2 : i32 to index
    %c0_0 = arith.constant 0 : index
    %c0_1 = arith.constant 0 : index
    %4 = vector.load %arg2[%c0, %3, %c0_0, %c0_1] : memref<1x10x10x128xbf16, #tpu.memory_space<vmem>>, vector<1x8x10x128xbf16>
    %5 = vector.shape_cast %4 : vector<1x8x10x128xbf16> to vector<8x10x128xbf16>
    %6 = arith.extf %5 : vector<8x10x128xbf16> to vector<8x10x128xf32>
    %7 = vector.extract_strided_slice %6 {offsets = [0, 0, 0], sizes = [8, 8, 128], strides = [1, 1, 1]} : vector<8x10x128xf32> to vector<8x8x128xf32>
    %c0_2 = arith.constant 0 : index
    %c0_3 = arith.constant 0 : index
    %c0_4 = arith.constant 0 : index
    %8 = vector.load %arg3[%c0_2, %c0_3, %c0_4] : memref<9x1x128xf32, #tpu.memory_space<vmem>>, vector<1x1x128xf32>
    %9 = vector.shape_cast %8 : vector<1x1x128xf32> to vector<1x128xf32>
    %10 = vector.shape_cast %9 : vector<1x128xf32> to vector<1x1x128xf32>
    %11 = vector.broadcast %10 : vector<1x1x128xf32> to vector<8x8x128xf32>
    %12 = arith.mulf %7, %11 : vector<8x8x128xf32>
    %13 = vector.extract_strided_slice %6 {offsets = [0, 1, 0], sizes = [8, 8, 128], strides = [1, 1, 1]} : vector<8x10x128xf32> to vector<8x8x128xf32>
    %c1 = arith.constant 1 : index
    %c0_5 = arith.constant 0 : index
    %c0_6 = arith.constant 0 : index
    %14 = vector.load %arg3[%c1, %c0_5, %c0_6] : memref<9x1x128xf32, #tpu.memory_space<vmem>>, vector<1x1x128xf32>
    %15 = vector.shape_cast %14 : vector<1x1x128xf32> to vector<1x128xf32>
    %16 = vector.shape_cast %15 : vector<1x128xf32> to vector<1x1x128xf32>
    %17 = vector.broadcast %16 : vector<1x1x128xf32> to vector<8x8x128xf32>
    %18 = arith.mulf %13, %17 : vector<8x8x128xf32>
    %19 = arith.addf %12, %18 : vector<8x8x128xf32>
    %20 = vector.extract_strided_slice %6 {offsets = [0, 2, 0], sizes = [8, 8, 128], strides = [1, 1, 1]} : vector<8x10x128xf32> to vector<8x8x128xf32>
    %c2 = arith.constant 2 : index
    %c0_7 = arith.constant 0 : index
    %c0_8 = arith.constant 0 : index
    %21 = vector.load %arg3[%c2, %c0_7, %c0_8] : memref<9x1x128xf32, #tpu.memory_space<vmem>>, vector<1x1x128xf32>
    %22 = vector.shape_cast %21 : vector<1x1x128xf32> to vector<1x128xf32>
    %23 = vector.shape_cast %22 : vector<1x128xf32> to vector<1x1x128xf32>
    %24 = vector.broadcast %23 : vector<1x1x128xf32> to vector<8x8x128xf32>
    %25 = arith.mulf %20, %24 : vector<8x8x128xf32>
    %26 = arith.addf %19, %25 : vector<8x8x128xf32>
    %c1_i32 = arith.constant 1 : i32
    %27 = arith.addi %1, %c1_i32 : i32
    %c0_9 = arith.constant 0 : index
    %28 = arith.index_cast %27 : i32 to index
    %c0_10 = arith.constant 0 : index
    %c0_11 = arith.constant 0 : index
    %29 = vector.load %arg2[%c0_9, %28, %c0_10, %c0_11] : memref<1x10x10x128xbf16, #tpu.memory_space<vmem>>, vector<1x8x10x128xbf16>
    %30 = vector.shape_cast %29 : vector<1x8x10x128xbf16> to vector<8x10x128xbf16>
    %31 = arith.extf %30 : vector<8x10x128xbf16> to vector<8x10x128xf32>
    %32 = vector.extract_strided_slice %31 {offsets = [0, 0, 0], sizes = [8, 8, 128], strides = [1, 1, 1]} : vector<8x10x128xf32> to vector<8x8x128xf32>
    %c3 = arith.constant 3 : index
    %c0_12 = arith.constant 0 : index
    %c0_13 = arith.constant 0 : index
    %33 = vector.load %arg3[%c3, %c0_12, %c0_13] : memref<9x1x128xf32, #tpu.memory_space<vmem>>, vector<1x1x128xf32>
    %34 = vector.shape_cast %33 : vector<1x1x128xf32> to vector<1x128xf32>
    %35 = vector.shape_cast %34 : vector<1x128xf32> to vector<1x1x128xf32>
    %36 = vector.broadcast %35 : vector<1x1x128xf32> to vector<8x8x128xf32>
    %37 = arith.mulf %32, %36 : vector<8x8x128xf32>
    %38 = arith.addf %26, %37 : vector<8x8x128xf32>
    %39 = vector.extract_strided_slice %31 {offsets = [0, 1, 0], sizes = [8, 8, 128], strides = [1, 1, 1]} : vector<8x10x128xf32> to vector<8x8x128xf32>
    %c4 = arith.constant 4 : index
    %c0_14 = arith.constant 0 : index
    %c0_15 = arith.constant 0 : index
    %40 = vector.load %arg3[%c4, %c0_14, %c0_15] : memref<9x1x128xf32, #tpu.memory_space<vmem>>, vector<1x1x128xf32>
    %41 = vector.shape_cast %40 : vector<1x1x128xf32> to vector<1x128xf32>
    %42 = vector.shape_cast %41 : vector<1x128xf32> to vector<1x1x128xf32>
    %43 = vector.broadcast %42 : vector<1x1x128xf32> to vector<8x8x128xf32>
    %44 = arith.mulf %39, %43 : vector<8x8x128xf32>
    %45 = arith.addf %38, %44 : vector<8x8x128xf32>
    %46 = vector.extract_strided_slice %31 {offsets = [0, 2, 0], sizes = [8, 8, 128], strides = [1, 1, 1]} : vector<8x10x128xf32> to vector<8x8x128xf32>
    %c5 = arith.constant 5 : index
    %c0_16 = arith.constant 0 : index
    %c0_17 = arith.constant 0 : index
    %47 = vector.load %arg3[%c5, %c0_16, %c0_17] : memref<9x1x128xf32, #tpu.memory_space<vmem>>, vector<1x1x128xf32>
    %48 = vector.shape_cast %47 : vector<1x1x128xf32> to vector<1x128xf32>
    %49 = vector.shape_cast %48 : vector<1x128xf32> to vector<1x1x128xf32>
    %50 = vector.broadcast %49 : vector<1x1x128xf32> to vector<8x8x128xf32>
    %51 = arith.mulf %46, %50 : vector<8x8x128xf32>
    %52 = arith.addf %45, %51 : vector<8x8x128xf32>
    %c2_i32 = arith.constant 2 : i32
    %53 = arith.addi %1, %c2_i32 : i32
    %c0_18 = arith.constant 0 : index
    %54 = arith.index_cast %53 : i32 to index
    %c0_19 = arith.constant 0 : index
    %c0_20 = arith.constant 0 : index
    %55 = vector.load %arg2[%c0_18, %54, %c0_19, %c0_20] : memref<1x10x10x128xbf16, #tpu.memory_space<vmem>>, vector<1x8x10x128xbf16>
    %56 = vector.shape_cast %55 : vector<1x8x10x128xbf16> to vector<8x10x128xbf16>
    %57 = arith.extf %56 : vector<8x10x128xbf16> to vector<8x10x128xf32>
    %58 = vector.extract_strided_slice %57 {offsets = [0, 0, 0], sizes = [8, 8, 128], strides = [1, 1, 1]} : vector<8x10x128xf32> to vector<8x8x128xf32>
    %c6 = arith.constant 6 : index
    %c0_21 = arith.constant 0 : index
    %c0_22 = arith.constant 0 : index
    %59 = vector.load %arg3[%c6, %c0_21, %c0_22] : memref<9x1x128xf32, #tpu.memory_space<vmem>>, vector<1x1x128xf32>
    %60 = vector.shape_cast %59 : vector<1x1x128xf32> to vector<1x128xf32>
    %61 = vector.shape_cast %60 : vector<1x128xf32> to vector<1x1x128xf32>
    %62 = vector.broadcast %61 : vector<1x1x128xf32> to vector<8x8x128xf32>
    %63 = arith.mulf %58, %62 : vector<8x8x128xf32>
    %64 = arith.addf %52, %63 : vector<8x8x128xf32>
    %65 = vector.extract_strided_slice %57 {offsets = [0, 1, 0], sizes = [8, 8, 128], strides = [1, 1, 1]} : vector<8x10x128xf32> to vector<8x8x128xf32>
    %c7 = arith.constant 7 : index
    %c0_23 = arith.constant 0 : index
    %c0_24 = arith.constant 0 : index
    %66 = vector.load %arg3[%c7, %c0_23, %c0_24] : memref<9x1x128xf32, #tpu.memory_space<vmem>>, vector<1x1x128xf32>
    %67 = vector.shape_cast %66 : vector<1x1x128xf32> to vector<1x128xf32>
    %68 = vector.shape_cast %67 : vector<1x128xf32> to vector<1x1x128xf32>
    %69 = vector.broadcast %68 : vector<1x1x128xf32> to vector<8x8x128xf32>
    %70 = arith.mulf %65, %69 : vector<8x8x128xf32>
    %71 = arith.addf %64, %70 : vector<8x8x128xf32>
    %72 = vector.extract_strided_slice %57 {offsets = [0, 2, 0], sizes = [8, 8, 128], strides = [1, 1, 1]} : vector<8x10x128xf32> to vector<8x8x128xf32>
    %c8 = arith.constant 8 : index
    %c0_25 = arith.constant 0 : index
    %c0_26 = arith.constant 0 : index
    %73 = vector.load %arg3[%c8, %c0_25, %c0_26] : memref<9x1x128xf32, #tpu.memory_space<vmem>>, vector<1x1x128xf32>
    %74 = vector.shape_cast %73 : vector<1x1x128xf32> to vector<1x128xf32>
    %75 = vector.shape_cast %74 : vector<1x128xf32> to vector<1x1x128xf32>
    %76 = vector.broadcast %75 : vector<1x1x128xf32> to vector<8x8x128xf32>
    %77 = arith.mulf %72, %76 : vector<8x8x128xf32>
    %78 = arith.addf %71, %77 : vector<8x8x128xf32>
    %c0_27 = arith.constant 0 : index
    %c0_28 = arith.constant 0 : index
    %79 = vector.load %arg4[%c0_27, %c0_28] : memref<1x128xf32, #tpu.memory_space<vmem>>, vector<1x128xf32>
    %80 = vector.shape_cast %79 : vector<1x128xf32> to vector<1x1x128xf32>
    %81 = vector.broadcast %80 : vector<1x1x128xf32> to vector<8x8x128xf32>
    %82 = arith.addf %78, %81 : vector<8x8x128xf32>
    %cst = arith.constant 0.000000e+00 : f32
    %83 = vector.broadcast %cst : f32 to vector<8x8x128xf32>
    %84 = arith.maximumf %82, %83 : vector<8x8x128xf32>
    %85 = arith.truncf %84 : vector<8x8x128xf32> to vector<8x8x128xbf16>
    %c0_29 = arith.constant 0 : index
    %c0_30 = arith.constant 0 : index
    %c0_31 = arith.constant 0 : index
    %c0_32 = arith.constant 0 : index
    %86 = vector.load %arg5[%c0_29, %c0_30, %c0_31, %c0_32] : memref<1x8x8x128xbf16, #tpu.memory_space<vmem>>, vector<1x8x8x128xbf16>
    %87 = vector.shape_cast %86 : vector<1x8x8x128xbf16> to vector<8x8x128xbf16>
    %88 = vector.shape_cast %85 : vector<8x8x128xbf16> to vector<1x8x8x128xbf16>
    tpu.vector_store %arg5[%c0_29, %c0_30, %c0_31, %c0_32], %88 {strides = array<i32>} : memref<1x8x8x128xbf16, #tpu.memory_space<vmem>>, vector<1x8x8x128xbf16>,
    return
  }
  func.func @transform_0(%arg0: i32, %arg1: i32) -> (i32, i32, i32, i32) {
    %c0_i32 = arith.constant 0 : i32
    %c0_i32_0 = arith.constant 0 : i32
    %c0_i32_1 = arith.constant 0 : i32
    %c0_i32_2 = arith.constant 0 : i32
    return %arg0, %c0_i32, %c0_i32_0, %c0_i32_1 : i32, i32, i32, i32
  }
  func.func @transform_1(%arg0: i32, %arg1: i32) -> (i32, i32, i32) {
    %c0_i32 = arith.constant 0 : i32
    %c0_i32_0 = arith.constant 0 : i32
    %c0_i32_1 = arith.constant 0 : i32
    %c0_i32_2 = arith.constant 0 : i32
    return %c0_i32, %c0_i32_0, %c0_i32_1 : i32, i32, i32
  }
  func.func @transform_2(%arg0: i32, %arg1: i32) -> (i32, i32) {
    %c0_i32 = arith.constant 0 : i32
    %c0_i32_0 = arith.constant 0 : i32
    %c0_i32_1 = arith.constant 0 : i32
    return %c0_i32, %c0_i32_0 : i32, i32
  }
  func.func @transform_3(%arg0: i32, %arg1: i32) -> (i32, i32, i32, i32) {
    %c0_i32 = arith.constant 0 : i32
    %c0_i32_0 = arith.constant 0 : i32
    %c0_i32_1 = arith.constant 0 : i32
    return %arg0, %arg1, %c0_i32, %c0_i32_0 : i32, i32, i32, i32
  }
}

module attributes {stable_mosaic.version = 11 : i64} {
  func.func @_head_kernel(%arg0: i32, %arg1: memref<128x128xbf16, #tpu.memory_space<vmem>>, %arg2: memref<128x128xbf16, #tpu.memory_space<vmem>>, %arg3: memref<128x128xbf16, #tpu.memory_space<vmem>>, %arg4: memref<128x128xbf16, #tpu.memory_space<vmem>>, %arg5: memref<1x128xf32, #tpu.memory_space<vmem>>, %arg6: memref<128x128xbf16, #tpu.memory_space<vmem>>) attributes {dimension_semantics = [#tpu.dimension_semantics<parallel>], iteration_bounds = array<i64: 1>, scalar_prefetch = 0 : i64, scratch_operands = 0 : i64, tpu.core_type = #tpu.core_type<tc>, window_params = [{transform_indices = @transform_0, window_bounds = array<i64: 128, 128>}, {transform_indices = @transform_1, window_bounds = array<i64: 128, 128>}, {pipeline_mode = #tpu.pipeline_mode<synchronous>, transform_indices = @transform_2, window_bounds = array<i64: 128, 128>}, {pipeline_mode = #tpu.pipeline_mode<synchronous>, transform_indices = @transform_3, window_bounds = array<i64: 128, 128>}, {pipeline_mode = #tpu.pipeline_mode<synchronous>, transform_indices = @transform_4, window_bounds = array<i64: 1, 128>}, {transform_indices = @transform_5, window_bounds = array<i64: 128, 128>}]} {
    %c0 = arith.constant 0 : index
    %c0_0 = arith.constant 0 : index
    %0 = vector.load %arg1[%c0, %c0_0] : memref<128x128xbf16, #tpu.memory_space<vmem>>, vector<128x128xbf16>
    %c0_1 = arith.constant 0 : index
    %c0_2 = arith.constant 0 : index
    %1 = vector.load %arg3[%c0_1, %c0_2] : memref<128x128xbf16, #tpu.memory_space<vmem>>, vector<128x128xbf16>
    %cst = arith.constant dense<0.000000e+00> : vector<128x128xf32>
    %2 = tpu.matmul %0, %1, %cst {dimension_numbers = #tpu.dot_dimension_numbers<[1], [0], [0], [1], [0, 0, 1, 1], [], []>} : vector<128x128xbf16>, vector<128x128xbf16>, vector<128x128xf32> -> vector<128x128xf32>
    %c0_3 = arith.constant 0 : index
    %c0_4 = arith.constant 0 : index
    %3 = vector.load %arg2[%c0_3, %c0_4] : memref<128x128xbf16, #tpu.memory_space<vmem>>, vector<128x128xbf16>
    %c0_5 = arith.constant 0 : index
    %c0_6 = arith.constant 0 : index
    %4 = vector.load %arg4[%c0_5, %c0_6] : memref<128x128xbf16, #tpu.memory_space<vmem>>, vector<128x128xbf16>
    %cst_7 = arith.constant dense<0.000000e+00> : vector<128x128xf32>
    %5 = tpu.matmul %3, %4, %cst_7 {dimension_numbers = #tpu.dot_dimension_numbers<[1], [0], [0], [1], [0, 0, 1, 1], [], []>} : vector<128x128xbf16>, vector<128x128xbf16>, vector<128x128xf32> -> vector<128x128xf32>
    %6 = arith.addf %2, %5 : vector<128x128xf32>
    %c0_8 = arith.constant 0 : index
    %c0_9 = arith.constant 0 : index
    %7 = vector.load %arg5[%c0_8, %c0_9] : memref<1x128xf32, #tpu.memory_space<vmem>>, vector<1x128xf32>
    %8 = vector.broadcast %7 : vector<1x128xf32> to vector<128x128xf32>
    %9 = arith.addf %6, %8 : vector<128x128xf32>
    %cst_10 = arith.constant 0.000000e+00 : f32
    %10 = vector.broadcast %cst_10 : f32 to vector<128x128xf32>
    %11 = arith.maximumf %9, %10 : vector<128x128xf32>
    %12 = arith.truncf %11 : vector<128x128xf32> to vector<128x128xbf16>
    %c0_11 = arith.constant 0 : index
    %c0_12 = arith.constant 0 : index
    %13 = vector.load %arg6[%c0_11, %c0_12] : memref<128x128xbf16, #tpu.memory_space<vmem>>, vector<128x128xbf16>
    tpu.vector_store %arg6[%c0_11, %c0_12], %12 {strides = array<i32>} : memref<128x128xbf16, #tpu.memory_space<vmem>>, vector<128x128xbf16>,
    return
  }
  func.func @transform_0(%arg0: i32) -> (i32, i32) {
    %c0_i32 = arith.constant 0 : i32
    %c0_i32_0 = arith.constant 0 : i32
    return %arg0, %c0_i32 : i32, i32
  }
  func.func @transform_1(%arg0: i32) -> (i32, i32) {
    %c0_i32 = arith.constant 0 : i32
    %c0_i32_0 = arith.constant 0 : i32
    return %arg0, %c0_i32 : i32, i32
  }
  func.func @transform_2(%arg0: i32) -> (i32, i32) {
    %c0_i32 = arith.constant 0 : i32
    %c0_i32_0 = arith.constant 0 : i32
    %c0_i32_1 = arith.constant 0 : i32
    return %c0_i32, %c0_i32_0 : i32, i32
  }
  func.func @transform_3(%arg0: i32) -> (i32, i32) {
    %c0_i32 = arith.constant 0 : i32
    %c0_i32_0 = arith.constant 0 : i32
    %c0_i32_1 = arith.constant 0 : i32
    return %c0_i32, %c0_i32_0 : i32, i32
  }
  func.func @transform_4(%arg0: i32) -> (i32, i32) {
    %c0_i32 = arith.constant 0 : i32
    %c0_i32_0 = arith.constant 0 : i32
    %c0_i32_1 = arith.constant 0 : i32
    return %c0_i32, %c0_i32_0 : i32, i32
  }
  func.func @transform_5(%arg0: i32) -> (i32, i32) {
    %c0_i32 = arith.constant 0 : i32
    %c0_i32_0 = arith.constant 0 : i32
    return %arg0, %c0_i32 : i32, i32
  }
}

</mosaic_0001>

<bundles_post_ra>
// kernel: gelayer_s2_forward.9
= control target key start
LH: loop header
LB: loop body
LE: loop exit
PB: predicated region body
PF: predicated region fallthrough
CT: control target
= control target key end

     0   :  { %s841_s3 = inlined_call_operand.vmem [shape: bf16[128,128], index: 3, kind: input, shape index: {}]   ;;  %s842_s2 = inlined_call_operand.vmem [shape: bf16[128,128], index: 2, kind: input, shape index: {}]   ;;  %s843_s1 = inlined_call_operand.vmem [shape: bf16[128,128], index: 1, kind: input, shape index: {}]   ;;  %s844_s0 = inlined_call_operand.vmem [shape: bf16[128,128], index: 0, kind: input, shape index: {}]   ;;  %s845_s4 = inlined_call_operand.vmem [shape: f32[1,128], index: 4, kind: input, shape index: {}]   ;;  %s846_s5 = inlined_call_operand.vmem [shape: bf16[128,128], index: 5, kind: output, shape index: {}]  }
   0x1   :  { %v605_v0 = vld [vmem:[%s841_s3 + $0x38] sm:$0xff]  ;;  %v604_v2 = vld [vmem:[%s841_s3 + $0x30] sm:$0xff]  ;;  %v603_v4 = vld [vmem:[%s841_s3 + $0x28] sm:$0xff] }
   0x2   :  { %v589_v1 = vld [vmem:[%s842_s2 + $0x38] sm:$0xff]  ;;  %180 = vmatpush.bf16.msra.mxu0 %v605_v0  ;;  %653 = vmatpush.bf16.msra.mxu2 %v605_v0  ;;  %v588_v3 = vld [vmem:[%s842_s2 + $0x30] sm:$0xff]  ;;  %v587_v5 = vld [vmem:[%s842_s2 + $0x28] sm:$0xff] }
   0x3   :  { %325 = vmatpush.bf16.msra.mxu1 %v589_v1  ;;  %661 = vmatpush.bf16.msra.mxu3 %v589_v1  ;;  %v602_v6 = vld [vmem:[%s841_s3 + $0x20] sm:$0xff]  ;;  %v601_v8 = vld [vmem:[%s841_s3 + $0x18] sm:$0xff]  ;;  %v600_v10 = vld [vmem:[%s841_s3 + $0x10] sm:$0xff] }
   0x4   :  { %v586_v7 = vld [vmem:[%s842_s2 + $0x20] sm:$0xff]  ;;  %v585_v9 = vld [vmem:[%s842_s2 + $0x18] sm:$0xff]  ;;  %v584_v11 = vld [vmem:[%s842_s2 + $0x10] sm:$0xff] }
   0x5   :  { %v599_v12 = vld [vmem:[%s841_s3 + $0x8] sm:$0xff]  ;;  %v598_v14 = vld [vmem:[%s841_s3] sm:$0xff]  ;;  %v592_v24 = vld [vmem:[%s843_s1 + $0x10] sm:$0xff] }
   0x6   :  { %181 = vmatpush.bf16.msra.mxu0 %v604_v2  ;;  %654 = vmatpush.bf16.msra.mxu2 %v604_v2  ;;  %v583_v13 = vld [vmem:[%s842_s2 + $0x8] sm:$0xff]  ;;  %v582_v15 = vld [vmem:[%s842_s2] sm:$0xff]  ;;  %v596_v25 = vld [vmem:[%s843_s1 + $0x30] sm:$0xff] }
   0x7   :  { %326 = vmatpush.bf16.msra.mxu1 %v588_v3  ;;  %662 = vmatpush.bf16.msra.mxu3 %v588_v3  ;;  %v590_v16 = vld [vmem:[%s843_s1] sm:$0xff]  ;;  %v591_v20 = vld [vmem:[%s843_s1 + $0x8] sm:$0xff]  ;;  %v576_v26 = vld [vmem:[%s844_s0 + $0x10] sm:$0xff] }
   0x8   :  { %v594_v17 = vld [vmem:[%s843_s1 + $0x20] sm:$0xff]  ;;  %v595_v21 = vld [vmem:[%s843_s1 + $0x28] sm:$0xff]  ;;  %v580_v27 = vld [vmem:[%s844_s0 + $0x30] sm:$0xff] }
   0x9   :  { %v574_v18 = vld [vmem:[%s844_s0] sm:$0xff]  ;;  %v575_v22 = vld [vmem:[%s844_s0 + $0x8] sm:$0xff]  ;;  %v593_v28 = vld [vmem:[%s843_s1 + $0x18] sm:$0xff] }
   0xa   :  { %182 = vmatpush.bf16.msra.mxu0 %v603_v4  ;;  %655 = vmatpush.bf16.msra.mxu2 %v603_v4  ;;  %v578_v19 = vld [vmem:[%s844_s0 + $0x20] sm:$0xff]  ;;  %v579_v23 = vld [vmem:[%s844_s0 + $0x28] sm:$0xff]  ;;  %v597_v29 = vld [vmem:[%s843_s1 + $0x38] sm:$0xff] }
   0xb   :  { %327 = vmatpush.bf16.msra.mxu1 %v587_v5  ;;  %663 = vmatpush.bf16.msra.mxu3 %v587_v5  ;;  %v577_v30 = vld [vmem:[%s844_s0 + $0x18] sm:$0xff]  ;;  %v799_v35 = vld [vmem:[%s845_s4] ss:$0 sm:$0xff] }
   0xc   :  { %v581_v31 = vld [vmem:[%s844_s0 + $0x38] sm:$0xff] }
   0xe   :  { %183 = vmatpush.bf16.msra.mxu0 %v602_v6  ;;  %656 = vmatpush.bf16.msra.mxu2 %v602_v6 }
   0xf   :  { %328 = vmatpush.bf16.msra.mxu1 %v586_v7  ;;  %664 = vmatpush.bf16.msra.mxu3 %v586_v7 }
  0x12   :  { %184 = vmatpush.bf16.msra.mxu0 %v601_v8  ;;  %657 = vmatpush.bf16.msra.mxu2 %v601_v8 }
  0x13   :  { %329 = vmatpush.bf16.msra.mxu1 %v585_v9  ;;  %665 = vmatpush.bf16.msra.mxu3 %v585_v9 }
  0x16   :  { %185 = vmatpush.bf16.msra.mxu0 %v600_v10  ;;  %658 = vmatpush.bf16.msra.mxu2 %v600_v10 }
  0x17   :  { %330 = vmatpush.bf16.msra.mxu1 %v584_v11  ;;  %666 = vmatpush.bf16.msra.mxu3 %v584_v11 }
  0x1a   :  { %186 = vmatpush.bf16.msra.mxu0 %v599_v12  ;;  %659 = vmatpush.bf16.msra.mxu2 %v599_v12 }
  0x1b   :  { %331 = vmatpush.bf16.msra.mxu1 %v583_v13  ;;  %667 = vmatpush.bf16.msra.mxu3 %v583_v13 }
  0x1e   :  { %187 = vmatpush.bf16.msra.mxu0 %v598_v14  ;;  %660 = vmatpush.bf16.msra.mxu2 %v598_v14 }
  0x1f   :  { %332 = vmatpush.bf16.msra.mxu1 %v582_v15  ;;  %668 = vmatpush.bf16.msra.mxu3 %v582_v15 }
  0x21   :  { %188 = vmatmul.bf16.vlgmr.msra.gmra.mxu0 %v590_v16  ;;  %208 = vmatmul.bf16.vlgmr.msra.gmra.mxu2 %v594_v17 }
  0x22   :  { %333 = vmatmul.bf16.vlgmr.msra.gmra.mxu1 %v574_v18  ;;  %353 = vmatmul.bf16.vlgmr.msra.gmra.mxu3 %v578_v19 }
  0x31   :  { %193 = vmatmul.bf16.gmra.mxu0 %v591_v20  ;;  %213 = vmatmul.bf16.gmra.mxu2 %v595_v21 }
  0x32   :  { %338 = vmatmul.bf16.gmra.mxu1 %v575_v22  ;;  %358 = vmatmul.bf16.gmra.mxu3 %v579_v23 }
  0x41   :  { %198 = vmatmul.bf16.gmra.mxu0 %v592_v24  ;;  %218 = vmatmul.bf16.gmra.mxu2 %v596_v25 }
  0x42   :  { %343 = vmatmul.bf16.gmra.mxu1 %v576_v26  ;;  %363 = vmatmul.bf16.gmra.mxu3 %v580_v27 }
  0x51   :  { %203 = vmatmul.bf16.gmra.mxu0 %v593_v28  ;;  %223 = vmatmul.bf16.gmra.mxu2 %v597_v29 }
  0x52   :  { %348 = vmatmul.bf16.gmra.mxu1 %v577_v30  ;;  %368 = vmatmul.bf16.gmra.mxu3 %v581_v31 }
  0x9e   :  { %v189_v32 = vpop.f32.mrf.mxu0 }
  0x9f   :  { %v334_v33 = vpop.f32.mrf.mxu1 }
  0xa0   :  { %v335_v34 = vadd.f32 %v334_v33, %v189_v32 }
  0xa2   :  { %v378_v40 = vadd.f32 %v799_v35, %v335_v34 }
  0xa4   :  { %v209_v36 = vpop.f32.mrf.mxu2  ;;  %v394_v44 = vmax.f32 %v378_v40, 0.0 }
  0xa5   :  { %v354_v37 = vpop.f32.mrf.mxu3 }
  0xa6   :  { %v191_v38 = vpop.f32.mrf.mxu0  ;;  %v355_v42 = vadd.f32 %v354_v37, %v209_v36 }
  0xa7   :  { %v336_v39 = vpop.f32.mrf.mxu1 }
  0xa8   :  { %v337_v41 = vadd.f32 %v336_v39, %v191_v38  ;;  %v386_v48 = vadd.f32 %v799_v35, %v355_v42 }
  0xaa   :  { %v379_v43 = vadd.f32 %v799_v35, %v337_v41  ;;  %v402_v54 = vmax.f32 %v386_v48, 0.0 }
  0xac   :  { %v395_v45 = vmax.f32 %v379_v43, 0.0  ;;  %v211_v46 = vpop.f32.mrf.mxu2 }
  0xad   :  { %v356_v47 = vpop.f32.mrf.mxu3 }
  0xae   :  { %v609_v49 = vpack.c.bf16 %v395_v45, %v394_v44  ;;  %v357_v50 = vadd.f32 %v356_v47, %v211_v46  ;;  %v194_v51 = vpop.f32.mrf.mxu0 }
  0xaf   :  { %v339_v52 = vpop.f32.mrf.mxu1 }
  0xb0   :  { %610 = vst [vmem:[%s846_s5] sm:$0xff] %v609_v49   ;;  %v387_v53 = vadd.f32 %v799_v35, %v357_v50  ;;  %v340_v57 = vadd.f32 %v339_v52, %v194_v51 }
  0xb2   :  { %v403_v55 = vmax.f32 %v387_v53, 0.0  ;;  %v380_v62 = vadd.f32 %v799_v35, %v340_v57 }
  0xb4   :  { %v629_v56 = vpack.c.bf16 %v403_v55, %v402_v54  ;;  %v214_v58 = vpop.f32.mrf.mxu2  ;;  %v396_v2 = vmax.f32 %v380_v62, 0.0 }
  0xb5   :  { %v359_v59 = vpop.f32.mrf.mxu3 }
  0xb6   :  { %649 = vst [vmem:[%s846_s5 + $0x20] sm:$0xff] %v629_v56   ;;  %v196_v60 = vpop.f32.mrf.mxu0  ;;  %v360_v0 = vadd.f32 %v359_v59, %v214_v58 }
  0xb7   :  { %v341_v61 = vpop.f32.mrf.mxu1 }
  0xb8   :  { %v342_v63 = vadd.f32 %v341_v61, %v196_v60  ;;  %v388_v6 = vadd.f32 %v799_v35, %v360_v0 }
  0xba   :  { %v381_v1 = vadd.f32 %v799_v35, %v342_v63  ;;  %v404_v12 = vmax.f32 %v388_v6, 0.0 }
  0xbc   :  { %v397_v3 = vmax.f32 %v381_v1, 0.0  ;;  %v216_v4 = vpop.f32.mrf.mxu2 }
  0xbd   :  { %v361_v5 = vpop.f32.mrf.mxu3 }
  0xbe   :  { %v614_v7 = vpack.c.bf16 %v397_v3, %v396_v2  ;;  %v362_v8 = vadd.f32 %v361_v5, %v216_v4  ;;  %v199_v9 = vpop.f32.mrf.mxu0 }
  0xbf   :  { %v344_v10 = vpop.f32.mrf.mxu1 }
  0xc0   :  { %646 = vst [vmem:[%s846_s5 + $0x8] sm:$0xff] %v614_v7   ;;  %v389_v11 = vadd.f32 %v799_v35, %v362_v8  ;;  %v345_v15 = vadd.f32 %v344_v10, %v199_v9 }
  0xc2   :  { %v405_v13 = vmax.f32 %v389_v11, 0.0  ;;  %v382_v20 = vadd.f32 %v799_v35, %v345_v15 }
  0xc4   :  { %v634_v14 = vpack.c.bf16 %v405_v13, %v404_v12  ;;  %v219_v16 = vpop.f32.mrf.mxu2  ;;  %v398_v24 = vmax.f32 %v382_v20, 0.0 }
  0xc5   :  { %v364_v17 = vpop.f32.mrf.mxu3 }
  0xc6   :  { %650 = vst [vmem:[%s846_s5 + $0x28] sm:$0xff] %v634_v14   ;;  %v201_v18 = vpop.f32.mrf.mxu0  ;;  %v365_v22 = vadd.f32 %v364_v17, %v219_v16 }
  0xc7   :  { %v346_v19 = vpop.f32.mrf.mxu1 }
  0xc8   :  { %v347_v21 = vadd.f32 %v346_v19, %v201_v18  ;;  %v390_v28 = vadd.f32 %v799_v35, %v365_v22 }
  0xca   :  { %v383_v23 = vadd.f32 %v799_v35, %v347_v21  ;;  %v406_v34 = vmax.f32 %v390_v28, 0.0 }
  0xcc   :  { %v399_v25 = vmax.f32 %v383_v23, 0.0  ;;  %v221_v26 = vpop.f32.mrf.mxu2 }
  0xcd   :  { %v366_v27 = vpop.f32.mrf.mxu3 }
  0xce   :  { %v619_v29 = vpack.c.bf16 %v399_v25, %v398_v24  ;;  %v367_v30 = vadd.f32 %v366_v27, %v221_v26  ;;  %v204_v31 = vpop.f32.mrf.mxu0 }
  0xcf   :  { %v349_v32 = vpop.f32.mrf.mxu1 }
  0xd0   :  { %647 = vst [vmem:[%s846_s5 + $0x10] sm:$0xff] %v619_v29   ;;  %v391_v33 = vadd.f32 %v799_v35, %v367_v30  ;;  %v350_v38 = vadd.f32 %v349_v32, %v204_v31 }
  0xd2   :  { %v407_v36 = vmax.f32 %v391_v33, 0.0  ;;  %v384_v43 = vadd.f32 %v799_v35, %v350_v38 }
  0xd4   :  { %v639_v37 = vpack.c.bf16 %v407_v36, %v406_v34  ;;  %v224_v39 = vpop.f32.mrf.mxu2  ;;  %v400_v47 = vmax.f32 %v384_v43, 0.0 }
  0xd5   :  { %v369_v40 = vpop.f32.mrf.mxu3 }
  0xd6   :  { %651 = vst [vmem:[%s846_s5 + $0x30] sm:$0xff] %v639_v37   ;;  %v206_v41 = vpop.f32.mrf.mxu0  ;;  %v370_v45 = vadd.f32 %v369_v40, %v224_v39 }
  0xd7   :  { %v351_v42 = vpop.f32.mrf.mxu1 }
  0xd8   :  { %v352_v44 = vadd.f32 %v351_v42, %v206_v41  ;;  %v392_v51 = vadd.f32 %v799_v35, %v370_v45 }
  0xda   :  { %v385_v46 = vadd.f32 %v799_v35, %v352_v44  ;;  %v408_v55 = vmax.f32 %v392_v51, 0.0 }
  0xdc   :  { %v401_v48 = vmax.f32 %v385_v46, 0.0  ;;  %v226_v49 = vpop.f32.mrf.mxu2 }
  0xdd   :  { %v371_v50 = vpop.f32.mrf.mxu3 }
  0xde   :  { %v624_v52 = vpack.c.bf16 %v401_v48, %v400_v47  ;;  %v372_v53 = vadd.f32 %v371_v50, %v226_v49 }
  0xe0   :  { %648 = vst [vmem:[%s846_s5 + $0x18] sm:$0xff] %v624_v52   ;;  %v393_v54 = vadd.f32 %v799_v35, %v372_v53 }
  0xe2   :  { %v409_v56 = vmax.f32 %v393_v54, 0.0 }
  0xe4   :  { %v644_v57 = vpack.c.bf16 %v409_v56, %v408_v55 }
  0xe6   :  { %652 = vst [vmem:[%s846_s5 + $0x38] sm:$0xff] %v644_v57  }

// kernel: gelayer_s2_forward.6
= control target key start
LH: loop header
LB: loop body
LE: loop exit
PB: predicated region body
PF: predicated region fallthrough
CT: control target
= control target key end

     0   :  { %s1067_s15 = smov 0   ;;  %s1069_s16 = smov 0   ;;  %s1695_s0 = inlined_call_operand.vmem [shape: bf16[2,9,2,9,128], index: 0, kind: input, shape index: {}]   ;;  %s1696_s1 = inlined_call_operand.vmem [shape: bf16[2,9,2,9,128], index: 1, kind: input, shape index: {}]   ;;  %s1697_s2 = inlined_call_operand.vmem [shape: f32[9,1,128], index: 2, kind: input, shape index: {}]   ;;  %s1698_s3 = inlined_call_operand.vmem [shape: f32[1,128], index: 3, kind: input, shape index: {}]   ;;  %s1699_s4 = inlined_call_operand.vmem [shape: bf16[2,8,8,128], index: 4, kind: output, shape index: {}]  }
   0x1   :  { %s1071_s17 = smov 0  }
   0x2 LB: > { %s26_s18 = sadd.s32 1, %s1036_s16  ;;  %p896_p0 = scmp.ge.s32.totalorder %s1040_s17, 1  ;;  %s1040_s17 = sphi %s1071_s17, %s14_s17   ;;  %s1036_s16 = sphi %s1069_s16, %s1873_s16   ;;  %s1032_s15 = sphi %s1067_s15, %s1872_s15  }
   0x3   : > { %p28_p1 = scmp.ge.s32.totalorder %s26_s18, 2  ;;  %p186_p2 = scmp.lt.s32.totalorder %s1040_s17, 3 }
   0x5   : > { %s1875_s18 = smov (%p28_p1, %s26_s18), 0  ;;  %p187_p3 = pnand %p896_p0, %p186_p2 }
   0x7   : > { %190 = sbr.rel (%p187_p3) target bundleno = 125 (0x7d), region = 36 }
   0xc   : > { %p221_p4 = scmp.lt.s32.totalorder %s1032_s15, 1  ;;  %v1098_v0 = vld [vmem:[%s1697_s2] ss:$0 sm:$0xff]  ;;  %v1187_v37 = vld [vmem:[%s1697_s2 + $0x2] ss:$0 sm:$0xff]  ;;  %vm472_vm0 = vcmask 1046528  }
   0xd   : > { %v1330_v28 = vld [vmem:[%s1697_s2 + $0x1] ss:$0 sm:$0xff] }
   0xe   : > { %s1877_s15 = smov (!%p221_p4, %s1032_s15), 1 }
   0xf   : > { %s983_s19 = smul.u32 144, %s1877_s15  ;;  %s959_s24 = sshll.u32 %s1877_s15, 5 }
  0x10   : > { %s239_s27 = scalar_lea.vmem %s1699_s4, %s959_s24 }
  0x11   : > { %s1093_s22 = scalar_lea.vmem %s1695_s0, %s983_s19  ;;  %s1313_s29 = scalar_lea.vmem %s1696_s1, %s983_s19 }
  0x12   : > { %v1101_v1 = vld [vmem:[%s1093_s22] sm:$0xf]  ;;  %v1104_v2 = vld [vmem:[%s1093_s22 + $0x4] sm:$0x1]  ;;  %v1107_v3 = vld [vmem:[%s1093_s22 + $0x10] sm:$0xf] }
  0x13   : > { %v1110_v4 = vld [vmem:[%s1093_s22 + $0x14] sm:$0x1]  ;;  %v1113_v5 = vld [vmem:[%s1093_s22 + $0x20] sm:$0xf]  ;;  %v1116_v6 = vld [vmem:[%s1093_s22 + $0x24] sm:$0x1]  ;;  %v261_v7 = vunpack.c.l.bf16 %v1101_v1  ;;  %v263_v8 = vunpack.c.l.bf16 %v1107_v3  ;;  %v262_v12 = vunpack.c.l.bf16 %v1104_v2 }
  0x14   : > { %v1121_v9 = vld [vmem:[%s1093_s22 + $0x30] sm:$0xf]  ;;  %v1124_v10 = vld [vmem:[%s1093_s22 + $0x34] sm:$0x1]  ;;  %v1127_v11 = vld [vmem:[%s1093_s22 + $0x40] sm:$0xf]  ;;  %v264_v13 = vunpack.c.l.bf16 %v1110_v4  ;;  %v265_v14 = vunpack.c.l.bf16 %v1113_v5  ;;  %v1765_v38 = vunpack.c.l.bf16 %v1116_v6 }
  0x15   : > { %v1134_v16 = vld [vmem:[%s1093_s22 + $0x44] sm:$0x1]  ;;  %v1137_v17 = vld [vmem:[%s1093_s22 + $0x50] sm:$0xf]  ;;  %v1140_v18 = vld [vmem:[%s1093_s22 + $0x54] sm:$0x1]  ;;  %v1704_v19 = vunpack.c.l.bf16 %v1121_v9  ;;  %v1703_v21 = vunpack.c.l.bf16 %v1127_v11  ;;  %v1148_v22 = vmul.f32 %v1098_v0, %v261_v7  ;;  %v1165_v29 = vmul.f32 %v1098_v0, %v263_v8 }
  0x16   : > { %v1151_v23 = vld [vmem:[%s1093_s22 + $0x60] sm:$0xf]  ;;  %v1154_v24 = vld [vmem:[%s1093_s22 + $0x64] sm:$0x1]  ;;  %v1157_v25 = vld [vmem:[%s1093_s22 + $0x70] sm:$0xf]  ;;  %v1702_v27 = vunpack.c.l.bf16 %v1137_v17  ;;  %v1182_v36 = vmul.f32 %v1098_v0, %v265_v14  ;;  %v1306_v1 = vmul.f32 %v1187_v37, %v262_v12  ;;  %v1352_v3 = vmul.f32 %v1187_v37, %v264_v13 }
  0x17   : > { %v1168_v30 = vld [vmem:[%s1093_s22 + $0x74] sm:$0x1]  ;;  %v1701_v31 = vunpack.c.l.bf16 %v1151_v23  ;;  %v1700_v33 = vunpack.c.l.bf16 %v1157_v25  ;;  %v1174_v34 = vld [vmem:[%s1093_s22 + $0x8] sm:$0xf]  ;;  %v1177_v35 = vld [vmem:[%s1093_s22 + $0xc] sm:$0x1]  ;;  %v1204_v44 = vmul.f32 %v1098_v0, %v1704_v19  ;;  %v1221_v51 = vmul.f32 %v1098_v0, %v1703_v21 }
  0x18   : > { %1741 = vst [vmem:[#allocation2_spill] sm:$0xff] %v1177_v35  ;;  %v1191_v39 = vld [vmem:[%s1093_s22 + $0x18] sm:$0xf]  ;;  %v1194_v40 = vld [vmem:[%s1093_s22 + $0x1c] sm:$0x1]  ;;  %v1238_v58 = vmul.f32 %v1098_v0, %v1702_v27  ;;  %v1335_v27 = vmul.f32 %v1187_v37, %v263_v8  ;;  %v1369_v4 = vmul.f32 %v1187_v37, %v265_v14  ;;  %v1380_v20 = vmul.f32 %v1187_v37, %v1765_v38 }
  0x19   : > { %1742 = vst [vmem:[#allocation3_spill] sm:$0xff] %v1194_v40  ;;  %v1197_v41 = vld [vmem:[%s1093_s22 + $0x28] sm:$0xf]  ;;  %v1207_v45 = vld [vmem:[%s1093_s22 + $0x2c] sm:$0x1]  ;;  %v1255_v55 = vmul.f32 %v1098_v0, %v1701_v31  ;;  %v1272_v57 = vmul.f32 %v1098_v0, %v1700_v33  ;;  %v1289_v0 = vmul.f32 %v1187_v37, %v261_v7 }
  0x1a   : > { %1743 = vst [vmem:[#allocation4_spill] sm:$0xff] %v1207_v45  ;;  %v1210_v46 = vld [vmem:[%s1093_s22 + $0x38] sm:$0xf]  ;;  %v1213_v47 = vld [vmem:[%s1093_s22 + $0x3c] sm:$0x1] }
  0x1b   : > { %1744 = vst [vmem:[#allocation5_spill] sm:$0xff] %v1213_v47  ;;  %v1224_v52 = vld [vmem:[%s1093_s22 + $0x48] sm:$0xf]  ;;  %v1227_v53 = vld [vmem:[%s1093_s22 + $0x4c] sm:$0x1] }
  0x1c   : > { %1745 = vst [vmem:[#allocation6_spill] sm:$0xff] %v1227_v53  ;;  %v1230_v54 = vld [vmem:[%s1093_s22 + $0x58] sm:$0xf]  ;;  %v1241_v59 = vld [vmem:[%s1093_s22 + $0x5c] sm:$0x1] }
  0x1d   : > { %1746 = vst [vmem:[#allocation7_spill] sm:$0xff] %v1241_v59  ;;  %v1244_v60 = vld [vmem:[%s1093_s22 + $0x68] sm:$0xf]  ;;  %v1247_v61 = vld [vmem:[%s1093_s22 + $0x6c] sm:$0x1] }
  0x1e   : > { %1747 = vst [vmem:[#allocation8_spill] sm:$0xff] %v1247_v61  ;;  %v1258_v49 = vld [vmem:[%s1093_s22 + $0x78] sm:$0xf]  ;;  %v1261_v43 = vld [vmem:[%s1093_s22 + $0x7c] sm:$0x1] }
  0x1f   : > { %1748 = vst [vmem:[#allocation9_spill] sm:$0xff] %v1261_v43  ;;  %v1267_v50 = vld [vmem:[%s1093_s22 + $0x10] sm:$0xf]  ;;  %v1277_v56 = vld [vmem:[%s1093_s22 + $0x14] sm:$0x1] }
  0x20   : > { %1749 = vst [vmem:[#allocation10_spill] sm:$0xff] %v1267_v50  ;;  %v1280_v62 = vld [vmem:[%s1093_s22 + $0x20] sm:$0xf]  ;;  %v1283_v63 = vld [vmem:[%s1093_s22 + $0x24] sm:$0x1] }
  0x21   : > { %1750 = vst [vmem:[#allocation11_spill] sm:$0xff] %v1277_v56  ;;  %v1292_v33 = vld [vmem:[%s1093_s22 + $0x30] sm:$0xf]  ;;  %v1295_v48 = vld [vmem:[%s1093_s22 + $0x34] sm:$0x1] }
  0x22   : > { %1751 = vst [vmem:[#allocation12_spill] sm:$0xff] %v1280_v62  ;;  %v1298_v42 = vld [vmem:[%s1093_s22 + $0x40] sm:$0xf]  ;;  %v1316_v7 = vld [vmem:[%s1093_s22 + $0x44] sm:$0x1] }
  0x23   : > { %1752 = vst [vmem:[#allocation13_spill] sm:$0xff] %v1283_v63  ;;  %v1319_v32 = vld [vmem:[%s1093_s22 + $0x50] sm:$0xf]  ;;  %v1322_v31 = vld [vmem:[%s1093_s22 + $0x54] sm:$0x1] }
  0x24   : > { %1753 = vst [vmem:[#allocation14_spill] sm:$0xff] %v1292_v33  ;;  %v1338_v26 = vld [vmem:[%s1093_s22 + $0x60] sm:$0xf]  ;;  %v1341_v21 = vld [vmem:[%s1093_s22 + $0x64] sm:$0x1] }
  0x25   : > { %1754 = vst [vmem:[#allocation15_spill] sm:$0xff] %v1295_v48  ;;  %v1344_v2 = vld [vmem:[%s1093_s22 + $0x70] sm:$0xf]  ;;  %v1355_v8 = vld [vmem:[%s1093_s22 + $0x74] sm:$0x1] }
  0x26   : > { %1755 = vst [vmem:[#allocation16_spill] sm:$0xff] %v1298_v42  ;;  %v1358_v19 = vld [vmem:[%s1093_s22 + $0x80] sm:$0xf]  ;;  %v1361_v15 = vld [vmem:[%s1093_s22 + $0x84] sm:$0x1] }
  0x27   : > { %1756 = vst [vmem:[#allocation17_spill] sm:$0xff] %v1316_v7  ;;  %v350_v48 = vld [vmem:[%s1313_s29] sm:$0xf]  ;;  %v351_v12 = vld [vmem:[%s1313_s29 + $0x10] sm:$0xf]  ;;  %v1766_v7 = vunpack.c.l.bf16 %v1121_v9 }
  0x28   : > { %1757 = vst [vmem:[#allocation18_spill] sm:$0xff] %v1319_v32  ;;  %v352_v63 = vld [vmem:[%s1313_s29 + $0x20] sm:$0xf]  ;;  %v353_v5 = vld [vmem:[%s1313_s29 + $0x30] sm:$0xf]  ;;  %v358_v13 = vunpack.c.l.bf16 %v350_v48  ;;  %v1767_v32 = vunpack.c.l.bf16 %v1124_v10 }
  0x29   : > { %1758 = vst [vmem:[#allocation19_spill] sm:$0xff] %v1322_v31  ;;  %v354_v14 = vld [vmem:[%s1313_s29 + $0x40] sm:$0xf]  ;;  %v360_v31 = vunpack.c.l.bf16 %v352_v63  ;;  %v357_v38 = vld [vmem:[%s1313_s29 + $0x70] sm:$0xf]  ;;  %v361_v56 = vunpack.c.l.bf16 %v353_v5 }
  0x2a   : > { %1759 = vst [vmem:[#allocation20_spill] sm:$0xff] %v1338_v26  ;;  %v356_v6 = vld [vmem:[%s1313_s29 + $0x60] sm:$0xf]  ;;  %v1393_v26 = vld [vmem:[%s1313_s29 + $0x8] sm:$0xf]  ;;  %v1398_v48 = vmul.f32 %v1187_v37, %v1767_v32  ;;  %v365_v63 = vunpack.c.l.bf16 %v357_v38  ;;  %v419_v5 = vmul.f32 %v1330_v28, %v358_v13 }
  0x2b   : > { %1760 = vst [vmem:[#allocation21_spill] sm:$0xff] %v1341_v21  ;;  %v355_v21 = vld [vmem:[%s1313_s29 + $0x50] sm:$0xf]  ;;  %v364_v9 = vunpack.c.l.bf16 %v356_v6  ;;  %v1407_v42 = vld [vmem:[%s1313_s29 + $0x38] sm:$0xf]  ;;  %v421_v33 = vmul.f32 %v1330_v28, %v360_v31  ;;  %v422_v43 = vmul.f32 %v1330_v28, %v361_v56 }
  0x2c   : > { %1761 = vst [vmem:[#allocation22_spill] sm:$0xff] %v1344_v2  ;;  %v363_v2 = vunpack.c.l.bf16 %v355_v21  ;;  %v1415_v10 = vld [vmem:[%s1313_s29 + $0x58] sm:$0xf]  ;;  %v1418_v32 = vld [vmem:[%s1313_s29 + $0x68] sm:$0xf]  ;;  %v427_v31 = vadd.f32 %v419_v5, %v1148_v22  ;;  %v1773_v22 = vunpack.c.l.bf16 %v1134_v16  ;;  %v1778_v16 = vunpack.c.l.bf16 %v1157_v25 }
  0x2d   : > { %1762 = vst [vmem:[#allocation23_spill] sm:$0xff] %v1355_v8  ;;  %v359_v8 = vunpack.c.l.bf16 %v351_v12  ;;  %v1401_v12 = vld [vmem:[%s1313_s29 + $0x18] sm:$0xf]  ;;  %v1431_v61 = vld [vmem:[%s1313_s29 + $0x10] sm:$0xf]  ;;  %v429_v35 = vadd.f32 %v421_v33, %v1182_v36  ;;  %v1774_v33 = vunpack.c.l.bf16 %v1137_v17  ;;  %v1779_v17 = vunpack.c.l.bf16 %v1168_v30 }
  0x2e   : > { %1763 = vst [vmem:[#allocation24_spill] sm:$0xff] %v1358_v19  ;;  %v362_v19 = vunpack.c.l.bf16 %v354_v14  ;;  %v1412_v14 = vld [vmem:[%s1313_s29 + $0x48] sm:$0xf]  ;;  %v1425_v13 = vld [vmem:[%s1313_s29 + $0x78] sm:$0xf]  ;;  %v480_v5 = vrot.slane %v1380_v20, 1 }
  0x2f   : > { %1764 = vst [vmem:[#allocation25_spill] sm:$0xff] %v1361_v15  ;;  %v1388_v15 = vmul.f32 %v1187_v37, %v1766_v7  ;;  %v1404_v7 = vld [vmem:[%s1313_s29 + $0x28] sm:$0xf]  ;;  %v420_v62 = vmul.f32 %v1330_v28, %v359_v8  ;;  %v1434_v6 = vld [vmem:[%s1313_s29 + $0x20] sm:$0xf]  ;;  %v450_v36 = vmul.f32 %v1187_v37, %v1774_v33  ;;  %v483_v30 = vrot.slane %v1398_v48, 1 }
  0x30   : > { %1768 = vst [vmem:[#allocation26_spill] sm:$0xff] %v1418_v32  ;;  %v1439_v38 = vld [vmem:[%s1313_s29 + $0x30] sm:$0xf]  ;;  %v1442_v59 = vld [vmem:[%s1313_s29 + $0x40] sm:$0xf]  ;;  %v426_v32 = vmul.f32 %v1330_v28, %v365_v63  ;;  %v477_v63 = vrot.slane %v1352_v3, 1 }
  0x31   : > { %1769 = vst [vmem:[#allocation27_spill] sm:$0xff] %v1425_v13  ;;  %v1445_v53 = vld [vmem:[%s1313_s29 + $0x50] sm:$0xf]  ;;  %v1451_v47 = vld [vmem:[%s1313_s29 + $0x60] sm:$0xf]  ;;  %v423_v13 = vmul.f32 %v1330_v28, %v362_v19  ;;  %v428_v8 = vadd.f32 %v420_v62, %v1165_v29  ;;  %v430_v19 = vadd.f32 %v422_v43, %v1204_v44  ;;  %v449_v29 = vmul.f32 %v1187_v37, %v1773_v22 }
  0x32   : > { %1770 = vst [vmem:[#allocation28_spill] sm:$0xff] %v1431_v61  ;;  %v1454_v45 = vld [vmem:[%s1313_s29 + $0x70] sm:$0xf]  ;;  %v1457_v40 = vld [vmem:[%s1313_s29 + $0x80] sm:$0xf]  ;;  %v425_v61 = vmul.f32 %v1330_v28, %v364_v9  ;;  %v1772_v9 = vunpack.c.l.bf16 %v1127_v11  ;;  %v1775_v43 = vunpack.c.l.bf16 %v1140_v18  ;;  %v1777_v11 = vunpack.c.l.bf16 %v1154_v24 }
  0x33   : > { %1771 = vst [vmem:[#allocation29_spill] sm:$0xff] %v1434_v6  ;;  %v424_v6 = vmul.f32 %v1330_v28, %v363_v2  ;;  %v431_v21 = vadd.f32 %v423_v13, %v1221_v51  ;;  %v434_v2 = vadd.f32 %v426_v32, %v1272_v57  ;;  %v1776_v51 = vunpack.c.l.bf16 %v1151_v23  ;;  %v1011_v20 = vld [vmem:[%s1697_s2 + $0x3] ss:$0 sm:$0xff] }
  0x34   : > { %v433_v56 = vadd.f32 %v425_v61, %v1255_v55  ;;  %v448_v28 = vmul.f32 %v1187_v37, %v1772_v9  ;;  %v451_v44 = vmul.f32 %v1187_v37, %v1775_v43  ;;  %v453_v57 = vmul.f32 %v1187_v37, %v1777_v11 }
  0x35   : > { %v432_v50 = vadd.f32 %v424_v6, %v1238_v58  ;;  %v452_v55 = vmul.f32 %v1187_v37, %v1776_v51  ;;  %v454_v58 = vmul.f32 %v1187_v37, %v1778_v16  ;;  %v455_v61 = vmul.f32 %v1187_v37, %v1779_v17 }
  0x36   : > { %v473_v18 = vrot.slane %v1289_v0, 1  ;;  %v474_v62 = vrot.slane %v1306_v1, 1  ;;  %v476_v23 = vrot.slane %v1335_v27, 1  ;;  %v479_v24 = vrot.slane %v1369_v4, 1 }
  0x37   : > { %v482_v32 = vrot.slane %v1388_v15, 1  ;;  %v485_v6 = vrot.slane %v448_v28, 1  ;;  %v486_v1 = vrot.slane %v449_v29, 1  ;;  %v488_v13 = vrot.slane %v450_v36, 1 }
  0x38   : > { %v475_v25 = vsel %vm472_vm0, %v473_v18, %v474_v62  ;;  %v478_v37 = vsel %vm472_vm0, %v476_v23, %v477_v63  ;;  %v481_v0 = vsel %vm472_vm0, %v479_v24, %v480_v5  ;;  %v489_v3 = vrot.slane %v451_v44, 1 }
  0x39   : > { %v484_v27 = vsel %vm472_vm0, %v482_v32, %v483_v30  ;;  %v491_v9 = vrot.slane %v452_v55, 1  ;;  %v492_v4 = vrot.slane %v453_v57, 1  ;;  %v487_v15 = vsel %vm472_vm0, %v485_v6, %v486_v1 }
  0x3a   : > { %v494_v22 = vrot.slane %v454_v58, 1  ;;  %v495_v48 = vrot.slane %v455_v61, 1  ;;  %v505_v28 = vadd.f32 %v475_v25, %v427_v31  ;;  %v490_v33 = vsel %vm472_vm0, %v488_v13, %v489_v3  ;;  %v1012_v31 = vld [vmem:[%s1697_s2 + $0x4] ss:$0 sm:$0xff] }
  0x3b   : > { %v493_v43 = vsel %vm472_vm0, %v491_v9, %v492_v4  ;;  %v506_v29 = vadd.f32 %v478_v37, %v428_v8  ;;  %v507_v36 = vadd.f32 %v481_v0, %v429_v35  ;;  %v508_v44 = vadd.f32 %v484_v27, %v430_v19 }
  0x3c   : > { %v496_v51 = vsel %vm472_vm0, %v494_v22, %v495_v48  ;;  %v509_v55 = vadd.f32 %v487_v15, %v431_v21  ;;  %v510_v11 = vadd.f32 %v490_v33, %v432_v50  ;;  %v511_v57 = vadd.f32 %v493_v43, %v433_v56  ;;  %v1013_v15 = vld [vmem:[%s1697_s2 + $0x5] ss:$0 sm:$0xff] }
  0x3d   : > { %v512_v16 = vadd.f32 %v496_v51, %v434_v2  ;;  %v1780_v17 = vunpack.c.l.bf16 %v1174_v34  ;;  %v1781_v58 = vunpack.c.l.bf16 %v1191_v39  ;;  %v1782_v8 = vunpack.c.l.bf16 %v1197_v41 }
  0x3e   : > { %v1783_v62 = vunpack.c.l.bf16 %v1210_v46  ;;  %v1784_v50 = vunpack.c.l.bf16 %v1224_v52  ;;  %v1785_v56 = vunpack.c.l.bf16 %v1230_v54  ;;  %v1786_v23 = vunpack.c.l.bf16 %v1244_v60 }
  0x3f   : > { %v518_v18 = vmul.f32 %v1011_v20, %v1780_v17  ;;  %v519_v61 = vmul.f32 %v1011_v20, %v1781_v58  ;;  %v520_v35 = vmul.f32 %v1011_v20, %v1782_v8  ;;  %v1787_v24 = vunpack.c.l.bf16 %v1258_v49 }
  0x40   : > { %v521_v19 = vmul.f32 %v1011_v20, %v1783_v62  ;;  %v522_v21 = vmul.f32 %v1011_v20, %v1784_v50  ;;  %v523_v2 = vmul.f32 %v1011_v20, %v1785_v56  ;;  %v524_v63 = vmul.f32 %v1011_v20, %v1786_v23 }
  0x41   : > { %v525_v5 = vmul.f32 %v1011_v20, %v1787_v24  ;;  %v526_v25 = vadd.f32 %v518_v18, %v505_v28  ;;  %v527_v32 = vadd.f32 %v519_v61, %v506_v29  ;;  %v528_v30 = vadd.f32 %v520_v35, %v507_v36  ;;  %v1794_v36 = vld [vmem:[#allocation26_spill] sm:$0xff] }
  0x42   : > { %v529_v6 = vadd.f32 %v521_v19, %v508_v44  ;;  %v530_v37 = vadd.f32 %v522_v21, %v509_v55  ;;  %v531_v0 = vadd.f32 %v523_v2, %v510_v11  ;;  %v532_v1 = vadd.f32 %v524_v63, %v511_v57  ;;  %v1796_v44 = vld [vmem:[#allocation27_spill] sm:$0xff]  ;;  %v1799_v35 = vld [vmem:[#allocation2_spill] sm:$0xff]  ;;  %v1805_v63 = vld [vmem:[#allocation4_spill] sm:$0xff] }
  0x43   : > { %v533_v13 = vadd.f32 %v525_v5, %v512_v16  ;;  %v1788_v27 = vunpack.c.l.bf16 %v1393_v26  ;;  %v1789_v9 = vunpack.c.l.bf16 %v1401_v12  ;;  %v1790_v20 = vunpack.c.l.bf16 %v1404_v7  ;;  %v1802_v21 = vld [vmem:[#allocation3_spill] sm:$0xff] }
  0x44   : > { %v1791_v48 = vunpack.c.l.bf16 %v1407_v42  ;;  %v1792_v33 = vunpack.c.l.bf16 %v1412_v14  ;;  %v1793_v29 = vunpack.c.l.bf16 %v1415_v10  ;;  %v1795_v51 = vunpack.c.l.bf16 %v1794_v36 }
  0x45   : > { %v539_v3 = vmul.f32 %v1012_v31, %v1788_v27  ;;  %v540_v4 = vmul.f32 %v1012_v31, %v1789_v9  ;;  %v541_v22 = vmul.f32 %v1012_v31, %v1790_v20  ;;  %v1797_v55 = vunpack.c.l.bf16 %v1796_v44 }
  0x46   : > { %v542_v28 = vmul.f32 %v1012_v31, %v1791_v48  ;;  %v543_v43 = vmul.f32 %v1012_v31, %v1792_v33  ;;  %v544_v26 = vmul.f32 %v1012_v31, %v1793_v29  ;;  %v545_v12 = vmul.f32 %v1012_v31, %v1795_v51 }
  0x47   : > { %v546_v11 = vmul.f32 %v1012_v31, %v1797_v55  ;;  %v547_v57 = vadd.f32 %v539_v3, %v526_v25  ;;  %v548_v16 = vadd.f32 %v540_v4, %v527_v32  ;;  %v549_v17 = vadd.f32 %v541_v22, %v528_v30 }
  0x48   : > { %v550_v7 = vadd.f32 %v542_v28, %v529_v6  ;;  %v551_v18 = vadd.f32 %v543_v43, %v530_v37  ;;  %v552_v58 = vadd.f32 %v544_v26, %v531_v0  ;;  %v553_v42 = vadd.f32 %v545_v12, %v532_v1 }
  0x49   : > { %v554_v61 = vadd.f32 %v546_v11, %v533_v13  ;;  %v1798_v14 = vunpack.c.l.bf16 %v1174_v34  ;;  %v1800_v10 = vunpack.c.l.bf16 %v1799_v35  ;;  %v1801_v19 = vunpack.c.l.bf16 %v1191_v39  ;;  %v1808_v34 = vld [vmem:[#allocation5_spill] sm:$0xff]  ;;  %v1811_v39 = vld [vmem:[#allocation6_spill] sm:$0xff] }
  0x4a   : > { %v1803_v56 = vunpack.c.l.bf16 %v1802_v21  ;;  %v1804_v2 = vunpack.c.l.bf16 %v1197_v41  ;;  %v1806_v24 = vunpack.c.l.bf16 %v1805_v63  ;;  %v1807_v25 = vunpack.c.l.bf16 %v1210_v46  ;;  %v1814_v41 = vld [vmem:[#allocation7_spill] sm:$0xff]  ;;  %v1817_v46 = vld [vmem:[#allocation8_spill] sm:$0xff] }
  0x4b   : > { %v560_v8 = vmul.f32 %v1013_v15, %v1798_v14  ;;  %v561_v62 = vmul.f32 %v1013_v15, %v1800_v10  ;;  %v562_v50 = vmul.f32 %v1013_v15, %v1801_v19  ;;  %v1809_v30 = vunpack.c.l.bf16 %v1808_v34 }
  0x4c   : > { %v563_v31 = vmul.f32 %v1013_v15, %v1803_v56  ;;  %v564_v23 = vmul.f32 %v1013_v15, %v1804_v2  ;;  %v565_v5 = vmul.f32 %v1013_v15, %v1806_v24  ;;  %v566_v32 = vmul.f32 %v1013_v15, %v1807_v25 }
  0x4d   : > { %v567_v6 = vmul.f32 %v1013_v15, %v1809_v30  ;;  %v1810_v37 = vunpack.c.l.bf16 %v1224_v52  ;;  %v1812_v1 = vunpack.c.l.bf16 %v1811_v39  ;;  %v1813_v27 = vunpack.c.l.bf16 %v1230_v54  ;;  %v1820_v52 = vld [vmem:[#allocation9_spill] sm:$0xff] }
  0x4e   : > { %v1815_v9 = vunpack.c.l.bf16 %v1814_v41  ;;  %v1816_v20 = vunpack.c.l.bf16 %v1244_v60  ;;  %v1818_v48 = vunpack.c.l.bf16 %v1817_v46  ;;  %v1819_v33 = vunpack.c.l.bf16 %v1258_v49 }
  0x4f   : > { %v568_v0 = vmul.f32 %v1013_v15, %v1810_v37  ;;  %v569_v13 = vmul.f32 %v1013_v15, %v1812_v1  ;;  %v570_v3 = vmul.f32 %v1013_v15, %v1813_v27  ;;  %v1821_v29 = vunpack.c.l.bf16 %v1820_v52  ;;  %v1822_v1 = vld [vmem:[#allocation10_spill] sm:$0xff]  ;;  %v1836_v52 = vld [vmem:[#allocation24_spill] sm:$0xff] }
  0x50   : > { %v571_v4 = vmul.f32 %v1013_v15, %v1815_v9  ;;  %v572_v22 = vmul.f32 %v1013_v15, %v1816_v20  ;;  %v573_v28 = vmul.f32 %v1013_v15, %v1818_v48  ;;  %v574_v43 = vmul.f32 %v1013_v15, %v1819_v33  ;;  %v1828_v20 = vld [vmem:[#allocation16_spill] sm:$0xff] }
  0x51   : > { %v575_v26 = vmul.f32 %v1013_v15, %v1821_v29  ;;  %v592_v36 = vrot.slane %v560_v8, 1  ;;  %v593_v51 = vrot.slane %v561_v62, 1  ;;  %v595_v12 = vrot.slane %v562_v50, 1  ;;  %v1014_v50 = vld [vmem:[%s1697_s2 + $0x6] ss:$0 sm:$0xff] }
  0x52   : > { %v596_v54 = vrot.slane %v563_v31, 1  ;;  %v598_v44 = vrot.slane %v564_v23, 1  ;;  %v599_v55 = vrot.slane %v565_v5, 1  ;;  %v601_v14 = vrot.slane %v566_v32, 1 }
  0x53   : > { %v594_v11 = vsel %vm472_vm0, %v592_v36, %v593_v51  ;;  %v602_v60 = vrot.slane %v567_v6, 1  ;;  %v604_v35 = vrot.slane %v568_v0, 1  ;;  %v605_v49 = vrot.slane %v569_v13, 1 }
  0x54   : > { %v597_v10 = vsel %vm472_vm0, %v595_v12, %v596_v54  ;;  %v600_v19 = vsel %vm472_vm0, %v598_v44, %v599_v55  ;;  %v607_v21 = vrot.slane %v570_v3, 1  ;;  %v608_v15 = vrot.slane %v571_v4, 1  ;;  %v1824_v3 = vld [vmem:[#allocation12_spill] sm:$0xff]  ;;  %v1826_v4 = vld [vmem:[#allocation14_spill] sm:$0xff] }
  0x55   : > { %v603_v56 = vsel %vm472_vm0, %v601_v14, %v602_v60  ;;  %v610_v8 = vrot.slane %v572_v22, 1  ;;  %v611_v62 = vrot.slane %v573_v28, 1  ;;  %v606_v31 = vsel %vm472_vm0, %v604_v35, %v605_v49  ;;  %v1834_v28 = vld [vmem:[#allocation22_spill] sm:$0xff]  ;;  %v1838_v60 = vld [vmem:[#allocation28_spill] sm:$0xff] }
  0x56   : > { %v613_v2 = vrot.slane %v574_v43, 1  ;;  %v614_v23 = vrot.slane %v575_v26, 1  ;;  %v624_v63 = vadd.f32 %v594_v11, %v547_v57  ;;  %v609_v24 = vsel %vm472_vm0, %v607_v21, %v608_v15  ;;  %v1015_v57 = vld [vmem:[%s1697_s2 + $0x7] ss:$0 sm:$0xff] }
  0x57   : > { %v612_v5 = vsel %vm472_vm0, %v610_v8, %v611_v62  ;;  %v625_v25 = vadd.f32 %v597_v10, %v548_v16  ;;  %v626_v32 = vadd.f32 %v600_v19, %v549_v17  ;;  %v627_v30 = vadd.f32 %v603_v56, %v550_v7  ;;  %v1840_v19 = vld [vmem:[#allocation29_spill] sm:$0xff]  ;;  %v1016_v56 = vld [vmem:[%s1697_s2 + $0x8] ss:$0 sm:$0xff] }
  0x58   : > { %v615_v34 = vsel %vm472_vm0, %v613_v2, %v614_v23  ;;  %v628_v6 = vadd.f32 %v606_v31, %v551_v18  ;;  %v629_v37 = vadd.f32 %v609_v24, %v552_v58  ;;  %v630_v0 = vadd.f32 %v612_v5, %v553_v42  ;;  %v1830_v18 = vld [vmem:[#allocation18_spill] sm:$0xff] }
  0x59   : > { %v631_v39 = vadd.f32 %v615_v34, %v554_v61  ;;  %v1823_v13 = vunpack.c.l.bf16 %v1822_v1  ;;  %v1825_v41 = vunpack.c.l.bf16 %v1824_v3  ;;  %v1827_v16 = vunpack.c.l.bf16 %v1826_v4  ;;  %v1832_v61 = vld [vmem:[#allocation20_spill] sm:$0xff]  ;;  %v1858_v1 = vld [vmem:[#allocation17_spill] sm:$0xff] }
  0x5a   : > { %v1829_v22 = vunpack.c.l.bf16 %v1828_v20  ;;  %v1831_v58 = vunpack.c.l.bf16 %v1830_v18  ;;  %v1833_v46 = vunpack.c.l.bf16 %v1832_v61  ;;  %v1835_v33 = vunpack.c.l.bf16 %v1834_v28 }
  0x5b   : > { %v637_v27 = vmul.f32 %v1014_v50, %v1823_v13  ;;  %v638_v9 = vmul.f32 %v1014_v50, %v1825_v41  ;;  %v639_v17 = vmul.f32 %v1014_v50, %v1827_v16  ;;  %v1837_v29 = vunpack.c.l.bf16 %v1836_v52  ;;  %v1852_v16 = vld [vmem:[#allocation13_spill] sm:$0xff] }
  0x5c   : > { %v640_v7 = vmul.f32 %v1014_v50, %v1829_v22  ;;  %v641_v42 = vmul.f32 %v1014_v50, %v1831_v58  ;;  %v642_v48 = vmul.f32 %v1014_v50, %v1833_v46  ;;  %v643_v43 = vmul.f32 %v1014_v50, %v1835_v33 }
  0x5d   : > { %v644_v26 = vmul.f32 %v1014_v50, %v1837_v29  ;;  %v645_v36 = vadd.f32 %v637_v27, %v624_v63  ;;  %v646_v51 = vadd.f32 %v638_v9, %v625_v25  ;;  %v647_v12 = vadd.f32 %v639_v17, %v626_v32  ;;  %v1849_v27 = vld [vmem:[#allocation11_spill] sm:$0xff] }
  0x5e   : > { %v648_v54 = vadd.f32 %v640_v7, %v627_v30  ;;  %v649_v44 = vadd.f32 %v641_v42, %v628_v6  ;;  %v650_v55 = vadd.f32 %v642_v48, %v629_v37  ;;  %v651_v11 = vadd.f32 %v643_v43, %v630_v0  ;;  %v1855_v7 = vld [vmem:[#allocation15_spill] sm:$0xff] }
  0x5f   : > { %v652_v14 = vadd.f32 %v644_v26, %v631_v39  ;;  %v1839_v35 = vunpack.c.l.bf16 %v1838_v60  ;;  %v1841_v49 = vunpack.c.l.bf16 %v1840_v19  ;;  %v1842_v15 = vunpack.c.l.bf16 %v1439_v38 }
  0x60   : > { %v1843_v62 = vunpack.c.l.bf16 %v1442_v59  ;;  %v1844_v31 = vunpack.c.l.bf16 %v1445_v53  ;;  %v1845_v23 = vunpack.c.l.bf16 %v1451_v47  ;;  %v1846_v24 = vunpack.c.l.bf16 %v1454_v45 }
  0x61   : > { %v658_v10 = vmul.f32 %v1015_v57, %v1839_v35  ;;  %v659_v21 = vmul.f32 %v1015_v57, %v1841_v49  ;;  %v660_v8 = vmul.f32 %v1015_v57, %v1842_v15  ;;  %v1847_v25 = vunpack.c.l.bf16 %v1457_v40 }
  0x62   : > { %v661_v50 = vmul.f32 %v1015_v57, %v1843_v62  ;;  %v662_v2 = vmul.f32 %v1015_v57, %v1844_v31  ;;  %v663_v63 = vmul.f32 %v1015_v57, %v1845_v23  ;;  %v664_v5 = vmul.f32 %v1015_v57, %v1846_v24 }
  0x63   : > { %v665_v32 = vmul.f32 %v1015_v57, %v1847_v25  ;;  %v666_v34 = vadd.f32 %v658_v10, %v645_v36  ;;  %v667_v30 = vadd.f32 %v659_v21, %v646_v51  ;;  %v668_v6 = vadd.f32 %v660_v8, %v647_v12 }
  0x64   : > { %v669_v38 = vadd.f32 %v661_v50, %v648_v54  ;;  %v670_v37 = vadd.f32 %v662_v2, %v649_v44  ;;  %v671_v0 = vadd.f32 %v663_v63, %v650_v55  ;;  %v672_v59 = vadd.f32 %v664_v5, %v651_v11 }
  0x65   : > { %v673_v39 = vadd.f32 %v665_v32, %v652_v14  ;;  %v1848_v53 = vmov %v1823_v13  ;;  %v1850_v47 = vunpack.c.l.bf16 %v1849_v27  ;;  %v1851_v45 = vunpack.c.l.bf16 %v1824_v3  ;;  %v1861_v3 = vld [vmem:[#allocation19_spill] sm:$0xff]  ;;  %v1017_v27 = vld [vmem:[%s1698_s3] ss:$0 sm:$0xff] }
  0x66   : > { %v679_v13 = vmul.f32 %v1016_v56, %v1848_v53  ;;  %v1853_v40 = vunpack.c.l.bf16 %v1852_v16  ;;  %v1854_v17 = vunpack.c.l.bf16 %v1826_v4  ;;  %v1856_v58 = vunpack.c.l.bf16 %v1855_v7  ;;  %v1864_v4 = vld [vmem:[#allocation21_spill] sm:$0xff] }
  0x67   : > { %v680_v41 = vmul.f32 %v1016_v56, %v1850_v47  ;;  %v681_v9 = vmul.f32 %v1016_v56, %v1851_v45  ;;  %v1857_v46 = vunpack.c.l.bf16 %v1828_v20  ;;  %v1859_v33 = vunpack.c.l.bf16 %v1858_v1  ;;  %v1867_v20 = vld [vmem:[#allocation23_spill] sm:$0xff] }
  0x68   : > { %v682_v57 = vmul.f32 %v1016_v56, %v1853_v40  ;;  %v683_v22 = vmul.f32 %v1016_v56, %v1854_v17  ;;  %v684_v42 = vmul.f32 %v1016_v56, %v1856_v58  ;;  %v1860_v29 = vunpack.c.l.bf16 %v1830_v18  ;;  %v1870_v18 = vld [vmem:[#allocation25_spill] sm:$0xff] }
  0x69   : > { %v685_v48 = vmul.f32 %v1016_v56, %v1857_v46  ;;  %v686_v43 = vmul.f32 %v1016_v56, %v1859_v33  ;;  %v1862_v36 = vunpack.c.l.bf16 %v1861_v3  ;;  %v1863_v12 = vunpack.c.l.bf16 %v1832_v61 }
  0x6a   : > { %v687_v26 = vmul.f32 %v1016_v56, %v1860_v29  ;;  %v1865_v44 = vunpack.c.l.bf16 %v1864_v4  ;;  %v1866_v11 = vunpack.c.l.bf16 %v1834_v28  ;;  %v1868_v60 = vunpack.c.l.bf16 %v1867_v20 }
  0x6b   : > { %v688_v51 = vmul.f32 %v1016_v56, %v1862_v36  ;;  %v689_v54 = vmul.f32 %v1016_v56, %v1863_v12  ;;  %v1869_v10 = vunpack.c.l.bf16 %v1836_v52  ;;  %v1871_v49 = vunpack.c.l.bf16 %v1870_v18 }
  0x6c   : > { %v690_v55 = vmul.f32 %v1016_v56, %v1865_v44  ;;  %v691_v14 = vmul.f32 %v1016_v56, %v1866_v11  ;;  %v692_v35 = vmul.f32 %v1016_v56, %v1868_v60  ;;  %v711_v15 = vrot.slane %v679_v13, 1 }
  0x6d   : > { %v693_v19 = vmul.f32 %v1016_v56, %v1869_v10  ;;  %v694_v21 = vmul.f32 %v1016_v56, %v1871_v49  ;;  %v712_v8 = vrot.slane %v680_v41, 1  ;;  %v714_v62 = vrot.slane %v681_v9, 1 }
  0x6e   : > { %v715_v61 = vrot.slane %v682_v57, 1  ;;  %v717_v50 = vrot.slane %v683_v22, 1  ;;  %v718_v31 = vrot.slane %v684_v42, 1  ;;  %v720_v23 = vrot.slane %v685_v48, 1 }
  0x6f   : > { %v713_v2 = vsel %vm472_vm0, %v711_v15, %v712_v8  ;;  %v721_v28 = vrot.slane %v686_v43, 1  ;;  %v723_v63 = vrot.slane %v687_v26, 1  ;;  %v724_v5 = vrot.slane %v688_v51, 1 }
  0x70   : > { %v716_v24 = vsel %vm472_vm0, %v714_v62, %v715_v61  ;;  %v719_v52 = vsel %vm472_vm0, %v717_v50, %v718_v31  ;;  %v726_v25 = vrot.slane %v689_v54, 1  ;;  %v727_v32 = vrot.slane %v690_v55, 1 }
  0x71   : > { %v722_v56 = vsel %vm472_vm0, %v720_v23, %v721_v28  ;;  %v729_v53 = vrot.slane %v691_v14, 1  ;;  %v730_v13 = vrot.slane %v692_v35, 1  ;;  %v725_v47 = vsel %vm472_vm0, %v723_v63, %v724_v5 }
  0x72   : > { %v732_v41 = vrot.slane %v693_v19, 1  ;;  %v733_v45 = vrot.slane %v694_v21, 1  ;;  %v743_v9 = vadd.f32 %v713_v2, %v666_v34  ;;  %v728_v16 = vsel %vm472_vm0, %v726_v25, %v727_v32 }
  0x73   : > { %v731_v40 = vsel %vm472_vm0, %v729_v53, %v730_v13  ;;  %v744_v57 = vadd.f32 %v716_v24, %v667_v30  ;;  %v745_v17 = vadd.f32 %v719_v52, %v668_v6  ;;  %v746_v7 = vadd.f32 %v722_v56, %v669_v38 }
  0x74   : > { %v734_v22 = vsel %vm472_vm0, %v732_v41, %v733_v45  ;;  %v747_v58 = vadd.f32 %v725_v47, %v670_v37  ;;  %v748_v42 = vadd.f32 %v728_v16, %v671_v0  ;;  %v749_v46 = vadd.f32 %v731_v40, %v672_v59 }
  0x75   : > { %v750_v48 = vadd.f32 %v734_v22, %v673_v39  ;;  %v755_v1 = vadd.f32 %v1017_v27, %v743_v9  ;;  %v756_v33 = vadd.f32 %v1017_v27, %v744_v57  ;;  %v757_v34 = vadd.f32 %v1017_v27, %v745_v17 }
  0x76   : > { %v758_v43 = vadd.f32 %v1017_v27, %v746_v7  ;;  %v759_v29 = vadd.f32 %v1017_v27, %v747_v58  ;;  %v760_v26 = vadd.f32 %v1017_v27, %v748_v42  ;;  %v761_v3 = vadd.f32 %v1017_v27, %v749_v46 }
  0x77   : > { %v762_v30 = vadd.f32 %v1017_v27, %v750_v48  ;;  %v963_v6 = vpack.c.bf16 %v756_v33, %v755_v1 }
  0x78   : > { %v968_v36 = vpack.c.bf16 %v758_v43, %v757_v34  ;;  %v973_v51 = vpack.c.bf16 %v760_v26, %v759_v29 }
  0x79   : > { %964 = vst [vmem:[%s239_s27] sm:$0xff] %v963_v6   ;;  %v978_v38 = vpack.c.bf16 %v762_v30, %v761_v3 }
  0x7a   : > { %980 = vst [vmem:[%s239_s27 + $0x8] sm:$0xff] %v968_v36  }
  0x7b   : > { %981 = vst [vmem:[%s239_s27 + $0x10] sm:$0xff] %v973_v51  }
  0x7c   : > { %982 = vst [vmem:[%s239_s27 + $0x18] sm:$0xff] %v978_v38  }
  0x7d PF: > { %s14_s17 = sadd.s32 1, %s1040_s17   ;;  %s1872_s15 = smov %s1036_s16 }
  0x7e   : > { %p11_p5 = scmp.ge.s32.totalorder %s14_s17, 4   ;;  %s1873_s16 = smov %s1875_s18 }
  0x80   :  { %13 = sbr.rel (!%p11_p5) target bundleno = 2 (0x2), region = 83 }

// kernel: gelayer_s2_forward.7
= control target key start
LH: loop header
LB: loop body
LE: loop exit
PB: predicated region body
PF: predicated region fallthrough
CT: control target
= control target key end

     0   :  { %s1100_s12 = smov 0   ;;  %s1102_s13 = smov 0   ;;  %s1553_s0 = inlined_call_operand.vmem [shape: bf16[2,10,10,128], index: 0, kind: input, shape index: {}]   ;;  %s1554_s1 = inlined_call_operand.vmem [shape: f32[9,1,128], index: 1, kind: input, shape index: {}]   ;;  %s1555_s2 = inlined_call_operand.vmem [shape: f32[1,128], index: 2, kind: input, shape index: {}]   ;;  %s1556_s3 = inlined_call_operand.vmem [shape: bf16[2,8,8,128], index: 3, kind: output, shape index: {}]  }
   0x1   :  { %s1104_s14 = smov 0  }
   0x2 LB: > { %s25_s15 = sadd.s32 1, %s1074_s13  ;;  %p951_p0 = scmp.ge.s32.totalorder %s1078_s14, 1  ;;  %s1078_s14 = sphi %s1104_s14, %s13_s14   ;;  %s1074_s13 = sphi %s1102_s13, %s1558_s13   ;;  %s1070_s12 = sphi %s1100_s12, %s1557_s12  }
   0x3   : > { %p27_p1 = scmp.ge.s32.totalorder %s25_s15, 2  ;;  %p151_p2 = scmp.lt.s32.totalorder %s1078_s14, 3 }
   0x5   : > { %s1560_s15 = smov (%p27_p1, %s25_s15), 0  ;;  %p152_p3 = pnand %p951_p0, %p151_p2 }
   0x6   : > { %p179_p4 = scmp.lt.s32.totalorder (!%p152_p3), %s1070_s12, 1 }
   0x7   : > { %155 = sbr.rel (%p152_p3) target bundleno = 121 (0x79), region = 32 }
   0xc   : > { %s1562_s12 = smov (!%p179_p4, %s1070_s12), 1  ;;  %v1046_v0 = vld [vmem:[%s1554_s1] ss:$0 sm:$0xff]  ;;  %v1047_v9 = vld [vmem:[%s1554_s1 + $0x1] ss:$0 sm:$0xff]  ;;  %vm279_vm0 = vcmask 1046528  }
   0xd   : > { %s1021_s16 = smul.u32 80, %s1562_s12  ;;  %vm357_vm1 = vcmask 1045504   ;;  %s997_s17 = sshll.u32 %s1562_s12, 5 }
   0xe   : > { %s192_s20 = scalar_lea.vmem %s1556_s3, %s997_s17 }
   0xf   : > { %s1124_s19 = scalar_lea.vmem %s1553_s0, %s1021_s16 }
  0x10   : > { %v198_v1 = vld [vmem:[%s1124_s19] sm:$0xf]  ;;  %v1131_v2 = vld [vmem:[%s1124_s19 + $0x4] sm:$0x1]  ;;  %v200_v3 = vld [vmem:[%s1124_s19 + $0x8] sm:$0xf] }
  0x11   : > { %v1135_v4 = vld [vmem:[%s1124_s19 + $0xc] sm:$0x1]  ;;  %v202_v5 = vld [vmem:[%s1124_s19 + $0x10] sm:$0xf]  ;;  %v1139_v6 = vld [vmem:[%s1124_s19 + $0x14] sm:$0x1]  ;;  %v1141_v7 = vunpack.c.l.bf16 %v198_v1  ;;  %v215_v8 = vunpack.c.l.bf16 %v1131_v2  ;;  %v1152_v13 = vunpack.c.l.bf16 %v200_v3 }
  0x12   : > { %v204_v10 = vld [vmem:[%s1124_s19 + $0x18] sm:$0xf]  ;;  %v1149_v11 = vld [vmem:[%s1124_s19 + $0x1c] sm:$0x1]  ;;  %v206_v12 = vld [vmem:[%s1124_s19 + $0x20] sm:$0xf]  ;;  %v217_v14 = vunpack.c.l.bf16 %v1135_v4  ;;  %v1155_v15 = vunpack.c.l.bf16 %v202_v5  ;;  %v219_v16 = vunpack.c.l.bf16 %v1139_v6 }
  0x13   : > { %v1159_v17 = vld [vmem:[%s1124_s19 + $0x24] sm:$0x1]  ;;  %v208_v18 = vld [vmem:[%s1124_s19 + $0x28] sm:$0xf]  ;;  %v1163_v19 = vld [vmem:[%s1124_s19 + $0x2c] sm:$0x1]  ;;  %v1165_v20 = vunpack.c.l.bf16 %v204_v10  ;;  %v221_v21 = vunpack.c.l.bf16 %v1149_v11  ;;  %v1168_v22 = vunpack.c.l.bf16 %v206_v12  ;;  %v234_v23 = vmul.f32 %v1046_v0, %v1141_v7 }
  0x14   : > { %v210_v24 = vld [vmem:[%s1124_s19 + $0x30] sm:$0xf]  ;;  %v1173_v25 = vld [vmem:[%s1124_s19 + $0x34] sm:$0x1]  ;;  %v212_v26 = vld [vmem:[%s1124_s19 + $0x38] sm:$0xf]  ;;  %v223_v27 = vunpack.c.l.bf16 %v1159_v17  ;;  %v1177_v28 = vunpack.c.l.bf16 %v208_v18  ;;  %v225_v29 = vunpack.c.l.bf16 %v1163_v19  ;;  %v235_v30 = vmul.f32 %v1046_v0, %v1152_v13 }
  0x15   : > { %v1182_v31 = vld [vmem:[%s1124_s19 + $0x3c] sm:$0x1]  ;;  %v1184_v32 = vunpack.c.l.bf16 %v210_v24  ;;  %v227_v33 = vunpack.c.l.bf16 %v1173_v25  ;;  %v1187_v34 = vunpack.c.l.bf16 %v212_v26  ;;  %v236_v35 = vmul.f32 %v1046_v0, %v1155_v15 }
  0x16   : > { %v229_v36 = vunpack.c.l.bf16 %v1182_v31  ;;  %v237_v37 = vmul.f32 %v1046_v0, %v1165_v20  ;;  %v238_v38 = vmul.f32 %v1046_v0, %v1168_v22  ;;  %v239_v39 = vmul.f32 %v1046_v0, %v1177_v28 }
  0x17   : > { %v240_v40 = vmul.f32 %v1046_v0, %v1184_v32  ;;  %v241_v41 = vmul.f32 %v1046_v0, %v1187_v34  ;;  %v247_v42 = vmul.f32 %v1047_v9, %v1141_v7  ;;  %v248_v43 = vmul.f32 %v1047_v9, %v215_v8 }
  0x18   : > { %v249_v44 = vmul.f32 %v1047_v9, %v1152_v13  ;;  %v250_v45 = vmul.f32 %v1047_v9, %v217_v14  ;;  %v251_v46 = vmul.f32 %v1047_v9, %v1155_v15  ;;  %v252_v47 = vmul.f32 %v1047_v9, %v219_v16 }
  0x19   : > { %v253_v48 = vmul.f32 %v1047_v9, %v1165_v20  ;;  %v254_v49 = vmul.f32 %v1047_v9, %v221_v21  ;;  %v255_v50 = vmul.f32 %v1047_v9, %v1168_v22  ;;  %v256_v51 = vmul.f32 %v1047_v9, %v223_v27 }
  0x1a   : > { %v257_v52 = vmul.f32 %v1047_v9, %v1177_v28  ;;  %v258_v53 = vmul.f32 %v1047_v9, %v225_v29  ;;  %v259_v54 = vmul.f32 %v1047_v9, %v1184_v32  ;;  %v260_v55 = vmul.f32 %v1047_v9, %v227_v33 }
  0x1b   : > { %v261_v56 = vmul.f32 %v1047_v9, %v1187_v34  ;;  %v262_v57 = vmul.f32 %v1047_v9, %v229_v36  ;;  %v280_v58 = vrot.slane %v247_v42, 1  ;;  %v281_v59 = vrot.slane %v248_v43, 1 }
  0x1c   : > { %v283_v60 = vrot.slane %v249_v44, 1  ;;  %v284_v61 = vrot.slane %v250_v45, 1  ;;  %v286_v62 = vrot.slane %v251_v46, 1  ;;  %v287_v63 = vrot.slane %v252_v47, 1  ;;  %v1048_v44 = vld [vmem:[%s1554_s1 + $0x2] ss:$0 sm:$0xff] }
  0x1d   : > { %v282_v0 = vsel %vm279_vm0, %v280_v58, %v281_v59  ;;  %v289_v1 = vrot.slane %v253_v48, 1  ;;  %v290_v3 = vrot.slane %v254_v49, 1  ;;  %v292_v5 = vrot.slane %v255_v50, 1 }
  0x1e   : > { %v285_v10 = vsel %vm279_vm0, %v283_v60, %v284_v61  ;;  %v288_v12 = vsel %vm279_vm0, %v286_v62, %v287_v63  ;;  %v293_v18 = vrot.slane %v256_v51, 1  ;;  %v295_v24 = vrot.slane %v257_v52, 1  ;;  %v959_v63 = vld [vmem:[%s1124_s19 + $0x10] sm:$0xf] }
  0x1f   : > { %v291_v9 = vsel %vm279_vm0, %v289_v1, %v290_v3  ;;  %v296_v26 = vrot.slane %v258_v53, 1  ;;  %v298_v42 = vrot.slane %v259_v54, 1  ;;  %v299_v43 = vrot.slane %v260_v55, 1 }
  0x20   : > { %v294_v45 = vsel %vm279_vm0, %v292_v5, %v293_v18  ;;  %v301_v46 = vrot.slane %v261_v56, 1  ;;  %v302_v47 = vrot.slane %v262_v57, 1  ;;  %v312_v48 = vadd.f32 %v282_v0, %v234_v23  ;;  %v1265_v0 = vld [vmem:[%s1124_s19 + $0x14] sm:$0x1]  ;;  %v1270_v18 = vld [vmem:[%s1124_s19 + $0x1c] sm:$0x1] }
  0x21   : > { %v297_v49 = vsel %vm279_vm0, %v295_v24, %v296_v26  ;;  %v300_v50 = vsel %vm279_vm0, %v298_v42, %v299_v43  ;;  %v313_v51 = vadd.f32 %v285_v10, %v235_v30  ;;  %v314_v52 = vadd.f32 %v288_v12, %v236_v35  ;;  %v961_v12 = vld [vmem:[%s1124_s19 + $0x18] sm:$0xf]  ;;  %v963_v43 = vld [vmem:[%s1124_s19 + $0x20] sm:$0xf] }
  0x22   : > { %v303_v58 = vsel %vm279_vm0, %v301_v46, %v302_v47  ;;  %v315_v53 = vadd.f32 %v291_v9, %v237_v37  ;;  %v316_v54 = vadd.f32 %v294_v45, %v238_v38  ;;  %v317_v55 = vadd.f32 %v297_v49, %v239_v39  ;;  %v965_v45 = vld [vmem:[%s1124_s19 + $0x28] sm:$0xf] }
  0x23   : > { %v318_v59 = vadd.f32 %v300_v50, %v240_v40  ;;  %v319_v60 = vadd.f32 %v303_v58, %v241_v41  ;;  %v325_v61 = vmul.f32 %v1048_v44, %v1141_v7  ;;  %v326_v56 = vmul.f32 %v1048_v44, %v215_v8  ;;  %v1281_v50 = vld [vmem:[%s1124_s19 + $0x2c] sm:$0x1]  ;;  %v967_v58 = vld [vmem:[%s1124_s19 + $0x30] sm:$0xf] }
  0x24   : > { %v327_v23 = vmul.f32 %v1048_v44, %v1152_v13  ;;  %v328_v57 = vmul.f32 %v1048_v44, %v217_v14  ;;  %v329_v30 = vmul.f32 %v1048_v44, %v1155_v15  ;;  %v330_v35 = vmul.f32 %v1048_v44, %v219_v16 }
  0x25   : > { %v331_v37 = vmul.f32 %v1048_v44, %v1165_v20  ;;  %v332_v38 = vmul.f32 %v1048_v44, %v221_v21  ;;  %v333_v7 = vmul.f32 %v1048_v44, %v1168_v22  ;;  %v334_v2 = vmul.f32 %v1048_v44, %v223_v27 }
  0x26   : > { %v335_v8 = vmul.f32 %v1048_v44, %v1177_v28  ;;  %v336_v4 = vmul.f32 %v1048_v44, %v225_v29  ;;  %v337_v13 = vmul.f32 %v1048_v44, %v1184_v32  ;;  %v338_v6 = vmul.f32 %v1048_v44, %v227_v33 }
  0x27   : > { %v339_v14 = vmul.f32 %v1048_v44, %v1187_v34  ;;  %v340_v11 = vmul.f32 %v1048_v44, %v229_v36  ;;  %v358_v15 = vrot.slane %v325_v61, 2  ;;  %v359_v16 = vrot.slane %v326_v56, 2  ;;  %v957_v34 = vld [vmem:[%s1124_s19 + $0x8] sm:$0xf]  ;;  %v1260_v36 = vld [vmem:[%s1124_s19 + $0xc] sm:$0x1] }
  0x28   : > { %v361_v17 = vrot.slane %v327_v23, 2  ;;  %v362_v20 = vrot.slane %v328_v57, 2  ;;  %v364_v21 = vrot.slane %v329_v30, 2  ;;  %v365_v19 = vrot.slane %v330_v35, 2  ;;  %v1276_v44 = vld [vmem:[%s1124_s19 + $0x24] sm:$0x1] }
  0x29   : > { %v360_v22 = vsel %vm357_vm1, %v358_v15, %v359_v16  ;;  %v367_v27 = vrot.slane %v331_v37, 2  ;;  %v368_v25 = vrot.slane %v332_v38, 2  ;;  %v370_v28 = vrot.slane %v333_v7, 2  ;;  %v1285_v61 = vld [vmem:[%s1124_s19 + $0x34] sm:$0x1] }
  0x2a   : > { %v363_v29 = vsel %vm357_vm1, %v361_v17, %v362_v20  ;;  %v366_v31 = vsel %vm357_vm1, %v364_v21, %v365_v19  ;;  %v371_v32 = vrot.slane %v334_v2, 2  ;;  %v373_v33 = vrot.slane %v335_v8, 2  ;;  %v1050_v20 = vld [vmem:[%s1554_s1 + $0x4] ss:$0 sm:$0xff] }
  0x2b   : > { %v369_v39 = vsel %vm357_vm1, %v367_v27, %v368_v25  ;;  %v374_v40 = vrot.slane %v336_v4, 2  ;;  %v376_v41 = vrot.slane %v337_v13, 2  ;;  %v377_v62 = vrot.slane %v338_v6, 2 }
  0x2c   : > { %v372_v1 = vsel %vm357_vm1, %v370_v28, %v371_v32  ;;  %v379_v3 = vrot.slane %v339_v14, 2  ;;  %v380_v5 = vrot.slane %v340_v11, 2  ;;  %v390_v10 = vadd.f32 %v360_v22, %v312_v48 }
  0x2d   : > { %v375_v24 = vsel %vm357_vm1, %v373_v33, %v374_v40  ;;  %v378_v9 = vsel %vm357_vm1, %v376_v41, %v377_v62  ;;  %v391_v26 = vadd.f32 %v363_v29, %v313_v51  ;;  %v392_v42 = vadd.f32 %v366_v31, %v314_v52  ;;  %v969_v51 = vld [vmem:[%s1124_s19 + $0x38] sm:$0xf]  ;;  %v1289_v52 = vld [vmem:[%s1124_s19 + $0x3c] sm:$0x1] }
  0x2e   : > { %v381_v46 = vsel %vm357_vm1, %v379_v3, %v380_v5  ;;  %v393_v47 = vadd.f32 %v369_v39, %v315_v53  ;;  %v394_v48 = vadd.f32 %v372_v1, %v316_v54  ;;  %v395_v49 = vadd.f32 %v375_v24, %v317_v55  ;;  %v1049_v53 = vld [vmem:[%s1554_s1 + $0x3] ss:$0 sm:$0xff]  ;;  %v1299_v55 = vld [vmem:[%s1124_s19 + $0x44] sm:$0x1] }
  0x2f   : > { %v396_v56 = vadd.f32 %v378_v9, %v318_v59  ;;  %v397_v23 = vadd.f32 %v381_v46, %v319_v60  ;;  %v1291_v57 = vunpack.c.l.bf16 %v957_v34  ;;  %v419_v30 = vunpack.c.l.bf16 %v1260_v36  ;;  %v971_v54 = vld [vmem:[%s1124_s19 + $0x40] sm:$0xf] }
  0x30   : > { %v1301_v35 = vunpack.c.l.bf16 %v959_v63  ;;  %v421_v37 = vunpack.c.l.bf16 %v1265_v0  ;;  %v1304_v59 = vunpack.c.l.bf16 %v961_v12  ;;  %v423_v60 = vunpack.c.l.bf16 %v1270_v18 }
  0x31   : > { %v1307_v38 = vunpack.c.l.bf16 %v963_v43  ;;  %v425_v7 = vunpack.c.l.bf16 %v1276_v44  ;;  %v1310_v2 = vunpack.c.l.bf16 %v965_v45  ;;  %v427_v8 = vunpack.c.l.bf16 %v1281_v50 }
  0x32   : > { %v1313_v4 = vunpack.c.l.bf16 %v967_v58  ;;  %v429_v13 = vunpack.c.l.bf16 %v1285_v61  ;;  %v1316_v6 = vunpack.c.l.bf16 %v969_v51  ;;  %v431_v14 = vunpack.c.l.bf16 %v1289_v52 }
  0x33   : > { %v1319_v11 = vunpack.c.l.bf16 %v971_v54  ;;  %v433_v15 = vunpack.c.l.bf16 %v1299_v55  ;;  %v439_v16 = vmul.f32 %v1049_v53, %v1291_v57  ;;  %v440_v17 = vmul.f32 %v1049_v53, %v1301_v35 }
  0x34   : > { %v441_v21 = vmul.f32 %v1049_v53, %v1304_v59  ;;  %v442_v19 = vmul.f32 %v1049_v53, %v1307_v38  ;;  %v443_v22 = vmul.f32 %v1049_v53, %v1310_v2  ;;  %v444_v27 = vmul.f32 %v1049_v53, %v1313_v4 }
  0x35   : > { %v445_v25 = vmul.f32 %v1049_v53, %v1316_v6  ;;  %v446_v28 = vmul.f32 %v1049_v53, %v1319_v11  ;;  %v447_v29 = vadd.f32 %v439_v16, %v390_v10  ;;  %v448_v31 = vadd.f32 %v440_v17, %v391_v26 }
  0x36   : > { %v449_v32 = vadd.f32 %v441_v21, %v392_v42  ;;  %v450_v33 = vadd.f32 %v442_v19, %v393_v47  ;;  %v451_v34 = vadd.f32 %v443_v22, %v394_v48  ;;  %v452_v39 = vadd.f32 %v444_v27, %v395_v49 }
  0x37   : > { %v453_v40 = vadd.f32 %v445_v25, %v396_v56  ;;  %v454_v41 = vadd.f32 %v446_v28, %v397_v23  ;;  %v460_v62 = vmul.f32 %v1050_v20, %v1291_v57  ;;  %v461_v63 = vmul.f32 %v1050_v20, %v419_v30 }
  0x38   : > { %v462_v1 = vmul.f32 %v1050_v20, %v1301_v35  ;;  %v463_v3 = vmul.f32 %v1050_v20, %v421_v37  ;;  %v464_v5 = vmul.f32 %v1050_v20, %v1304_v59  ;;  %v465_v10 = vmul.f32 %v1050_v20, %v423_v60 }
  0x39   : > { %v466_v12 = vmul.f32 %v1050_v20, %v1307_v38  ;;  %v467_v24 = vmul.f32 %v1050_v20, %v425_v7  ;;  %v468_v9 = vmul.f32 %v1050_v20, %v1310_v2  ;;  %v469_v26 = vmul.f32 %v1050_v20, %v427_v8 }
  0x3a   : > { %v470_v42 = vmul.f32 %v1050_v20, %v1313_v4  ;;  %v471_v43 = vmul.f32 %v1050_v20, %v429_v13  ;;  %v472_v45 = vmul.f32 %v1050_v20, %v1316_v6  ;;  %v473_v46 = vmul.f32 %v1050_v20, %v431_v14 }
  0x3b   : > { %v474_v47 = vmul.f32 %v1050_v20, %v1319_v11  ;;  %v475_v48 = vmul.f32 %v1050_v20, %v433_v15  ;;  %v492_v49 = vrot.slane %v460_v62, 1  ;;  %v493_v58 = vrot.slane %v461_v63, 1 }
  0x3c   : > { %v495_v56 = vrot.slane %v462_v1, 1  ;;  %v496_v23 = vrot.slane %v463_v3, 1  ;;  %v498_v51 = vrot.slane %v464_v5, 1  ;;  %v499_v53 = vrot.slane %v465_v10, 1  ;;  %v1051_v1 = vld [vmem:[%s1554_s1 + $0x5] ss:$0 sm:$0xff] }
  0x3d   : > { %v494_v54 = vsel %vm279_vm0, %v492_v49, %v493_v58  ;;  %v501_v16 = vrot.slane %v466_v12, 1  ;;  %v502_v17 = vrot.slane %v467_v24, 1  ;;  %v504_v21 = vrot.slane %v468_v9, 1 }
  0x3e   : > { %v497_v19 = vsel %vm279_vm0, %v495_v56, %v496_v23  ;;  %v500_v22 = vsel %vm279_vm0, %v498_v51, %v499_v53  ;;  %v505_v27 = vrot.slane %v469_v26, 1  ;;  %v507_v25 = vrot.slane %v470_v42, 1  ;;  %v978_v53 = vld [vmem:[%s1124_s19 + $0x18] sm:$0xf] }
  0x3f   : > { %v503_v28 = vsel %vm279_vm0, %v501_v16, %v502_v17  ;;  %v508_v20 = vrot.slane %v471_v43, 1  ;;  %v510_v62 = vrot.slane %v472_v45, 1  ;;  %v511_v63 = vrot.slane %v473_v46, 1 }
  0x40   : > { %v506_v3 = vsel %vm279_vm0, %v504_v21, %v505_v27  ;;  %v513_v5 = vrot.slane %v474_v47, 1  ;;  %v514_v10 = vrot.slane %v475_v48, 1  ;;  %v524_v12 = vadd.f32 %v494_v54, %v447_v29  ;;  %v1402_v54 = vld [vmem:[%s1124_s19 + $0x1c] sm:$0x1]  ;;  %v1407_v27 = vld [vmem:[%s1124_s19 + $0x24] sm:$0x1] }
  0x41   : > { %v509_v24 = vsel %vm279_vm0, %v507_v25, %v508_v20  ;;  %v512_v9 = vsel %vm279_vm0, %v510_v62, %v511_v63  ;;  %v525_v26 = vadd.f32 %v497_v19, %v448_v31  ;;  %v526_v42 = vadd.f32 %v500_v22, %v449_v32  ;;  %v980_v22 = vld [vmem:[%s1124_s19 + $0x20] sm:$0xf]  ;;  %v982_v63 = vld [vmem:[%s1124_s19 + $0x28] sm:$0xf] }
  0x42   : > { %v515_v49 = vsel %vm279_vm0, %v513_v5, %v514_v10  ;;  %v527_v43 = vadd.f32 %v503_v28, %v450_v33  ;;  %v528_v45 = vadd.f32 %v506_v3, %v451_v34  ;;  %v529_v46 = vadd.f32 %v509_v24, %v452_v39  ;;  %v984_v3 = vld [vmem:[%s1124_s19 + $0x30] sm:$0xf] }
  0x43   : > { %v530_v58 = vadd.f32 %v512_v9, %v453_v40  ;;  %v531_v56 = vadd.f32 %v515_v49, %v454_v41  ;;  %v537_v23 = vmul.f32 %v1051_v1, %v1291_v57  ;;  %v538_v47 = vmul.f32 %v1051_v1, %v419_v30  ;;  %v1418_v9 = vld [vmem:[%s1124_s19 + $0x34] sm:$0x1]  ;;  %v986_v49 = vld [vmem:[%s1124_s19 + $0x38] sm:$0xf] }
  0x44   : > { %v539_v29 = vmul.f32 %v1051_v1, %v1301_v35  ;;  %v540_v48 = vmul.f32 %v1051_v1, %v421_v37  ;;  %v541_v31 = vmul.f32 %v1051_v1, %v1304_v59  ;;  %v542_v32 = vmul.f32 %v1051_v1, %v423_v60 }
  0x45   : > { %v543_v33 = vmul.f32 %v1051_v1, %v1307_v38  ;;  %v544_v34 = vmul.f32 %v1051_v1, %v425_v7  ;;  %v545_v57 = vmul.f32 %v1051_v1, %v1310_v2  ;;  %v546_v36 = vmul.f32 %v1051_v1, %v427_v8 }
  0x46   : > { %v547_v30 = vmul.f32 %v1051_v1, %v1313_v4  ;;  %v548_v0 = vmul.f32 %v1051_v1, %v429_v13  ;;  %v549_v35 = vmul.f32 %v1051_v1, %v1316_v6  ;;  %v550_v18 = vmul.f32 %v1051_v1, %v431_v14 }
  0x47   : > { %v551_v37 = vmul.f32 %v1051_v1, %v1319_v11  ;;  %v552_v44 = vmul.f32 %v1051_v1, %v433_v15  ;;  %v569_v59 = vrot.slane %v537_v23, 2  ;;  %v570_v50 = vrot.slane %v538_v47, 2  ;;  %v976_v11 = vld [vmem:[%s1124_s19 + $0x10] sm:$0xf]  ;;  %v1397_v15 = vld [vmem:[%s1124_s19 + $0x14] sm:$0x1] }
  0x48   : > { %v572_v60 = vrot.slane %v539_v29, 2  ;;  %v573_v38 = vrot.slane %v540_v48, 2  ;;  %v575_v7 = vrot.slane %v541_v31, 2  ;;  %v576_v61 = vrot.slane %v542_v32, 2  ;;  %v1413_v1 = vld [vmem:[%s1124_s19 + $0x2c] sm:$0x1] }
  0x49   : > { %v571_v2 = vsel %vm357_vm1, %v569_v59, %v570_v50  ;;  %v578_v8 = vrot.slane %v543_v33, 2  ;;  %v579_v52 = vrot.slane %v544_v34, 2  ;;  %v581_v4 = vrot.slane %v545_v57, 2  ;;  %v1422_v23 = vld [vmem:[%s1124_s19 + $0x3c] sm:$0x1] }
  0x4a   : > { %v574_v13 = vsel %vm357_vm1, %v572_v60, %v573_v38  ;;  %v577_v55 = vsel %vm357_vm1, %v575_v7, %v576_v61  ;;  %v582_v6 = vrot.slane %v546_v36, 2  ;;  %v584_v14 = vrot.slane %v547_v30, 2  ;;  %v1053_v38 = vld [vmem:[%s1554_s1 + $0x7] ss:$0 sm:$0xff] }
  0x4b   : > { %v580_v39 = vsel %vm357_vm1, %v578_v8, %v579_v52  ;;  %v585_v40 = vrot.slane %v548_v0, 2  ;;  %v587_v41 = vrot.slane %v549_v35, 2  ;;  %v588_v51 = vrot.slane %v550_v18, 2 }
  0x4c   : > { %v583_v16 = vsel %vm357_vm1, %v581_v4, %v582_v6  ;;  %v590_v17 = vrot.slane %v551_v37, 2  ;;  %v591_v21 = vrot.slane %v552_v44, 2  ;;  %v601_v19 = vadd.f32 %v571_v2, %v524_v12 }
  0x4d   : > { %v586_v25 = vsel %vm357_vm1, %v584_v14, %v585_v40  ;;  %v589_v28 = vsel %vm357_vm1, %v587_v41, %v588_v51  ;;  %v602_v20 = vadd.f32 %v574_v13, %v525_v26  ;;  %v603_v62 = vadd.f32 %v577_v55, %v526_v42  ;;  %v988_v26 = vld [vmem:[%s1124_s19 + $0x40] sm:$0xf]  ;;  %v1426_v42 = vld [vmem:[%s1124_s19 + $0x44] sm:$0x1] }
  0x4e   : > { %v592_v5 = vsel %vm357_vm1, %v590_v17, %v591_v21  ;;  %v604_v10 = vadd.f32 %v580_v39, %v527_v43  ;;  %v605_v12 = vadd.f32 %v583_v16, %v528_v45  ;;  %v606_v24 = vadd.f32 %v586_v25, %v529_v46  ;;  %v1052_v43 = vld [vmem:[%s1554_s1 + $0x6] ss:$0 sm:$0xff]  ;;  %v990_v45 = vld [vmem:[%s1124_s19 + $0x48] sm:$0xf]  ;;  %v1436_v46 = vld [vmem:[%s1124_s19 + $0x4c] sm:$0x1] }
  0x4f   : > { %v607_v47 = vadd.f32 %v589_v28, %v530_v58  ;;  %v608_v29 = vadd.f32 %v592_v5, %v531_v56  ;;  %v1428_v48 = vunpack.c.l.bf16 %v976_v11  ;;  %v630_v31 = vunpack.c.l.bf16 %v1397_v15 }
  0x50   : > { %v1438_v32 = vunpack.c.l.bf16 %v978_v53  ;;  %v632_v33 = vunpack.c.l.bf16 %v1402_v54  ;;  %v1441_v58 = vunpack.c.l.bf16 %v980_v22  ;;  %v634_v56 = vunpack.c.l.bf16 %v1407_v27 }
  0x51   : > { %v1444_v34 = vunpack.c.l.bf16 %v982_v63  ;;  %v636_v57 = vunpack.c.l.bf16 %v1413_v1  ;;  %v1447_v36 = vunpack.c.l.bf16 %v984_v3  ;;  %v638_v30 = vunpack.c.l.bf16 %v1418_v9 }
  0x52   : > { %v1450_v0 = vunpack.c.l.bf16 %v986_v49  ;;  %v640_v35 = vunpack.c.l.bf16 %v1422_v23  ;;  %v1453_v18 = vunpack.c.l.bf16 %v988_v26  ;;  %v642_v37 = vunpack.c.l.bf16 %v1426_v42 }
  0x53   : > { %v1456_v44 = vunpack.c.l.bf16 %v990_v45  ;;  %v644_v59 = vunpack.c.l.bf16 %v1436_v46  ;;  %v650_v50 = vmul.f32 %v1052_v43, %v1428_v48  ;;  %v651_v60 = vmul.f32 %v1052_v43, %v1438_v32 }
  0x54   : > { %v652_v7 = vmul.f32 %v1052_v43, %v1441_v58  ;;  %v653_v61 = vmul.f32 %v1052_v43, %v1444_v34  ;;  %v654_v2 = vmul.f32 %v1052_v43, %v1447_v36  ;;  %v655_v8 = vmul.f32 %v1052_v43, %v1450_v0 }
  0x55   : > { %v656_v52 = vmul.f32 %v1052_v43, %v1453_v18  ;;  %v657_v4 = vmul.f32 %v1052_v43, %v1456_v44  ;;  %v658_v13 = vadd.f32 %v650_v50, %v601_v19  ;;  %v659_v55 = vadd.f32 %v651_v60, %v602_v20 }
  0x56   : > { %v660_v6 = vadd.f32 %v652_v7, %v603_v62  ;;  %v661_v14 = vadd.f32 %v653_v61, %v604_v10  ;;  %v662_v11 = vadd.f32 %v654_v2, %v605_v12  ;;  %v663_v39 = vadd.f32 %v655_v8, %v606_v24 }
  0x57   : > { %v664_v40 = vadd.f32 %v656_v52, %v607_v47  ;;  %v665_v41 = vadd.f32 %v657_v4, %v608_v29  ;;  %v671_v51 = vmul.f32 %v1053_v38, %v1428_v48  ;;  %v672_v53 = vmul.f32 %v1053_v38, %v630_v31 }
  0x58   : > { %v673_v16 = vmul.f32 %v1053_v38, %v1438_v32  ;;  %v674_v17 = vmul.f32 %v1053_v38, %v632_v33  ;;  %v675_v21 = vmul.f32 %v1053_v38, %v1441_v58  ;;  %v676_v19 = vmul.f32 %v1053_v38, %v634_v56 }
  0x59   : > { %v677_v22 = vmul.f32 %v1053_v38, %v1444_v34  ;;  %v678_v25 = vmul.f32 %v1053_v38, %v636_v57  ;;  %v679_v28 = vmul.f32 %v1053_v38, %v1447_v36  ;;  %v680_v20 = vmul.f32 %v1053_v38, %v638_v30 }
  0x5a   : > { %v681_v62 = vmul.f32 %v1053_v38, %v1450_v0  ;;  %v682_v63 = vmul.f32 %v1053_v38, %v640_v35  ;;  %v683_v3 = vmul.f32 %v1053_v38, %v1453_v18  ;;  %v684_v5 = vmul.f32 %v1053_v38, %v642_v37 }
  0x5b   : > { %v685_v10 = vmul.f32 %v1053_v38, %v1456_v44  ;;  %v686_v12 = vmul.f32 %v1053_v38, %v644_v59  ;;  %v703_v24 = vrot.slane %v671_v51, 1  ;;  %v704_v49 = vrot.slane %v672_v53, 1 }
  0x5c   : > { %v706_v47 = vrot.slane %v673_v16, 1  ;;  %v707_v29 = vrot.slane %v674_v17, 1  ;;  %v709_v26 = vrot.slane %v675_v21, 1  ;;  %v710_v43 = vrot.slane %v676_v19, 1  ;;  %v1054_v16 = vld [vmem:[%s1554_s1 + $0x8] ss:$0 sm:$0xff] }
  0x5d   : > { %v705_v45 = vsel %vm279_vm0, %v703_v24, %v704_v49  ;;  %v712_v50 = vrot.slane %v677_v22, 1  ;;  %v713_v60 = vrot.slane %v678_v25, 1  ;;  %v715_v7 = vrot.slane %v679_v28, 1 }
  0x5e   : > { %v708_v61 = vsel %vm279_vm0, %v706_v47, %v707_v29  ;;  %v711_v2 = vsel %vm279_vm0, %v709_v26, %v710_v43  ;;  %v716_v8 = vrot.slane %v680_v20, 1  ;;  %v718_v52 = vrot.slane %v681_v62, 1 }
  0x5f   : > { %v714_v4 = vsel %vm279_vm0, %v712_v50, %v713_v60  ;;  %v719_v38 = vrot.slane %v682_v63, 1  ;;  %v721_v51 = vrot.slane %v683_v3, 1  ;;  %v722_v53 = vrot.slane %v684_v5, 1 }
  0x60   : > { %v717_v17 = vsel %vm279_vm0, %v715_v7, %v716_v8  ;;  %v724_v21 = vrot.slane %v685_v10, 1  ;;  %v725_v19 = vrot.slane %v686_v12, 1  ;;  %v735_v22 = vadd.f32 %v705_v45, %v658_v13 }
  0x61   : > { %v720_v25 = vsel %vm279_vm0, %v718_v52, %v719_v38  ;;  %v723_v28 = vsel %vm279_vm0, %v721_v51, %v722_v53  ;;  %v736_v20 = vadd.f32 %v708_v61, %v659_v55  ;;  %v737_v62 = vadd.f32 %v711_v2, %v660_v6 }
  0x62   : > { %v726_v24 = vsel %vm279_vm0, %v724_v21, %v725_v19  ;;  %v738_v63 = vadd.f32 %v714_v4, %v661_v14  ;;  %v739_v3 = vadd.f32 %v717_v17, %v662_v11  ;;  %v740_v5 = vadd.f32 %v720_v25, %v663_v39 }
  0x63   : > { %v741_v49 = vadd.f32 %v723_v28, %v664_v40  ;;  %v742_v47 = vadd.f32 %v726_v24, %v665_v41  ;;  %v748_v29 = vmul.f32 %v1054_v16, %v1428_v48  ;;  %v749_v10 = vmul.f32 %v1054_v16, %v630_v31  ;;  %v1055_v41 = vld [vmem:[%s1555_s2] ss:$0 sm:$0xff] }
  0x64   : > { %v750_v13 = vmul.f32 %v1054_v16, %v1438_v32  ;;  %v751_v12 = vmul.f32 %v1054_v16, %v632_v33  ;;  %v752_v55 = vmul.f32 %v1054_v16, %v1441_v58  ;;  %v753_v6 = vmul.f32 %v1054_v16, %v634_v56 }
  0x65   : > { %v754_v14 = vmul.f32 %v1054_v16, %v1444_v34  ;;  %v755_v11 = vmul.f32 %v1054_v16, %v636_v57  ;;  %v756_v48 = vmul.f32 %v1054_v16, %v1447_v36  ;;  %v757_v15 = vmul.f32 %v1054_v16, %v638_v30 }
  0x66   : > { %v758_v31 = vmul.f32 %v1054_v16, %v1450_v0  ;;  %v759_v54 = vmul.f32 %v1054_v16, %v640_v35  ;;  %v760_v32 = vmul.f32 %v1054_v16, %v1453_v18  ;;  %v761_v27 = vmul.f32 %v1054_v16, %v642_v37 }
  0x67   : > { %v762_v33 = vmul.f32 %v1054_v16, %v1456_v44  ;;  %v763_v1 = vmul.f32 %v1054_v16, %v644_v59  ;;  %v780_v58 = vrot.slane %v748_v29, 2  ;;  %v781_v56 = vrot.slane %v749_v10, 2 }
  0x68   : > { %v783_v34 = vrot.slane %v750_v13, 2  ;;  %v784_v9 = vrot.slane %v751_v12, 2  ;;  %v786_v57 = vrot.slane %v752_v55, 2  ;;  %v787_v36 = vrot.slane %v753_v6, 2 }
  0x69   : > { %v782_v30 = vsel %vm357_vm1, %v780_v58, %v781_v56  ;;  %v789_v23 = vrot.slane %v754_v14, 2  ;;  %v790_v0 = vrot.slane %v755_v11, 2  ;;  %v792_v35 = vrot.slane %v756_v48, 2 }
  0x6a   : > { %v785_v18 = vsel %vm357_vm1, %v783_v34, %v784_v9  ;;  %v788_v42 = vsel %vm357_vm1, %v786_v57, %v787_v36  ;;  %v793_v37 = vrot.slane %v757_v15, 2  ;;  %v795_v44 = vrot.slane %v758_v31, 2 }
  0x6b   : > { %v791_v46 = vsel %vm357_vm1, %v789_v23, %v790_v0  ;;  %v796_v59 = vrot.slane %v759_v54, 2  ;;  %v798_v39 = vrot.slane %v760_v32, 2  ;;  %v799_v40 = vrot.slane %v761_v27, 2 }
  0x6c   : > { %v794_v26 = vsel %vm357_vm1, %v792_v35, %v793_v37  ;;  %v801_v43 = vrot.slane %v762_v33, 2  ;;  %v802_v45 = vrot.slane %v763_v1, 2  ;;  %v812_v50 = vadd.f32 %v782_v30, %v735_v22 }
  0x6d   : > { %v797_v60 = vsel %vm357_vm1, %v795_v44, %v796_v59  ;;  %v800_v7 = vsel %vm357_vm1, %v798_v39, %v799_v40  ;;  %v813_v61 = vadd.f32 %v785_v18, %v736_v20  ;;  %v814_v2 = vadd.f32 %v788_v42, %v737_v62 }
  0x6e   : > { %v803_v8 = vsel %vm357_vm1, %v801_v43, %v802_v45  ;;  %v815_v52 = vadd.f32 %v791_v46, %v738_v63  ;;  %v816_v4 = vadd.f32 %v794_v26, %v739_v3  ;;  %v817_v38 = vadd.f32 %v797_v60, %v740_v5 }
  0x6f   : > { %v818_v51 = vadd.f32 %v800_v7, %v741_v49  ;;  %v819_v53 = vadd.f32 %v803_v8, %v742_v47  ;;  %v824_v16 = vadd.f32 %v1055_v41, %v812_v50  ;;  %v825_v17 = vadd.f32 %v1055_v41, %v813_v61 }
  0x70   : > { %v826_v21 = vadd.f32 %v1055_v41, %v814_v2  ;;  %v827_v19 = vadd.f32 %v1055_v41, %v815_v52  ;;  %v828_v25 = vadd.f32 %v1055_v41, %v816_v4  ;;  %v829_v22 = vadd.f32 %v1055_v41, %v817_v38 }
  0x71   : > { %v830_v28 = vadd.f32 %v1055_v41, %v818_v51  ;;  %v831_v24 = vadd.f32 %v1055_v41, %v819_v53  ;;  %v832_v29 = vmax.f32 %v824_v16, 0.0  ;;  %v833_v10 = vmax.f32 %v825_v17, 0.0 }
  0x72   : > { %v834_v20 = vmax.f32 %v826_v21, 0.0  ;;  %v835_v62 = vmax.f32 %v827_v19, 0.0  ;;  %v836_v63 = vmax.f32 %v828_v25, 0.0  ;;  %v837_v3 = vmax.f32 %v829_v22, 0.0 }
  0x73   : > { %v838_v5 = vmax.f32 %v830_v28, 0.0  ;;  %v839_v49 = vmax.f32 %v831_v24, 0.0  ;;  %v1001_v47 = vpack.c.bf16 %v833_v10, %v832_v29 }
  0x74   : > { %v1006_v13 = vpack.c.bf16 %v835_v62, %v834_v20  ;;  %v1011_v12 = vpack.c.bf16 %v837_v3, %v836_v63 }
  0x75   : > { %1002 = vst [vmem:[%s192_s20] sm:$0xff] %v1001_v47   ;;  %v1016_v55 = vpack.c.bf16 %v839_v49, %v838_v5 }
  0x76   : > { %1018 = vst [vmem:[%s192_s20 + $0x8] sm:$0xff] %v1006_v13  }
  0x77   : > { %1019 = vst [vmem:[%s192_s20 + $0x10] sm:$0xff] %v1011_v12  }
  0x78   : > { %1020 = vst [vmem:[%s192_s20 + $0x18] sm:$0xff] %v1016_v55  }
  0x79 PF: > { %s13_s14 = sadd.s32 1, %s1078_s14   ;;  %s1557_s12 = smov %s1074_s13 }
  0x7a   : > { %p10_p5 = scmp.ge.s32.totalorder %s13_s14, 4   ;;  %s1558_s13 = smov %s1560_s15 }
  0x7c   :  { %12 = sbr.rel (!%p10_p5) target bundleno = 2 (0x2), region = 73 }

// kernel: gelayer_s2_forward.5
= control target key start
LH: loop header
LB: loop body
LE: loop exit
PB: predicated region body
PF: predicated region fallthrough
CT: control target
= control target key end

     0   :  { %s3571_s12 = smov 0   ;;  %s3573_s13 = smov 0   ;;  %s4610_s0 = inlined_call_operand.vmem [shape: bf16[2,18,18,128], index: 0, kind: input, shape index: {}]   ;;  %s4611_s1 = inlined_call_operand.vmem [shape: bf16[9,128,128], index: 1, kind: input, shape index: {}]   ;;  %s4612_s2 = inlined_call_operand.vmem [shape: f32[1,128], index: 2, kind: input, shape index: {}]   ;;  %s4613_s3 = inlined_call_operand.vmem [shape: bf16[2,16,16,128], index: 3, kind: output, shape index: {}]  }
   0x1   :  { %s3575_s14 = smov 0   ;;  %s3577_s15 = smov 0  }
   0x2   :  { %s3579_s16 = smov 0  }
   0x3 LB: > { %s22_s17 = sadd.s32 1, %s3541_s14  ;;  %s25_s18 = sadd.s32 1, %s3545_s15  ;;  %s3549_s16 = sphi %s3579_s16, %s13_s16   ;;  %s3545_s15 = sphi %s3577_s15, %s4632_s15   ;;  %s3541_s14 = sphi %s3575_s14, %s4631_s14   ;;  %s3537_s13 = sphi %s3573_s13, %s4630_s13   ;;  %s3533_s12 = sphi %s3571_s12, %s4629_s12  }
   0x4   : > { %p23_p0 = scmp.ge.s32.totalorder %s22_s17, 2  ;;  %p2699_p1 = scmp.ge.s32.totalorder %s3549_s16, 1 }
   0x5   : > { %p151_p2 = scmp.lt.s32.totalorder %s3549_s16, 5 }
   0x6   : > { %s4634_s17 = smov (%p23_p0, %s22_s17), 0  ;;  %s4636_s18 = smov (!%p23_p0, %s25_s18), %s3545_s15 }
   0x7   : > { %p152_p3 = pnand %p2699_p1, %p151_p2  ;;  %p27_p4 = scmp.ge.s32.totalorder %s4636_s18, 2 }
   0x9   : > { %s4638_s18 = smov (%p27_p4, %s4636_s18), 0  ;;  %155 = sbr.rel (%p152_p3) target bundleno = 471 (0x1d7), region = 32 }
   0xe   : > { %v3322_v0 = vld [vmem:[%s4611_s1 + $0x78] sm:$0xff]  ;;  %p180_p5 = scmp.lt.s32.totalorder %s3537_s13, 1  ;;  %v3321_v1 = vld [vmem:[%s4611_s1 + $0x70] sm:$0xff]  ;;  %s3298_s23 = smul.u32 96, %s3533_s12  ;;  %v3320_v2 = vld [vmem:[%s4611_s1 + $0x68] sm:$0xff]  ;;  %vm734_vm3 = vcmask 1042432  }
   0xf   : > { %3442 = vmatpush.bf16.msra.mxu1 %v3322_v0  ;;  %3443 = vmatpush.bf16.msra.mxu2 %v3322_v0  ;;  %vm240_vm0 = vsmask.f32 3328  ;;  %vm241_vm1 = vsmask.f32 7440  ;;  %v3319_v3 = vld [vmem:[%s4611_s1 + $0x60] sm:$0xff]  ;;  %v3318_v30 = vld [vmem:[%s4611_s1 + $0x58] sm:$0xff] }
  0x10   : > { %s4640_s13 = smov (!%p180_p5, %s3537_s13), 1  ;;  %3444 = vmatpush.bf16.msra.mxu3 %v3322_v0  ;;  %532 = vmatpush.bf16.msra.mxu0 %v3322_v0  ;;  %vm3659_vm2 = vmor %vm240_vm0, %vm241_vm1  ;;  %v3317_v50 = vld [vmem:[%s4611_s1 + $0x50] sm:$0xff]  ;;  %vm735_vm4 = vcmask 1046532  }
  0x11   : > { %s3466_s24 = smul.u32 216, %s4640_s13  ;;  %vm3888_vm5 = vmor %vm734_vm3, %vm735_vm4  ;;  %s2703_s11 = sshll.u32 %s4640_s13, 5 }
  0x13   : > { %3445 = vmatpush.bf16.msra.mxu1 %v3321_v1  ;;  %3446 = vmatpush.bf16.msra.mxu2 %v3321_v1  ;;  %s184_s29 = scalar_lea.vmem %s4610_s0, %s3466_s24 }
  0x14   : > { %3447 = vmatpush.bf16.msra.mxu3 %v3321_v1  ;;  %533 = vmatpush.bf16.msra.mxu0 %v3321_v1  ;;  %s3619_s30 = scalar_lea.vmem %s184_s29, %s3298_s23 }
  0x15   : > { %v3625_v4 = vld [vmem:[%s3619_s30 + $0x18] sm:$0xf]  ;;  %v3628_v5 = vld [vmem:[%s3619_s30 + $0x1c] sm:$0xf]  ;;  %v3631_v6 = vld [vmem:[%s3619_s30 + $0x20] sm:$0x1] }
  0x16   : > { %v292_v7 = vshrl.u32 %v3625_v4, 16  ;;  %v295_v8 = vshll.u32 %v3625_v4, 16  ;;  %v301_v9 = vshll.u32 %v3628_v5, 16  ;;  %v305_v10 = vshrl.u32 %v3628_v5, 16  ;;  %v3638_v11 = vld [vmem:[%s3619_s30 + $0x30] sm:$0xf] }
  0x17   : > { %3448 = vmatpush.bf16.msra.mxu1 %v3320_v2  ;;  %3449 = vmatpush.bf16.msra.mxu2 %v3320_v2  ;;  %v311_v12 = vshll.u32 %v3631_v6, 16  ;;  %v3642_v13 = vld [vmem:[%s3619_s30 + $0x34] sm:$0xf]  ;;  %v3645_v14 = vld [vmem:[%s3619_s30 + $0x38] sm:$0x1]  ;;  %v340_v15 = vshrl.u32 %v3638_v11, 16 }
  0x18   : > { %3450 = vmatpush.bf16.msra.mxu3 %v3320_v2  ;;  %534 = vmatpush.bf16.msra.mxu0 %v3320_v2  ;;  %v294_v16 = vrot.slane %v292_v7, 4  ;;  %v297_v17 = vrot.slane %v295_v8, 5  ;;  %v303_v18 = vrot.slane %v301_v9, 5  ;;  %v307_v19 = vrot.slane %v305_v10, 4  ;;  %v218_v20 = vld [vmem:[%s3619_s30 + $0x48] sm:$0xf] }
  0x19   : > { %v313_v21 = vrot.slane %v311_v12, 5  ;;  %v342_v22 = vrot.slane %v340_v15, 4  ;;  %v343_v23 = vshll.u32 %v3638_v11, 16  ;;  %v349_v24 = vshll.u32 %v3642_v13, 16  ;;  %v219_v29 = vld [vmem:[%s3619_s30 + $0x4c] sm:$0xf] }
  0x1a   : > { %v298_v25 = vor.u32 %v297_v17, %v294_v16  ;;  %v308_v26 = vor.u32 %v307_v19, %v303_v18  ;;  %v353_v27 = vshrl.u32 %v3642_v13, 16  ;;  %v359_v28 = vshll.u32 %v3645_v14, 16  ;;  %v220_v41 = vld [vmem:[%s3619_s30 + $0x50] sm:$0x1]  ;;  %v3669_v49 = vld [vmem:[%s3619_s30] sm:$0xf] }
  0x1b   : > { %3451 = vmatpush.bf16.msra.mxu1 %v3319_v3  ;;  %3452 = vmatpush.bf16.msra.mxu2 %v3319_v3  ;;  %v345_v32 = vrot.slane %v343_v23, 5  ;;  %v351_v33 = vrot.slane %v349_v24, 5  ;;  %v388_v34 = vshrl.u32 %v218_v20, 16  ;;  %v391_v35 = vshll.u32 %v218_v20, 16  ;;  %v3683_v62 = vld [vmem:[%s3619_s30 + $0x4] sm:$0xf] }
  0x1c   : > { %3453 = vmatpush.bf16.msra.mxu3 %v3319_v3  ;;  %535 = vmatpush.bf16.msra.mxu0 %v3319_v3  ;;  %v299_v36 = vrot.slane %v298_v25, 4  ;;  %v309_v37 = vrot.slane %v308_v26, 4  ;;  %v355_v38 = vrot.slane %v353_v27, 4  ;;  %v361_v39 = vrot.slane %v359_v28, 5  ;;  %v3691_v7 = vld [vmem:[%s3619_s30 + $0x8] sm:$0x1] }
  0x1d   : > { %v346_v40 = vor.u32 %v345_v32, %v342_v22  ;;  %v390_v42 = vrot.slane %v388_v34, 4  ;;  %v393_v43 = vrot.slane %v391_v35, 5  ;;  %v397_v44 = vshll.u32 %v219_v29, 16  ;;  %v3694_v8 = vld [vmem:[%s3619_s30 + $0x24] sm:$0xf]  ;;  %v3316_v9 = vld [vmem:[%s4611_s1 + $0x48] sm:$0xff] }
  0x1e   : > { %v304_v45 = vsel %vm3659_vm2, %v299_v36, %v303_v18  ;;  %v314_v46 = vsel %vm3659_vm2, %v309_v37, %v313_v21  ;;  %v356_v47 = vor.u32 %v355_v38, %v351_v33  ;;  %v401_v48 = vshrl.u32 %v219_v29, 16  ;;  %v3709_v21 = vld [vmem:[%s3619_s30 + $0x28] sm:$0xf]  ;;  %v3715_v25 = vld [vmem:[%s3619_s30 + $0x2c] sm:$0x1]  ;;  %v3330_v38 = vld [vmem:[%s4611_s1 + $0xb8] sm:$0xff] }
  0x1f   : > { %3454 = vmatpush.bf16.msra.mxu1 %v3318_v30  ;;  %3455 = vmatpush.bf16.msra.mxu2 %v3318_v30  ;;  %v3674_v51 = vunpack.c.l.b16 %v304_v45  ;;  %v3676_v52 = vunpack.c.l.b16 %v314_v46  ;;  %v347_v53 = vrot.slane %v346_v40, 4  ;;  %v394_v54 = vor.u32 %v393_v43, %v390_v42  ;;  %v3722_v32 = vld [vmem:[%s3619_s30 + $0x3c] sm:$0xf] }
  0x20   : > { %3456 = vmatpush.bf16.msra.mxu3 %v3318_v30  ;;  %536 = vmatpush.bf16.msra.mxu0 %v3318_v30  ;;  %v357_v55 = vrot.slane %v356_v47, 4  ;;  %v399_v56 = vrot.slane %v397_v44, 5  ;;  %v403_v57 = vrot.slane %v401_v48, 4  ;;  %v407_v58 = vshll.u32 %v220_v41, 16  ;;  %v3314_v44 = vld [vmem:[%s4611_s1 + $0x38] sm:$0xff] }
  0x21   : > { %v470_v59 = vpack.c.b16 %v3676_v52, %v3674_v51  ;;  %v352_v60 = vsel %vm3659_vm2, %v347_v53, %v351_v33  ;;  %v395_v61 = vrot.slane %v394_v54, 4  ;;  %v244_v63 = vshrl.u32 %v3669_v49, 16  ;;  %v3315_v33 = vld [vmem:[%s4611_s1 + $0x40] sm:$0xff]  ;;  %v3353_v51 = vld [vmem:[%s4611_s1 + $0x130] sm:$0xff] }
  0x22   : > { %v362_v0 = vsel %vm3659_vm2, %v357_v55, %v361_v39  ;;  %v3688_v1 = vunpack.c.l.b16 %v352_v60  ;;  %v404_v2 = vor.u32 %v403_v57, %v399_v56  ;;  %v409_v3 = vrot.slane %v407_v58, 5  ;;  %v3738_v47 = vld [vmem:[%s3619_s30 + $0x40] sm:$0xf]  ;;  %v3354_v58 = vld [vmem:[%s4611_s1 + $0x138] sm:$0xff] }
  0x23   : > { %3457 = vmatpush.bf16.msra.mxu1 %v3317_v50  ;;  %3458 = vmatpush.bf16.msra.mxu2 %v3317_v50  ;;  %v3699_v10 = vunpack.c.l.b16 %v362_v0  ;;  %v400_v12 = vsel %vm3659_vm2, %v395_v61, %v399_v56  ;;  %v246_v15 = vrot.slane %v244_v63, 4  ;;  %v247_v16 = vshll.u32 %v3669_v49, 16  ;;  %v3742_v56 = vld [vmem:[%s3619_s30 + $0x44] sm:$0x1]  ;;  %v3751_v0 = vld [vmem:[%s3619_s30 + $0x54] sm:$0xf] }
  0x24   : > { %3459 = vmatpush.bf16.msra.mxu3 %v3317_v50  ;;  %537 = vmatpush.bf16.msra.mxu0 %v3317_v50  ;;  %v405_v17 = vrot.slane %v404_v2, 4  ;;  %v3704_v18 = vunpack.c.l.b16 %v400_v12  ;;  %v253_v19 = vshll.u32 %v3683_v62, 16  ;;  %v257_v20 = vshrl.u32 %v3683_v62, 16 }
  0x25   : > { %v472_v22 = vpack.c.b16 %v3699_v10, %v3688_v1  ;;  %v249_v23 = vrot.slane %v247_v16, 5  ;;  %v263_v24 = vshll.u32 %v3691_v7, 16  ;;  %v316_v26 = vshrl.u32 %v3694_v8, 16  ;;  %v3346_v1 = vld [vmem:[%s4611_s1 + $0xf8] sm:$0xff] }
  0x26   : > { %v410_v27 = vsel %vm3659_vm2, %v405_v17, %v409_v3  ;;  %v255_v28 = vrot.slane %v253_v19, 5  ;;  %v259_v29 = vrot.slane %v257_v20, 4  ;;  %v319_v30 = vshll.u32 %v3694_v8, 16  ;;  %v3313_v19 = vld [vmem:[%s4611_s1 + $0x30] sm:$0xff] }
  0x27   : > { %3460 = vmatpush.bf16.msra.mxu1 %v3316_v9  ;;  %3461 = vmatpush.bf16.msra.mxu2 %v3316_v9  ;;  %v465_v34 = vunpack.c.l.b16 %v410_v27  ;;  %v250_v35 = vor.u32 %v249_v23, %v246_v15  ;;  %v265_v36 = vrot.slane %v263_v24, 5  ;;  %v318_v37 = vrot.slane %v316_v26, 4  ;;  %v3329_v15 = vld [vmem:[%s4611_s1 + $0xb0] sm:$0xff]  ;;  %v3773_v26 = vld [vmem:[%s3619_s30 + $0x58] sm:$0xf] }
  0x28   : > { %3462 = vmatpush.bf16.msra.mxu3 %v3316_v9  ;;  %538 = vmatpush.bf16.msra.mxu0 %v3316_v9  ;;  %v260_v39 = vor.u32 %v259_v29, %v255_v28  ;;  %v321_v40 = vrot.slane %v319_v30, 5  ;;  %v325_v41 = vshll.u32 %v3709_v21, 16  ;;  %v329_v42 = vshrl.u32 %v3709_v21, 16  ;;  %v3783_v29 = vld [vmem:[%s3619_s30 + $0xc] sm:$0xf]  ;;  %v3345_v30 = vld [vmem:[%s4611_s1 + $0xf0] sm:$0xff] }
  0x29   : > { %v474_v43 = vpack.c.b16 %v465_v34, %v3704_v18  ;;  %v251_v45 = vrot.slane %v250_v35, 4  ;;  %v335_v46 = vshll.u32 %v3715_v25, 16  ;;  %v364_v48 = vshrl.u32 %v3722_v32, 16 }
  0x2a   : > { %v261_v50 = vrot.slane %v260_v39, 4  ;;  %v322_v53 = vor.u32 %v321_v40, %v318_v37  ;;  %v327_v54 = vrot.slane %v325_v41, 5  ;;  %v331_v55 = vrot.slane %v329_v42, 4  ;;  %v3328_v37 = vld [vmem:[%s4611_s1 + $0xa8] sm:$0xff] }
  0x2b   : > { %3463 = vmatpush.bf16.msra.mxu1 %v3315_v33  ;;  %3464 = vmatpush.bf16.msra.mxu2 %v3315_v33  ;;  %v256_v57 = vsel %vm3659_vm2, %v251_v45, %v255_v28  ;;  %v337_v60 = vrot.slane %v335_v46, 5  ;;  %v366_v61 = vrot.slane %v364_v48, 4  ;;  %v367_v63 = vshll.u32 %v3722_v32, 16  ;;  %v3312_v42 = vld [vmem:[%s4611_s1 + $0x28] sm:$0xff]  ;;  %v3803_v46 = vld [vmem:[%s3619_s30 + $0x10] sm:$0xf] }
  0x2c   : > { %3465 = vmatpush.bf16.msra.mxu3 %v3315_v33  ;;  %539 = vmatpush.bf16.msra.mxu0 %v3315_v33  ;;  %v266_v2 = vsel %vm3659_vm2, %v261_v50, %v265_v36  ;;  %v452_v3 = vunpack.c.l.b16 %v256_v57  ;;  %v323_v9 = vrot.slane %v322_v53, 4  ;;  %v332_v10 = vor.u32 %v331_v55, %v327_v54  ;;  %v3352_v50 = vld [vmem:[%s4611_s1 + $0x128] sm:$0xff] }
  0x2d   : > { %v453_v12 = vunpack.c.l.b16 %v266_v2  ;;  %v369_v16 = vrot.slane %v367_v63, 5  ;;  %v373_v17 = vshll.u32 %v3738_v47, 16  ;;  %v377_v18 = vshrl.u32 %v3738_v47, 16 }
  0x2e   : > { %550 = vmatmul.bf16.vlgmr.msra.gmra.mxu1 %v470_v59  ;;  %560 = vmatmul.bf16.vlgmr.msra.gmra.mxu2 %v472_v22  ;;  %v328_v20 = vsel %vm3659_vm2, %v323_v9, %v327_v54  ;;  %v333_v23 = vrot.slane %v332_v10, 4  ;;  %v383_v24 = vshll.u32 %v3742_v56, 16  ;;  %v412_v27 = vshrl.u32 %v3751_v0, 16  ;;  %v3780_v22 = vld [vmem:[%s3619_s30 + $0x5c] sm:$0x1] }
  0x2f   : > { %890 = vmatpush.bf16.msrb.mxu2 %v3330_v38  ;;  %677 = vmatpush.bf16.msrb.mxu1 %v3314_v44  ;;  %v468_v28 = vpack.c.b16 %v453_v12, %v452_v3  ;;  %v370_v52 = vor.u32 %v369_v16, %v366_v61  ;;  %v375_v59 = vrot.slane %v373_v17, 5  ;;  %v3790_v34 = vunpack.c.l.b16 %v328_v20  ;;  %v3327_v3 = vld [vmem:[%s4611_s1 + $0xa0] sm:$0xff] }
  0x30   : > { %570 = vmatmul.bf16.vlgmr.msra.gmra.mxu3 %v474_v43  ;;  %1450 = vmatpush.bf16.msrb.mxu0 %v3354_v58  ;;  %v338_v33 = vsel %vm3659_vm2, %v333_v23, %v337_v60  ;;  %v379_v35 = vrot.slane %v377_v18, 4  ;;  %v385_v36 = vrot.slane %v383_v24, 5  ;;  %v414_v39 = vrot.slane %v412_v27, 4  ;;  %v3814_v58 = vld [vmem:[%s3619_s30 + $0x14] sm:$0x1]  ;;  %v3344_v60 = vld [vmem:[%s4611_s1 + $0xe8] sm:$0xff] }
  0x31   : > { %1096 = vmatpush.bf16.msrb.mxu3 %v3346_v1  ;;  %540 = vmatmul.bf16.vlgmr.msra.gmra.mxu0 %v468_v28  ;;  %v371_v38 = vrot.slane %v370_v52, 4  ;;  %v415_v40 = vshll.u32 %v3751_v0, 16  ;;  %v421_v41 = vshll.u32 %v3773_v26, 16  ;;  %v425_v44 = vshrl.u32 %v3773_v26, 16  ;;  %v3311_v16 = vld [vmem:[%s4611_s1 + $0x20] sm:$0xff] }
  0x32   : > { %v380_v43 = vor.u32 %v379_v35, %v375_v59  ;;  %v431_v45 = vshll.u32 %v3780_v22, 16  ;;  %v268_v48 = vshrl.u32 %v3783_v29, 16  ;;  %v3809_v53 = vunpack.c.l.b16 %v338_v33  ;;  %v3351_v23 = vld [vmem:[%s4611_s1 + $0x120] sm:$0xff] }
  0x33   : > { %891 = vmatpush.bf16.msrb.mxu2 %v3329_v15  ;;  %678 = vmatpush.bf16.msrb.mxu1 %v3313_v19  ;;  %v376_v54 = vsel %vm3659_vm2, %v371_v38, %v375_v59  ;;  %v417_v55 = vrot.slane %v415_v40, 5  ;;  %v423_v57 = vrot.slane %v421_v41, 5  ;;  %v427_v1 = vrot.slane %v425_v44, 4  ;;  %v3343_v52 = vld [vmem:[%s4611_s1 + $0xe0] sm:$0xff]  ;;  %v3848_v40 = vld [vmem:[%s3619_s30 + $0x10] sm:$0xf] }
  0x34   : > { %1451 = vmatpush.bf16.msrb.mxu0 %v3353_v51  ;;  %v381_v61 = vrot.slane %v380_v43, 4  ;;  %v462_v63 = vunpack.c.l.b16 %v376_v54  ;;  %v433_v2 = vrot.slane %v431_v45, 5  ;;  %v270_v10 = vrot.slane %v268_v48, 4  ;;  %v3310_v45 = vld [vmem:[%s4611_s1 + $0x18] sm:$0xff] }
  0x35   : > { %1097 = vmatpush.bf16.msrb.mxu3 %v3345_v30  ;;  %v418_v9 = vor.u32 %v417_v55, %v414_v39  ;;  %v271_v12 = vshll.u32 %v3783_v29, 16  ;;  %v277_v15 = vshll.u32 %v3803_v46, 16  ;;  %v428_v18 = vor.u32 %v427_v1, %v423_v57  ;;  %v3845_v39 = vld [vmem:[%s3619_s30 + $0xc] sm:$0xf]  ;;  %v3350_v55 = vld [vmem:[%s4611_s1 + $0x118] sm:$0xff]  ;;  %v3325_v1 = vld [vmem:[%s4611_s1 + $0x90] sm:$0xff] }
  0x36   : > { %v386_v17 = vsel %vm3659_vm2, %v381_v61, %v385_v36  ;;  %v281_v19 = vshrl.u32 %v3803_v46, 16  ;;  %v287_v20 = vshll.u32 %v3814_v58, 16  ;;  %v471_v33 = vpack.c.b16 %v3809_v53, %v3790_v34  ;;  %v3326_v36 = vld [vmem:[%s4611_s1 + $0x98] sm:$0xff] }
  0x37   : > { %892 = vmatpush.bf16.msrb.mxu2 %v3328_v37  ;;  %679 = vmatpush.bf16.msrb.mxu1 %v3312_v42  ;;  %v463_v24 = vunpack.c.l.b16 %v386_v17  ;;  %v419_v27 = vrot.slane %v418_v9, 4  ;;  %v273_v28 = vrot.slane %v271_v12, 5  ;;  %v279_v51 = vrot.slane %v277_v15, 5  ;;  %v3342_v53 = vld [vmem:[%s4611_s1 + $0xd8] sm:$0xff] }
  0x38   : > { %1452 = vmatpush.bf16.msrb.mxu0 %v3352_v50  ;;  %v429_v59 = vrot.slane %v428_v18, 4  ;;  %v283_v30 = vrot.slane %v281_v19, 4  ;;  %v289_v38 = vrot.slane %v287_v20, 5  ;;  %v739_v50 = vrot.slane %v3683_v62, 5  ;;  %v3341_v20 = vld [vmem:[%s4611_s1 + $0xd0] sm:$0xff] }
  0x39   : > { %1098 = vmatpush.bf16.msrb.mxu3 %v3344_v60  ;;  %v424_v35 = vsel %vm3659_vm2, %v419_v27, %v423_v57  ;;  %v274_v37 = vor.u32 %v273_v28, %v270_v10  ;;  %v473_v41 = vpack.c.b16 %v463_v24, %v462_v63  ;;  %v1162_v57 = vshrl.u32 %v3845_v39, 16 }
  0x3a   : > { %v434_v42 = vsel %vm3659_vm2, %v429_v59, %v433_v2  ;;  %v466_v43 = vunpack.c.l.b16 %v424_v35  ;;  %v284_v34 = vor.u32 %v283_v30, %v279_v51  ;;  %v1165_v60 = vshll.u32 %v3845_v39, 16  ;;  %v3871_v2 = vld [vmem:[%s3619_s30 + $0x14] sm:$0x1]  ;;  %v3308_v30 = vld [vmem:[%s4611_s1 + $0x8] sm:$0xff] }
  0x3b   : > { %893 = vmatpush.bf16.msrb.mxu2 %v3327_v3  ;;  %680 = vmatpush.bf16.msrb.mxu1 %v3311_v16  ;;  %v467_v44 = vunpack.c.l.b16 %v434_v42  ;;  %v275_v48 = vrot.slane %v274_v37, 4  ;;  %v1171_v61 = vshll.u32 %v3848_v40, 16  ;;  %v2820_v10 = vrot.slane %v3669_v49, 9  ;;  %v3309_v16 = vld [vmem:[%s4611_s1 + $0x10] sm:$0xff]  ;;  %v3348_v35 = vld [vmem:[%s4611_s1 + $0x108] sm:$0xff] }
  0x3c   : > { %1453 = vmatpush.bf16.msrb.mxu0 %v3351_v23  ;;  %v285_v54 = vrot.slane %v284_v34, 4  ;;  %v1164_v12 = vrot.slane %v1162_v57, 4  ;;  %v741_v17 = vrot.slane %v739_v50, 4  ;;  %v742_v18 = vrot.slane %v3691_v7, 5  ;;  %v3349_v49 = vld [vmem:[%s4611_s1 + $0x110] sm:$0xff] }
  0x3d   : > { %1099 = vmatpush.bf16.msrb.mxu3 %v3343_v52  ;;  %v475_v63 = vpack.c.b16 %v467_v44, %v466_v43  ;;  %v280_v62 = vsel %vm3659_vm2, %v275_v48, %v279_v51  ;;  %v1167_v19 = vrot.slane %v1165_v60, 5  ;;  %v1173_v24 = vrot.slane %v1171_v61, 5  ;;  %v3324_v51 = vld [vmem:[%s4611_s1 + $0x88] sm:$0xff]  ;;  %v3911_v43 = vld [vmem:[%s3619_s30 + $0x18] sm:$0xf]  ;;  %v3323_v44 = vld [vmem:[%s4611_s1 + $0x80] sm:$0xff] }
  0x3e   : > { %555 = vmatmul.bf16.gmra.mxu1 %v471_v33  ;;  %565 = vmatmul.bf16.gmra.mxu2 %v473_v41  ;;  %v290_v3 = vsel %vm3659_vm2, %v285_v54, %v289_v38  ;;  %v454_v9 = vunpack.c.l.b16 %v280_v62  ;;  %v1175_v7 = vshrl.u32 %v3848_v40, 16  ;;  %v1181_v27 = vshll.u32 %v3871_v2, 16  ;;  %v3340_v33 = vld [vmem:[%s4611_s1 + $0xc8] sm:$0xff]  ;;  %v3914_v34 = vld [vmem:[%s3619_s30 + $0x1c] sm:$0xf]  ;;  %v3307_v54 = vld [vmem:[%s4611_s1] sm:$0xff] }
  0x3f   : > { %894 = vmatpush.bf16.msrb.mxu2 %v3326_v36  ;;  %681 = vmatpush.bf16.msrb.mxu1 %v3310_v45  ;;  %v455_v15 = vunpack.c.l.b16 %v290_v3  ;;  %v1168_v52 = vor.u32 %v1167_v19, %v1164_v12  ;;  %v740_v36 = vsel %vm3888_vm5, %v2820_v10, %v739_v50  ;;  %v743_v37 = vsel %vm3888_vm5, %v741_v17, %v742_v18  ;;  %v3378_v50 = vld [vmem:[%s4611_s1 + $0x1b8] sm:$0xff]  ;;  %v3339_v61 = vld [vmem:[%s4611_s1 + $0xc0] sm:$0xff] }
  0x40   : > { %575 = vmatmul.bf16.gmra.mxu3 %v475_v63  ;;  %1454 = vmatpush.bf16.msrb.mxu0 %v3350_v55  ;;  %v1177_v59 = vrot.slane %v1175_v7, 4  ;;  %v1183_v42 = vrot.slane %v1181_v27, 5  ;;  %v810_v45 = vunpack.c.l.b16 %v740_v36  ;;  %v811_v48 = vunpack.c.l.b16 %v743_v37  ;;  %v3347_v63 = vld [vmem:[%s4611_s1 + $0x100] sm:$0xff]  ;;  %v3386_v10 = vld [vmem:[%s4611_s1 + $0x1f8] sm:$0xff] }
  0x41   : > { %1100 = vmatpush.bf16.msrb.mxu3 %v3342_v53  ;;  %v469_v28 = vpack.c.b16 %v455_v15, %v454_v9  ;;  %v1169_v38 = vrot.slane %v1168_v52, 4  ;;  %v1186_v55 = vshrl.u32 %v3911_v43, 16  ;;  %v1189_v57 = vshll.u32 %v3911_v43, 16  ;;  %v3362_v12 = vld [vmem:[%s4611_s1 + $0x178] sm:$0xff] }
  0x42   : > { %v1178_v41 = vor.u32 %v1177_v59, %v1173_v24  ;;  %v1195_v60 = vshll.u32 %v3914_v34, 16  ;;  %v1199_v3 = vshrl.u32 %v3914_v34, 16  ;;  %v753_v9 = vrot.slane %v3628_v5, 5  ;;  %v3331_v5 = vld [vmem:[%s3619_s30 + $0xc] sm:$0xff]  ;;  %v3394_v7 = vld [vmem:[%s4611_s1 + $0x238] sm:$0xff] }
  0x43   : > { %895 = vmatpush.bf16.msrb.mxu2 %v3325_v1  ;;  %545 = vmatmul.bf16.gmra.mxu0 %v469_v28  ;;  %v1174_v62 = vsel %vm3659_vm2, %v1169_v38, %v1173_v24  ;;  %v746_v15 = vrot.slane %v3803_v46, 5  ;;  %v826_v17 = vpack.c.b16 %v811_v48, %v810_v45  ;;  %v2822_v18 = vrot.slane %v3625_v4, 9  ;;  %v3377_v4 = vld [vmem:[%s4611_s1 + $0x1b0] sm:$0xff] }
  0x44   : > { %682 = vmatpush.bf16.msrb.mxu1 %v3309_v16  ;;  %1455 = vmatpush.bf16.msrb.mxu0 %v3349_v49  ;;  %v1179_v53 = vrot.slane %v1178_v41, 4  ;;  %v3299_v16 = vld [vmem:[%s3619_s30] sm:$0xff]  ;;  %v755_v19 = vrot.slane %v753_v9, 4  ;;  %v1370_v49 = vunpack.c.l.b16 %v1174_v62  ;;  %v1188_v27 = vrot.slane %v1186_v55, 4 }
  0x45   : > { %1101 = vmatpush.bf16.msrb.mxu3 %v3341_v20  ;;  %v756_v20 = vrot.slane %v3631_v6, 5  ;;  %v1191_v28 = vrot.slane %v1189_v57, 5  ;;  %v3957_v46 = vrot.slane %v1195_v60, 5  ;;  %v1201_v6 = vrot.slane %v1199_v3, 4  ;;  %v3989_v55 = vld [vmem:[%s3619_s30 + $0x24] sm:$0xf] }
  0x46   : > { %v1184_v1 = vsel %vm3659_vm2, %v1179_v53, %v1183_v42  ;;  %v2821_v59 = vrot.slane %v3783_v29, 9  ;;  %v748_v38 = vrot.slane %v746_v15, 4  ;;  %v749_v41 = vrot.slane %v3814_v58, 5  ;;  %v3376_v58 = vld [vmem:[%s4611_s1 + $0x1a8] sm:$0xff] }
  0x47   : > { %896 = vmatpush.bf16.msrb.mxu2 %v3324_v51  ;;  %v1371_v24 = vunpack.c.l.b16 %v1184_v1  ;;  %v754_v51 = vsel %vm3888_vm5, %v2822_v18, %v753_v9  ;;  %v757_v52 = vsel %vm3888_vm5, %v755_v19, %v756_v20  ;;  %v1202_v45 = vor.u32 %v1201_v6, %v3957_v46  ;;  %v3992_v57 = vld [vmem:[%s3619_s30 + $0x28] sm:$0xf] }
  0x48   : > { %683 = vmatpush.bf16.msrb.mxu1 %v3308_v30  ;;  %1456 = vmatpush.bf16.msrb.mxu0 %v3348_v35  ;;  %v3965_v30 = vld [vmem:[%s3619_s30 + $0x20] sm:$0x1]  ;;  %v3361_v35 = vld [vmem:[%s4611_s1 + $0x170] sm:$0xff]  ;;  %v814_v36 = vunpack.c.l.b16 %v754_v51  ;;  %v815_v37 = vunpack.c.l.b16 %v757_v52  ;;  %v747_v53 = vsel %vm3888_vm5, %v2821_v59, %v746_v15  ;;  %v3384_v60 = vld [vmem:[%s4611_s1 + $0x1e8] sm:$0xff]  ;;  %v1213_v15 = vshll.u32 %v3989_v55, 16 }
  0x49   : > { %1102 = vmatpush.bf16.msrb.mxu3 %v3340_v33  ;;  %v3385_v33 = vld [vmem:[%s4611_s1 + $0x1f0] sm:$0xff]  ;;  %v1386_v29 = vpack.c.b16 %v1371_v24, %v1370_v49  ;;  %v1205_v48 = vshll.u32 %v3965_v30, 16  ;;  %v1203_v1 = vrot.slane %v1202_v45, 4  ;;  %v3392_v9 = vld [vmem:[%s4611_s1 + $0x228] sm:$0xff]  ;;  %v760_v20 = vrot.slane %v3709_v21, 5  ;;  %v3332_v52 = vld [vmem:[%s3619_s30 + $0x18] sm:$0xff] }
  0x4a   : > { %v3974_v42 = vpack.c.b16 %v815_v37, %v814_v36  ;;  %v1215_v24 = vrot.slane %v1213_v15, 5  ;;  %v763_v51 = vrot.slane %v3715_v25, 5 }
  0x4b   : > { %897 = vmatpush.bf16.msrb.mxu2 %v3323_v44  ;;  %v1192_v44 = vor.u32 %v1191_v28, %v1188_v27  ;;  %v1207_v3 = vrot.slane %v1205_v48, 5  ;;  %v3300_v27 = vld [vmem:[%s3619_s30 + $0xc] sm:$0xff]  ;;  %v762_v6 = vrot.slane %v760_v20, 4 }
  0x4c   : > { %684 = vmatpush.bf16.msrb.mxu1 %v3307_v54  ;;  %1457 = vmatpush.bf16.msrb.mxu0 %v3347_v63  ;;  %v750_v54 = vsel %vm3888_vm5, %v748_v38, %v749_v41  ;;  %v812_v63 = vunpack.c.l.b16 %v747_v53  ;;  %v3359_v53 = vld [vmem:[%s4611_s1 + $0x160] sm:$0xff] }
  0x4d   : > { %1103 = vmatpush.bf16.msrb.mxu3 %v3339_v61  ;;  %v3360_v61 = vld [vmem:[%s4611_s1 + $0x168] sm:$0xff]  ;;  %v1193_v62 = vrot.slane %v1192_v44, 4  ;;  %v1208_v19 = vsel %vm3659_vm2, %v1203_v1, %v1207_v3  ;;  %v764_v21 = vsel %vm3888_vm5, %v762_v6, %v763_v51  ;;  %v3375_v44 = vld [vmem:[%s4611_s1 + $0x1a0] sm:$0xff] }
  0x4e   : > { %898 = vmatmul.bf16.vlgmr.msrb.gmra.mxu2 %v826_v17  ;;  %v1223_v17 = vshrl.u32 %v3992_v57, 16  ;;  %v1373_v59 = vunpack.c.l.b16 %v1208_v19  ;;  %v817_v37 = vunpack.c.l.b16 %v764_v21  ;;  %v4076_v21 = vld [vmem:[%s3619_s30 + $0x40] sm:$0xf] }
  0x4f   : > { %1882 = vmatpush.bf16.msra.mxu2 %v3378_v50  ;;  %685 = vmatmul.bf16.vlgmr.msrb.gmra.mxu1 %v3299_v16  ;;  %v3393_v50 = vld [vmem:[%s4611_s1 + $0x230] sm:$0xff]  ;;  %v1219_v16 = vshll.u32 %v3992_v57, 16  ;;  %v1198_v18 = vsel %vm3659_vm2, %v1193_v62, %v3957_v46 }
  0x50   : > { %1676 = vmatpush.bf16.msra.mxu1 %v3362_v12  ;;  %1104 = vmatmul.bf16.vlgmr.msrb.gmra.mxu3 %v3331_v5  ;;  %v1210_v12 = vshrl.u32 %v3989_v55, 16  ;;  %v1225_v28 = vrot.slane %v1223_v17, 4  ;;  %v1372_v46 = vunpack.c.l.b16 %v1198_v18  ;;  %v3333_v17 = vld [vmem:[%s3619_s30 + $0x24] sm:$0xff] }
  0x51   : > { %2236 = vmatpush.bf16.msra.mxu3 %v3386_v10  ;;  %2462 = vmatpush.bf16.msra.mxu0 %v3394_v7  ;;  %v813_v10 = vunpack.c.l.b16 %v750_v54  ;;  %v1221_v7 = vrot.slane %v1219_v16, 5  ;;  %v3391_v54 = vld [vmem:[%s4611_s1 + $0x220] sm:$0xff] }
  0x52   : > { %v1212_v49 = vrot.slane %v1210_v12, 4  ;;  %v1387_v41 = vpack.c.b16 %v1373_v59, %v1372_v46  ;;  %v3301_v12 = vld [vmem:[%s3619_s30 + $0x18] sm:$0xff] }
  0x53   : > { %1883 = vmatpush.bf16.msra.mxu2 %v3377_v4  ;;  %1458 = vmatmul.bf16.vlgmr.msrb.gmra.mxu0 %v1386_v29  ;;  %v827_v5 = vpack.c.b16 %v813_v10, %v812_v63  ;;  %v2823_v4 = vrot.slane %v3694_v8, 9  ;;  %v1226_v38 = vor.u32 %v1225_v28, %v1221_v7  ;;  %v3358_v46 = vld [vmem:[%s4611_s1 + $0x158] sm:$0xff] }
  0x54   : > { %1677 = vmatpush.bf16.msra.mxu1 %v3361_v35  ;;  %v1216_v8 = vor.u32 %v1215_v24, %v1212_v49  ;;  %v4056_v49 = vld [vmem:[%s3619_s30 + $0x38] sm:$0x1] }
  0x55   : > { %2237 = vmatpush.bf16.msra.mxu3 %v3385_v33  ;;  %2463 = vmatpush.bf16.msra.mxu0 %v3393_v50  ;;  %v4018_v33 = vld [vmem:[%s3619_s30 + $0x2c] sm:$0x1]  ;;  %v761_v35 = vsel %vm3888_vm5, %v2823_v4, %v760_v20  ;;  %v1227_v48 = vrot.slane %v1226_v38, 4  ;;  %v1253_v28 = vshll.u32 %v4056_v49, 16  ;;  %v3374_v4 = vld [vmem:[%s4611_s1 + $0x198] sm:$0xff] }
  0x56   : > { %v816_v36 = vunpack.c.l.b16 %v761_v35  ;;  %v1229_v25 = vshll.u32 %v4018_v33, 16  ;;  %v1217_v45 = vrot.slane %v1216_v8, 4  ;;  %v3390_v59 = vld [vmem:[%s4611_s1 + $0x218] sm:$0xff] }
  0x57   : > { %1884 = vmatpush.bf16.msra.mxu2 %v3376_v58  ;;  %v3383_v58 = vld [vmem:[%s4611_s1 + $0x1e0] sm:$0xff]  ;;  %v4073_v35 = vld [vmem:[%s3619_s30 + $0x3c] sm:$0xf] }
  0x58   : > { %1678 = vmatpush.bf16.msra.mxu1 %v3360_v61  ;;  %v4025_v29 = vpack.c.b16 %v817_v37, %v816_v36  ;;  %v1231_v50 = vrot.slane %v1229_v25, 5  ;;  %v4043_v61 = vld [vmem:[%s3619_s30 + $0x34] sm:$0xf]  ;;  %v1222_v63 = vsel %vm3659_vm2, %v1217_v45, %v1221_v7  ;;  %v1258_v8 = vshrl.u32 %v4073_v35, 16 }
  0x59   : > { %2238 = vmatpush.bf16.msra.mxu3 %v3384_v60  ;;  %2464 = vmatpush.bf16.msra.mxu0 %v3392_v9  ;;  %v4040_v60 = vld [vmem:[%s3619_s30 + $0x30] sm:$0xf]  ;;  %v1243_v9 = vshll.u32 %v4043_v61, 16  ;;  %v1247_v10 = vshrl.u32 %v4043_v61, 16  ;;  %v1374_v15 = vunpack.c.l.b16 %v1222_v63  ;;  %v1261_v38 = vshll.u32 %v4073_v35, 16 }
  0x5a   : > { %v1232_v62 = vsel %vm3659_vm2, %v1227_v48, %v1231_v50  ;;  %v1234_v1 = vshrl.u32 %v4040_v60, 16  ;;  %v1237_v3 = vshll.u32 %v4040_v60, 16  ;;  %v1267_v25 = vshll.u32 %v4076_v21, 16  ;;  %v3334_v48 = vld [vmem:[%s3619_s30 + $0x30] sm:$0xff] }
  0x5b   : > { %1885 = vmatpush.bf16.msra.mxu2 %v3375_v44  ;;  %v1375_v16 = vunpack.c.l.b16 %v1232_v62  ;;  %v1245_v20 = vrot.slane %v1243_v9, 5  ;;  %v3302_v44 = vld [vmem:[%s3619_s30 + $0x24] sm:$0xff]  ;;  %v767_v45 = vrot.slane %v3642_v13, 5 }
  0x5c   : > { %1679 = vmatpush.bf16.msra.mxu1 %v3359_v53  ;;  %v1236_v18 = vrot.slane %v1234_v1, 4  ;;  %v1239_v19 = vrot.slane %v1237_v3, 5  ;;  %v1260_v53 = vrot.slane %v1258_v8, 4  ;;  %v1269_v63 = vrot.slane %v1267_v25, 5  ;;  %v4090_v1 = vld [vmem:[%s3619_s30 + $0x44] sm:$0x1] }
  0x5d   : > { %2239 = vmatpush.bf16.msra.mxu3 %v3383_v58  ;;  %2465 = vmatpush.bf16.msra.mxu0 %v3391_v54  ;;  %v1388_v24 = vpack.c.b16 %v1375_v16, %v1374_v15  ;;  %v1263_v54 = vrot.slane %v1261_v38, 5  ;;  %v2824_v3 = vrot.slane %v3638_v11, 9  ;;  %v769_v9 = vrot.slane %v767_v45, 4 }
  0x5e   : > { %903 = vmatmul.bf16.gmra.mxu2 %v827_v5  ;;  %v1249_v5 = vrot.slane %v1247_v10, 4  ;;  %v1240_v7 = vor.u32 %v1239_v19, %v1236_v18  ;;  %v770_v10 = vrot.slane %v3645_v14, 5  ;;  %v4107_v14 = vld [vmem:[%s3619_s30 + $0x4c] sm:$0xf]  ;;  %v3381_v19 = vld [vmem:[%s4611_s1 + $0x1d0] sm:$0xff] }
  0x5f   : > { %690 = vmatmul.bf16.gmra.mxu1 %v3300_v27  ;;  %1886 = vmatpush.bf16.msra.mxu2 %v3374_v4  ;;  %v1264_v15 = vor.u32 %v1263_v54, %v1260_v53  ;;  %v768_v18 = vsel %vm3888_vm5, %v2824_v3, %v767_v45  ;;  %v2825_v3 = vrot.slane %v3722_v32, 9  ;;  %v3380_v32 = vld [vmem:[%s4611_s1 + $0x1c8] sm:$0xff] }
  0x60   : > { %1109 = vmatmul.bf16.gmra.mxu3 %v3332_v52  ;;  %v1250_v27 = vor.u32 %v1249_v5, %v1245_v20  ;;  %v1241_v6 = vrot.slane %v1240_v7, 4  ;;  %v1255_v52 = vrot.slane %v1253_v28, 5  ;;  %1680 = vmatpush.bf16.msra.mxu1 %v3358_v46  ;;  %v771_v11 = vsel %vm3888_vm5, %v769_v9, %v770_v10  ;;  %v3389_v5 = vld [vmem:[%s4611_s1 + $0x210] sm:$0xff] }
  0x61   : > { %2466 = vmatpush.bf16.msra.mxu0 %v3390_v59  ;;  %v818_v28 = vunpack.c.l.b16 %v768_v18  ;;  %v819_v4 = vunpack.c.l.b16 %v771_v11  ;;  %v777_v10 = vrot.slane %v3742_v56, 5  ;;  %v3356_v56 = vld [vmem:[%s4611_s1 + $0x148] sm:$0xff]  ;;  %v4149_v18 = vld [vmem:[%s3619_s30 + $0x54] sm:$0xf]  ;;  %v4152_v11 = vld [vmem:[%s3619_s30 + $0x58] sm:$0xf] }
  0x62   : > { %v1251_v51 = vrot.slane %v1250_v27, 4  ;;  %v1246_v36 = vsel %vm3659_vm2, %v1241_v6, %v1245_v20  ;;  %v3357_v20 = vld [vmem:[%s4611_s1 + $0x150] sm:$0xff] }
  0x63   : > { %1463 = vmatmul.bf16.gmra.mxu0 %v1387_v41  ;;  %v1271_v41 = vshrl.u32 %v4076_v21, 16  ;;  %v1376_v50 = vunpack.c.l.b16 %v1246_v36  ;;  %v830_v36 = vpack.c.b16 %v819_v4, %v818_v28  ;;  %v1309_v28 = vshll.u32 %v4149_v18, 16 }
  0x64   : > { %v1256_v37 = vsel %vm3659_vm2, %v1251_v51, %v1255_v52  ;;  %1681 = vmatpush.bf16.msra.mxu1 %v3357_v20  ;;  %v1291_v52 = vshll.u32 %v4107_v14, 16  ;;  %v1315_v4 = vshll.u32 %v4152_v11, 16 }
  0x65   : > { %v1377_v58 = vunpack.c.l.b16 %v1256_v37  ;;  %v1273_v62 = vrot.slane %v1271_v41, 4  ;;  %2467 = vmatpush.bf16.msra.mxu0 %v3389_v5  ;;  %v3303_v37 = vld [vmem:[%s3619_s30 + $0x30] sm:$0xff] }
  0x66   : > { %v1293_v25 = vrot.slane %v1291_v52, 5 }
  0x67   : > { %v1389_v13 = vpack.c.b16 %v1377_v58, %v1376_v50  ;;  %v1274_v16 = vor.u32 %v1273_v62, %v1269_v63  ;;  %v774_v50 = vrot.slane %v3738_v47, 5  ;;  %v4130_v58 = vld [vmem:[%s3619_s30 + $0x50] sm:$0x1]  ;;  %v3372_v47 = vld [vmem:[%s4611_s1 + $0x188] sm:$0xff] }
  0x68   : > { %1682 = vmatpush.bf16.msra.mxu1 %v3356_v56  ;;  %v4188_v56 = vld [vmem:[%s3619_s30 + $0x60] sm:$0xf] }
  0x69   : > { %v1275_v7 = vrot.slane %v1274_v16, 4  ;;  %v776_v9 = vrot.slane %v774_v50, 4  ;;  %v775_v16 = vsel %vm3888_vm5, %v2825_v3, %v774_v50 }
  0x6e   : > { %908 = vmatmul.bf16.gmra.mxu2 %v3974_v42  ;;  %v3382_v42 = vld [vmem:[%s4611_s1 + $0x1d8] sm:$0xff] }
  0x6f   : > { %695 = vmatmul.bf16.gmra.mxu1 %v3301_v12  ;;  %2240 = vmatpush.bf16.msra.mxu3 %v3382_v42  ;;  %v3373_v12 = vld [vmem:[%s4611_s1 + $0x190] sm:$0xff]  ;;  %v1295_v42 = vshrl.u32 %v4107_v14, 16 }
  0x70   : > { %1114 = vmatmul.bf16.gmra.mxu3 %v3333_v17  ;;  %v1277_v17 = vshll.u32 %v4090_v1, 16  ;;  %1887 = vmatpush.bf16.msra.mxu2 %v3373_v12 }
  0x71   : > { %v1297_v41 = vrot.slane %v1295_v42, 4 }
  0x72   : > { %v1279_v27 = vrot.slane %v1277_v17, 5  ;;  %v778_v17 = vsel %vm3888_vm5, %v776_v9, %v777_v10  ;;  %v3371_v10 = vld [vmem:[%s4611_s1 + $0x180] sm:$0xff] }
  0x73   : > { %1468 = vmatmul.bf16.gmra.mxu0 %v1388_v24  ;;  %v1265_v24 = vrot.slane %v1264_v15, 4  ;;  %2241 = vmatpush.bf16.msra.mxu3 %v3381_v19  ;;  %v1298_v54 = vor.u32 %v1297_v41, %v1293_v25  ;;  %v820_v19 = vunpack.c.l.b16 %v775_v16  ;;  %v821_v20 = vunpack.c.l.b16 %v778_v17  ;;  %v3379_v17 = vld [vmem:[%s4611_s1 + $0x1c0] sm:$0xff] }
  0x74   : > { %v1280_v59 = vsel %vm3659_vm2, %v1275_v7, %v1279_v27  ;;  %1888 = vmatpush.bf16.msra.mxu2 %v3372_v47  ;;  %v3388_v7 = vld [vmem:[%s4611_s1 + $0x208] sm:$0xff]  ;;  %v1306_v27 = vshrl.u32 %v4149_v18, 16 }
  0x75   : > { %v1270_v46 = vsel %vm3659_vm2, %v1265_v24, %v1269_v63  ;;  %v1301_v63 = vshll.u32 %v4130_v58, 16  ;;  %v1299_v12 = vrot.slane %v1298_v54, 4  ;;  %2468 = vmatpush.bf16.msra.mxu0 %v3388_v7  ;;  %v831_v52 = vpack.c.b16 %v821_v20, %v820_v19  ;;  %v3510_v54 = vld [vmem:[%s3619_s30 + $0x50] sm:$0x1]  ;;  %v4191_v19 = vld [vmem:[%s3619_s30 + $0x64] sm:$0xf] }
  0x76   : > { %v1378_v45 = vunpack.c.l.b16 %v1270_v46 }
  0x77   : > { %v1303_v15 = vrot.slane %v1301_v63, 5  ;;  %2242 = vmatpush.bf16.msra.mxu3 %v3380_v32  ;;  %v784_v63 = vrot.slane %v3510_v54, 5  ;;  %v3355_v32 = vld [vmem:[%s4611_s1 + $0x140] sm:$0xff] }
  0x78   : > { %1889 = vmatpush.bf16.msra.mxu2 %v3371_v10  ;;  %1683 = vmatpush.bf16.msra.mxu1 %v3355_v32 }
  0x79   : > { %v1304_v24 = vsel %vm3659_vm2, %v1299_v12, %v1303_v15 }
  0x7a   : > { %v1381_v46 = vunpack.c.l.b16 %v1304_v24 }
  0x7b   : > { %2243 = vmatpush.bf16.msra.mxu3 %v3379_v17 }
  0x7e   : > { %913 = vmatmul.bf16.gmra.mxu2 %v4025_v29  ;;  %v4104_v29 = vld [vmem:[%s3619_s30 + $0x48] sm:$0xf] }
  0x7f   : > { %700 = vmatmul.bf16.gmra.mxu1 %v3302_v44  ;;  %v1282_v6 = vshrl.u32 %v4104_v29, 16  ;;  %v1285_v51 = vshll.u32 %v4104_v29, 16  ;;  %v3335_v44 = vld [vmem:[%s3619_s30 + $0x3c] sm:$0xff] }
  0x80   : > { %1119 = vmatmul.bf16.gmra.mxu3 %v3334_v48  ;;  %v1379_v48 = vunpack.c.l.b16 %v1280_v59  ;;  %v3508_v59 = vld [vmem:[%s3619_s30 + $0x4c] sm:$0xf] }
  0x81   : > { %v1284_v8 = vrot.slane %v1282_v6, 4  ;;  %v1287_v38 = vrot.slane %v1285_v51, 5  ;;  %v1319_v6 = vshrl.u32 %v4152_v11, 16  ;;  %v3304_v51 = vld [vmem:[%s3619_s30 + $0x3c] sm:$0xff] }
  0x82   : > { %v1390_v62 = vpack.c.b16 %v1379_v48, %v1378_v45  ;;  %v3509_v48 = vld [vmem:[%s3619_s30 + $0x48] sm:$0xf] }
  0x83   : > { %1473 = vmatmul.bf16.gmra.mxu0 %v1389_v13  ;;  %v1288_v53 = vor.u32 %v1287_v38, %v1284_v8  ;;  %v1308_v8 = vrot.slane %v1306_v27, 4  ;;  %v1311_v38 = vrot.slane %v1309_v28, 5  ;;  %v1321_v41 = vrot.slane %v1319_v6, 4 }
  0x84   : > { %v2826_v50 = vrot.slane %v3509_v48, 9  ;;  %v1330_v27 = vshrl.u32 %v4188_v56, 16  ;;  %v1333_v28 = vshll.u32 %v4188_v56, 16  ;;  %v1343_v6 = vshrl.u32 %v4191_v19, 16  ;;  %v4210_v48 = vld [vmem:[%s3619_s30 + $0x68] sm:$0x1] }
  0x85   : > { %v1289_v13 = vrot.slane %v1288_v53, 4  ;;  %4619 = vst [vmem:[#allocation2_spill] sm:$0xff] %v4210_v48 }
  0x87   : > { %v1294_v5 = vsel %vm3659_vm2, %v1289_v13, %v1293_v25  ;;  %v1317_v25 = vrot.slane %v1315_v4, 5  ;;  %v1339_v4 = vshll.u32 %v4191_v19, 16 }
  0x88   : > { %v1380_v42 = vunpack.c.l.b16 %v1294_v5 }
  0x89   : > { %v1322_v3 = vor.u32 %v1321_v41, %v1317_v25  ;;  %v1341_v41 = vrot.slane %v1339_v4, 5 }
  0x8a   : > { %v1391_v45 = vpack.c.b16 %v1381_v46, %v1380_v42 }
  0x8b   : > { %v1323_v15 = vrot.slane %v1322_v3, 4  ;;  %v791_v3 = vrot.slane %v3780_v22, 5 }
  0x8e   : > { %918 = vmatmul.bf16.gmra.mxu2 %v830_v36  ;;  %v781_v36 = vrot.slane %v3508_v59, 5  ;;  %v3337_v59 = vld [vmem:[%s3619_s30 + $0x54] sm:$0xff] }
  0x8f   : > { %705 = vmatmul.bf16.gmra.mxu1 %v3303_v37  ;;  %v3336_v37 = vld [vmem:[%s3619_s30 + $0x48] sm:$0xff] }
  0x90   : > { %1124 = vmatmul.bf16.gmra.mxu3 %v3335_v44  ;;  %v4169_v44 = vld [vmem:[%s3619_s30 + $0x5c] sm:$0x1]  ;;  %v783_v53 = vrot.slane %v781_v36, 4  ;;  %v782_v47 = vsel %vm3888_vm5, %v2826_v50, %v781_v36 }
  0x91   : > { %v1325_v9 = vshll.u32 %v4169_v44, 16  ;;  %v822_v20 = vunpack.c.l.b16 %v782_v47  ;;  %v1349_v47 = vshll.u32 %v4210_v48, 16 }
  0x92   : > { %v785_v13 = vsel %vm3888_vm5, %v783_v53, %v784_v63  ;;  %v4215_v53 = vld [vmem:[%s3619_s30 + $0x18] sm:$0xf]  ;;  %v2827_v63 = vrot.slane %v3751_v0, 9 }
  0x93   : > { %1478 = vmatmul.bf16.gmra.mxu0 %v1390_v62  ;;  %v1312_v62 = vor.u32 %v1311_v38, %v1308_v8  ;;  %v1327_v16 = vrot.slane %v1325_v9, 5  ;;  %v823_v5 = vunpack.c.l.b16 %v785_v13  ;;  %v788_v8 = vrot.slane %v3773_v26, 5  ;;  %v4220_v26 = vld [vmem:[%s3619_s30 + $0x1c] sm:$0xf] }
  0x94   : > { %v1332_v38 = vrot.slane %v1330_v27, 4  ;;  %v1957_v17 = vshll.u32 %v4220_v26, 16  ;;  %v1961_v0 = vshrl.u32 %v4220_v26, 16 }
  0x95   : > { %v1313_v12 = vrot.slane %v1312_v62, 4  ;;  %v1328_v7 = vsel %vm3659_vm2, %v1323_v15, %v1327_v16  ;;  %v832_v42 = vpack.c.b16 %v823_v5, %v822_v20  ;;  %v790_v62 = vrot.slane %v788_v8, 4 }
  0x96   : > { %v1951_v15 = vshll.u32 %v4215_v53, 16  ;;  %v789_v32 = vsel %vm3888_vm5, %v2827_v63, %v788_v8 }
  0x97   : > { %v1318_v24 = vsel %vm3659_vm2, %v1313_v12, %v1317_v25  ;;  %v1335_v25 = vrot.slane %v1333_v28, 5  ;;  %v1948_v12 = vshrl.u32 %v4215_v53, 16  ;;  %v792_v20 = vsel %vm3888_vm5, %v790_v62, %v791_v3 }
  0x98   : > { %v1382_v36 = vunpack.c.l.b16 %v1318_v24  ;;  %v1953_v28 = vrot.slane %v1951_v15, 5  ;;  %v3030_v15 = vrot.slane %v3845_v39, 9 }
  0x99   : > { %v1336_v9 = vor.u32 %v1335_v25, %v1332_v38  ;;  %v1950_v27 = vrot.slane %v1948_v12, 4  ;;  %v1525_v38 = vrot.slane %v3848_v40, 5  ;;  %v1528_v12 = vrot.slane %v3871_v2, 5 }
  0x9b   : > { %v1337_v5 = vrot.slane %v1336_v9, 4  ;;  %v1954_v25 = vor.u32 %v1953_v28, %v1950_v27  ;;  %v4262_v27 = vld [vmem:[%s3619_s30 + $0x28] sm:$0xf]  ;;  %v1526_v39 = vsel %vm3888_vm5, %v3030_v15, %v1525_v38 }
  0x9d   : > { %v1955_v40 = vrot.slane %v1954_v25, 4 }
  0x9e   : > { %923 = vmatmul.bf16.gmra.mxu2 %v831_v52  ;;  %v3305_v52 = vld [vmem:[%s3619_s30 + $0x48] sm:$0xff] }
  0x9f   : > { %710 = vmatmul.bf16.gmra.mxu1 %v3304_v51  ;;  %v3387_v51 = vld [vmem:[%s4611_s1 + $0x200] sm:$0xff] }
  0xa0   : > { %1129 = vmatmul.bf16.gmra.mxu3 %v3336_v37  ;;  %2469 = vmatpush.bf16.msra.mxu0 %v3387_v51  ;;  %v1383_v37 = vunpack.c.l.b16 %v1328_v7  ;;  %v1351_v7 = vrot.slane %v1349_v47, 5  ;;  %v825_v51 = vunpack.c.l.b16 %v792_v20  ;;  %v2311_v20 = vrot.slane %v4220_v26, 5 }
  0xa2   : > { %v1392_v54 = vpack.c.b16 %v1383_v37, %v1382_v36  ;;  %v1342_v36 = vsel %vm3659_vm2, %v1337_v5, %v1341_v41 }
  0xa3   : > { %1483 = vmatmul.bf16.gmra.mxu0 %v1391_v45  ;;  %v1345_v45 = vrot.slane %v1343_v6, 4  ;;  %v824_v6 = vunpack.c.l.b16 %v789_v32 }
  0xa5   : > { %v1346_v10 = vor.u32 %v1345_v45, %v1341_v41  ;;  %v833_v63 = vpack.c.b16 %v825_v51, %v824_v6  ;;  %v1384_v41 = vunpack.c.l.b16 %v1342_v36  ;;  %v2313_v36 = vrot.slane %v2311_v20, 4 }
  0xa7   : > { %v1347_v24 = vrot.slane %v1346_v10, 4  ;;  %v3338_v10 = vld [vmem:[%s3619_s30 + $0x60] sm:$0xff] }
  0xa9   : > { %v1352_v37 = vsel %vm3659_vm2, %v1347_v24, %v1351_v7  ;;  %v4259_v7 = vld [vmem:[%s3619_s30 + $0x24] sm:$0xf] }
  0xaa   : > { %v1385_v47 = vunpack.c.l.b16 %v1352_v37 }
  0xab   : > { %v4205_v46 = vpop.f32.mrf.mxu1 }
  0xac   : > { %v1393_v5 = vpack.c.b16 %v1385_v47, %v1384_v41 }
  0xae   : > { %v4212_v50 = vpop.f32.mrf.mxu0  ;;  %928 = vmatmul.bf16.gmra.mxu2 %v832_v42  ;;  %v1963_v42 = vrot.slane %v1961_v0, 4 }
  0xaf   : > { %715 = vmatmul.bf16.gmra.mxu1 %v3305_v52  ;;  %v1959_v52 = vrot.slane %v1957_v17, 5  ;;  %v1527_v17 = vrot.slane %v1525_v38, 4  ;;  %v1972_v38 = vshrl.u32 %v4259_v7, 16 }
  0xb0   : > { %1134 = vmatmul.bf16.gmra.mxu3 %v3337_v59  ;;  %v3090_v59 = vld [vmem:[%s3619_s30 + $0x20] sm:$0x1] }
  0xb1   : > { %v4223_v13 = vpop.f32.mrf.mxu2  ;;  %v1964_v62 = vor.u32 %v1963_v42, %v1959_v52  ;;  %v1967_v3 = vshll.u32 %v3090_v59, 16  ;;  %v1529_v2 = vsel %vm3888_vm5, %v1527_v17, %v1528_v12  ;;  %v1960_v6 = vsel %vm3659_vm2, %v1955_v40, %v1959_v52 }
  0xb2   : > { %v3240_v42 = vrot.slane %v4215_v53, 9  ;;  %v2314_v37 = vrot.slane %v3090_v59, 5  ;;  %v1985_v52 = vshrl.u32 %v4262_v27, 16  ;;  %v1974_v47 = vrot.slane %v1972_v38, 4 }
  0xb3   : > { %v4227_v16 = vpop.f32.mrf.mxu3  ;;  %1488 = vmatmul.bf16.gmra.mxu0 %v1392_v54  ;;  %v4231_v22 = vpop.f32.mrf.mxu1  ;;  %v3306_v54 = vld [vmem:[%s3619_s30 + $0x54] sm:$0xff]  ;;  %v1965_v0 = vrot.slane %v1964_v62, 4  ;;  %v1969_v32 = vrot.slane %v1967_v3, 5  ;;  %v1596_v62 = vunpack.c.l.b16 %v1526_v39  ;;  %v1597_v3 = vunpack.c.l.b16 %v1529_v2 }
  0xb4   : > { %4620 = vst [vmem:[#allocation3_spill] sm:$0xff] %v4227_v16  ;;  %v2312_v53 = vsel %vm3888_vm5, %v3240_v42, %v2311_v20  ;;  %v2315_v59 = vsel %vm3888_vm5, %v2313_v36, %v2314_v37  ;;  %v1987_v17 = vrot.slane %v1985_v52, 4  ;;  %v3363_v2 = vld [vmem:[%s3619_s30 + $0x18] sm:$0xff] }
  0xb5   : > { %v1970_v51 = vsel %vm3659_vm2, %v1965_v0, %v1969_v32  ;;  %v3093_v0 = vld [vmem:[%s3619_s30 + $0x2c] sm:$0x1]  ;;  %v1612_v39 = vpack.c.b16 %v1597_v3, %v1596_v62  ;;  %v2383_v20 = vunpack.c.l.b16 %v2315_v59  ;;  %v4299_v3 = vld [vmem:[%s3619_s30 + $0x30] sm:$0xf] }
  0xb6   : > { %v4237_v4 = vpop.f32.mrf.mxu0  ;;  %v2157_v41 = vunpack.c.l.b16 %v1970_v51  ;;  %v1532_v51 = vrot.slane %v3914_v34, 5  ;;  %v1535_v34 = vrot.slane %v3965_v30, 5 }
  0xb8   : > { %v1534_v62 = vrot.slane %v1532_v51, 4 }
  0xb9   : > { %v4244_v8 = vpop.f32.mrf.mxu2 }
  0xbb   : > { %v4247_v45 = vpop.f32.mrf.mxu3  ;;  %v4250_v9 = vpop.f32.mrf.mxu1 }
  0xbc   : > { %4621 = vst [vmem:[#allocation4_spill] sm:$0xff] %v4247_v45 }
  0xbe   : > { %933 = vmatmul.bf16.gmra.mxu2 %v833_v63  ;;  %v1981_v63 = vshll.u32 %v4262_v27, 16 }
  0xbf   : > { %720 = vmatmul.bf16.gmra.mxu1 %v3306_v54  ;;  %v1975_v54 = vshll.u32 %v4259_v7, 16 }
  0xc0   : > { %1139 = vmatmul.bf16.gmra.mxu3 %v3338_v10  ;;  %v4256_v24 = vpop.f32.mrf.mxu0  ;;  %v2156_v10 = vunpack.c.l.b16 %v1960_v6  ;;  %v1983_v15 = vrot.slane %v1981_v63, 5  ;;  %v2382_v6 = vunpack.c.l.b16 %v2312_v53 }
  0xc1   : > { %v4264_v28 = vpop.f32.mrf.mxu2  ;;  %v1977_v12 = vrot.slane %v1975_v54, 5  ;;  %v1991_v54 = vshll.u32 %v3093_v0, 16 }
  0xc2   : > { %v2172_v36 = vpack.c.b16 %v2157_v41, %v2156_v10  ;;  %v1988_v38 = vor.u32 %v1987_v17, %v1983_v15  ;;  %v2398_v52 = vpack.c.b16 %v2383_v20, %v2382_v6  ;;  %v1999_v17 = vshll.u32 %v4299_v3, 16 }
  0xc3   : > { %v4272_v26 = vpop.f32.mrf.mxu3  ;;  %1493 = vmatmul.bf16.gmra.mxu0 %v1393_v5  ;;  %v4277_v25 = vpop.f32.mrf.mxu1  ;;  %v1978_v37 = vor.u32 %v1977_v12, %v1974_v47  ;;  %v1993_v41 = vrot.slane %v1991_v54, 5  ;;  %v2318_v47 = vrot.slane %v4262_v27, 5  ;;  %v1996_v12 = vshrl.u32 %v4299_v3, 16 }
  0xc4   : > { %4622 = vst [vmem:[#allocation5_spill] sm:$0xff] %v4272_v26  ;;  %v4302_v26 = vld [vmem:[%s3619_s30 + $0x34] sm:$0xf]  ;;  %v1989_v10 = vrot.slane %v1988_v38, 4  ;;  %v1536_v27 = vsel %vm3888_vm5, %v1534_v62, %v1535_v34  ;;  %v3096_v62 = vld [vmem:[%s3619_s30 + $0x38] sm:$0x1] }
  0xc5   : > { %v1979_v53 = vrot.slane %v1978_v37, 4  ;;  %v3241_v37 = vrot.slane %v4259_v7, 9  ;;  %v1599_v48 = vunpack.c.l.b16 %v1536_v27 }
  0xc7   : > { %v2319_v7 = vsel %vm3888_vm5, %v3241_v37, %v2318_v47  ;;  %v3032_v37 = vrot.slane %v3989_v55, 9 }
  0xc8   : > { %v4287_v40 = vpop.f32.mrf.mxu0  ;;  %v2384_v27 = vunpack.c.l.b16 %v2319_v7 }
  0xc9   : > { %v4290_v32 = vpop.f32.mrf.mxu2 }
  0xcb   : > { %v4292_v5 = vpop.f32.mrf.mxu3 }
  0xcc   : > { %4623 = vst [vmem:[#allocation6_spill] sm:$0xff] %v4292_v5  ;;  %v686_v42 = vpop.f32.mrf.mxu1  ;;  %v3031_v5 = vrot.slane %v3911_v43, 9  ;;  %v2005_v43 = vshll.u32 %v4302_v26, 16 }
  0xcd   : > { %v687_v63 = vadd.f32 %v686_v42, %v4212_v50  ;;  %v1984_v42 = vsel %vm3659_vm2, %v1979_v53, %v1983_v15 }
  0xce   : > { %1890 = vmatmul.bf16.vlgmr.msra.gmra.mxu2 %v3363_v2  ;;  %v1533_v30 = vsel %vm3888_vm5, %v3031_v5, %v1532_v51  ;;  %v1998_v5 = vrot.slane %v1996_v12, 4  ;;  %v2001_v51 = vrot.slane %v1999_v17, 5  ;;  %v2158_v15 = vunpack.c.l.b16 %v1984_v42 }
  0xcf   : > { %1684 = vmatmul.bf16.vlgmr.msra.gmra.mxu1 %v1612_v39  ;;  %v2009_v39 = vshrl.u32 %v4302_v26, 16  ;;  %v1598_v16 = vunpack.c.l.b16 %v1533_v30 }
  0xd0   : > { %2244 = vmatmul.bf16.vlgmr.msra.gmra.mxu3 %v2172_v36  ;;  %v1459_v59 = vpop.f32.mrf.mxu0  ;;  %v1994_v36 = vsel %vm3659_vm2, %v1989_v10, %v1993_v41  ;;  %v2002_v12 = vor.u32 %v2001_v51, %v1998_v5  ;;  %v4336_v51 = vld [vmem:[%s3619_s30 + $0x3c] sm:$0xf] }
  0xd1   : > { %v899_v50 = vpop.f32.mrf.mxu2  ;;  %v2011_v45 = vrot.slane %v2009_v39, 4  ;;  %v2159_v53 = vunpack.c.l.b16 %v1994_v36 }
  0xd2   : > { %v939_v2 = vadd.f32 %v899_v50, %v687_v63  ;;  %v2320_v63 = vrot.slane %v2318_v47, 4  ;;  %v2321_v50 = vrot.slane %v3093_v0, 5  ;;  %v1539_v0 = vrot.slane %v3992_v57, 5 }
  0xd3   : > { %v1105_v6 = vpop.f32.mrf.mxu3  ;;  %2470 = vmatmul.bf16.vlgmr.msra.gmra.mxu0 %v2398_v52  ;;  %v2007_v52 = vrot.slane %v2005_v43, 5  ;;  %v2015_v43 = vshll.u32 %v3096_v62, 16 }
  0xd4   : > { %v688_v20 = vpop.f32.mrf.mxu1  ;;  %v1145_v38 = vadd.f32 %v1105_v6, %v939_v2  ;;  %v1613_v6 = vpack.c.b16 %v1599_v48, %v1598_v16  ;;  %v1541_v57 = vrot.slane %v1539_v0, 4  ;;  %v2325_v48 = vrot.slane %v4302_v26, 5 }
  0xd5   : > { %v689_v54 = vadd.f32 %v688_v20, %v4237_v4  ;;  %v2322_v4 = vsel %vm3888_vm5, %v2320_v63, %v2321_v50  ;;  %v2012_v17 = vor.u32 %v2011_v45, %v2007_v52  ;;  %v2173_v20 = vpack.c.b16 %v2159_v53, %v2158_v15 }
  0xd6   : > { %v4321_v34 = vadd.f32 %v1459_v59, %v1145_v38  ;;  %v3364_v59 = vld [vmem:[%s3619_s30 + $0x24] sm:$0xff]  ;;  %v2385_v42 = vunpack.c.l.b16 %v2322_v4  ;;  %v1542_v38 = vrot.slane %v4018_v33, 5  ;;  %v2003_v45 = vrot.slane %v2002_v12, 4 }
  0xd7   : > { %v2013_v63 = vrot.slane %v2012_v17, 4  ;;  %v1540_v33 = vsel %vm3888_vm5, %v3032_v37, %v1539_v0  ;;  %v3242_v4 = vrot.slane %v4299_v3, 9  ;;  %v2328_v12 = vrot.slane %v3096_v62, 5 }
  0xd8   : > { %v1461_v10 = vpop.f32.mrf.mxu0  ;;  %v2399_v16 = vpack.c.b16 %v2385_v42, %v2384_v27  ;;  %v1543_v15 = vsel %vm3888_vm5, %v1541_v57, %v1542_v38  ;;  %v2008_v53 = vsel %vm3659_vm2, %v2003_v45, %v2007_v52  ;;  %v2023_v0 = vshll.u32 %v4336_v51, 16  ;;  %v4362_v45 = vld [vmem:[%s3619_s30 + $0x44] sm:$0x1] }
  0xd9   : > { %v901_v41 = vpop.f32.mrf.mxu2  ;;  %v2160_v3 = vunpack.c.l.b16 %v2008_v53  ;;  %v2326_v62 = vsel %vm3888_vm5, %v3242_v4, %v2325_v48 }
  0xda   : > { %v940_v39 = vadd.f32 %v901_v41, %v689_v54  ;;  %v2017_v54 = vrot.slane %v2015_v43, 5  ;;  %v2327_v41 = vrot.slane %v2325_v48, 4  ;;  %v2020_v43 = vshrl.u32 %v4336_v51, 16 }
  0xdb   : > { %v1107_v2 = vpop.f32.mrf.mxu3 }
  0xdc   : > { %v691_v30 = vpop.f32.mrf.mxu1  ;;  %v1146_v36 = vadd.f32 %v1107_v2, %v940_v39  ;;  %v2018_v26 = vsel %vm3659_vm2, %v2013_v63, %v2017_v54  ;;  %v2329_v27 = vsel %vm3888_vm5, %v2327_v41, %v2328_v12  ;;  %v3033_v12 = vrot.slane %v4040_v60, 9 }
  0xdd   : > { %v692_v47 = vadd.f32 %v691_v30, %v4256_v24  ;;  %v4339_v24 = vld [vmem:[%s3619_s30 + $0x40] sm:$0xf]  ;;  %v1601_v30 = vunpack.c.l.b16 %v1543_v15  ;;  %v2387_v48 = vunpack.c.l.b16 %v2329_v27  ;;  %v1546_v15 = vrot.slane %v4043_v61, 5  ;;  %v4374_v61 = vld [vmem:[%s3619_s30 + $0x4c] sm:$0xf] }
  0xde   : > { %1895 = vmatmul.bf16.gmra.mxu2 %v3364_v59  ;;  %v4333_v50 = vadd.f32 %v1461_v10, %v1146_v36  ;;  %v2029_v39 = vshll.u32 %v4339_v24, 16  ;;  %v2033_v52 = vshrl.u32 %v4339_v24, 16  ;;  %v1600_v59 = vunpack.c.l.b16 %v1540_v33 }
  0xdf   : > { %1689 = vmatmul.bf16.gmra.mxu1 %v1613_v6  ;;  %v2022_v36 = vrot.slane %v2020_v43, 4  ;;  %v2386_v33 = vunpack.c.l.b16 %v2326_v62  ;;  %v1548_v43 = vrot.slane %v1546_v15, 4  ;;  %v2057_v62 = vshrl.u32 %v4374_v61, 16 }
  0xe0   : > { %2249 = vmatmul.bf16.gmra.mxu3 %v2173_v20  ;;  %v1464_v5 = vpop.f32.mrf.mxu0  ;;  %v2161_v20 = vunpack.c.l.b16 %v2018_v26  ;;  %v2031_v37 = vrot.slane %v2029_v39, 5  ;;  %v2035_v57 = vrot.slane %v2033_v52, 4  ;;  %v1614_v63 = vpack.c.b16 %v1601_v30, %v1600_v59  ;;  %v4371_v39 = vld [vmem:[%s3619_s30 + $0x48] sm:$0xf] }
  0xe1   : > { %v904_v55 = vpop.f32.mrf.mxu2 }
  0xe2   : > { %v941_v10 = vadd.f32 %v904_v55, %v692_v47  ;;  %v2025_v47 = vrot.slane %v2023_v0, 5  ;;  %v3365_v55 = vld [vmem:[%s3619_s30 + $0x30] sm:$0xff]  ;;  %v2174_v53 = vpack.c.b16 %v2161_v20, %v2160_v3  ;;  %v1549_v0 = vrot.slane %v4056_v49, 5 }
  0xe3   : > { %v1110_v7 = vpop.f32.mrf.mxu3  ;;  %2475 = vmatmul.bf16.gmra.mxu0 %v2399_v16  ;;  %v2044_v3 = vshrl.u32 %v4371_v39, 16  ;;  %v2047_v20 = vshll.u32 %v4371_v39, 16  ;;  %v2053_v49 = vshll.u32 %v4374_v61, 16 }
  0xe4   : > { %v693_v17 = vpop.f32.mrf.mxu1  ;;  %v1147_v2 = vadd.f32 %v1110_v7, %v941_v10  ;;  %v2026_v26 = vor.u32 %v2025_v47, %v2022_v36  ;;  %v2036_v10 = vor.u32 %v2035_v57, %v2031_v37  ;;  %v2039_v7 = vshll.u32 %v4362_v45, 16 }
  0xe5   : > { %v694_v6 = vadd.f32 %v693_v17, %v4287_v40  ;;  %v2400_v17 = vpack.c.b16 %v2387_v48, %v2386_v33  ;;  %v1547_v47 = vsel %vm3888_vm5, %v3033_v12, %v1546_v15  ;;  %v2335_v33 = vrot.slane %v4362_v45, 5 }
  0xe6   : > { %v4359_v42 = vadd.f32 %v1464_v5, %v1147_v2  ;;  %v2027_v52 = vrot.slane %v2026_v26, 4  ;;  %v2037_v2 = vrot.slane %v2036_v10, 4  ;;  %v2046_v48 = vrot.slane %v2044_v3, 4 }
  0xe7   : > { %v2049_v15 = vrot.slane %v2047_v20, 5  ;;  %v1602_v26 = vunpack.c.l.b16 %v1547_v47  ;;  %v1553_v45 = vrot.slane %v4076_v21, 5  ;;  %v1556_v47 = vrot.slane %v4090_v1, 5 }
  0xe8   : > { %v1466_v38 = vpop.f32.mrf.mxu0 }
  0xe9   : > { %v906_v40 = vpop.f32.mrf.mxu2  ;;  %v1555_v21 = vrot.slane %v1553_v45, 4 }
  0xea   : > { %v942_v54 = vadd.f32 %v906_v40, %v694_v6  ;;  %v2041_v6 = vrot.slane %v2039_v7, 5  ;;  %v3102_v7 = vld [vmem:[%s3619_s30 + $0x50] sm:$0x1] }
  0xeb   : > { %v1112_v16 = vpop.f32.mrf.mxu3 }
  0xec   : > { %v696_v5 = vpop.f32.mrf.mxu1  ;;  %v1148_v4 = vadd.f32 %v1112_v16, %v942_v54  ;;  %v2042_v40 = vsel %vm3659_vm2, %v2037_v2, %v2041_v6 }
  0xed   : > { %v697_v41 = vadd.f32 %v696_v5, %v4205_v46  ;;  %v2332_v46 = vrot.slane %v4339_v24, 5  ;;  %v1550_v24 = vsel %vm3888_vm5, %v1548_v43, %v1549_v0  ;;  %v2055_v5 = vrot.slane %v2053_v49, 5 }
  0xee   : > { %1900 = vmatmul.bf16.gmra.mxu2 %v3365_v55  ;;  %v4376_v59 = vadd.f32 %v1466_v38, %v1148_v4  ;;  %v2032_v38 = vsel %vm3659_vm2, %v2027_v52, %v2031_v37  ;;  %v1603_v10 = vunpack.c.l.b16 %v1550_v24  ;;  %v2050_v43 = vor.u32 %v2049_v15, %v2046_v48 }
  0xef   : > { %1694 = vmatmul.bf16.gmra.mxu1 %v1614_v63  ;;  %v3243_v63 = vrot.slane %v4336_v51, 9  ;;  %v2334_v55 = vrot.slane %v2332_v46, 4  ;;  %v2162_v4 = vunpack.c.l.b16 %v2032_v38  ;;  %v2063_v52 = vshll.u32 %v3102_v7, 16 }
  0xf0   : > { %2254 = vmatmul.bf16.gmra.mxu3 %v2174_v53  ;;  %v1469_v30 = vpop.f32.mrf.mxu0  ;;  %v2059_v53 = vrot.slane %v2057_v62, 4 }
  0xf1   : > { %v909_v60 = vpop.f32.mrf.mxu2  ;;  %v2333_v51 = vsel %vm3888_vm5, %v3243_v63, %v2332_v46  ;;  %v2065_v38 = vrot.slane %v2063_v52, 5 }
  0xf2   : > { %v943_v27 = vadd.f32 %v909_v60, %v697_v41  ;;  %v2163_v41 = vunpack.c.l.b16 %v2042_v40  ;;  %v2060_v0 = vor.u32 %v2059_v53, %v2055_v5  ;;  %v1615_v60 = vpack.c.b16 %v1603_v10, %v1602_v26 }
  0xf3   : > { %v1115_v36 = vpop.f32.mrf.mxu3  ;;  %2480 = vmatmul.bf16.gmra.mxu0 %v2400_v17  ;;  %v2388_v49 = vunpack.c.l.b16 %v2333_v51  ;;  %v2339_v40 = vrot.slane %v4374_v61, 5  ;;  %v3244_v26 = vrot.slane %v4371_v39, 9 }
  0xf4   : > { %v698_v57 = vpop.f32.mrf.mxu1  ;;  %v1149_v54 = vadd.f32 %v1115_v36, %v943_v27  ;;  %v2175_v20 = vpack.c.b16 %v2163_v41, %v2162_v4  ;;  %v3034_v36 = vrot.slane %v4073_v35, 9  ;;  %v2061_v24 = vrot.slane %v2060_v0, 4 }
  0xf5   : > { %v699_v16 = vadd.f32 %v698_v57, %v4231_v22  ;;  %v2336_v22 = vsel %vm3888_vm5, %v2334_v55, %v2335_v33  ;;  %v2051_v57 = vrot.slane %v2050_v43, 4  ;;  %v4410_v55 = vld [vmem:[%s3619_s30 + $0x54] sm:$0xf]  ;;  %v1557_v33 = vsel %vm3888_vm5, %v1555_v21, %v1556_v47  ;;  %v3367_v21 = vld [vmem:[%s3619_s30 + $0x48] sm:$0xff] }
  0xf6   : > { %v4395_v37 = vadd.f32 %v1469_v30, %v1149_v54  ;;  %v3366_v30 = vld [vmem:[%s3619_s30 + $0x3c] sm:$0xff]  ;;  %v2389_v62 = vunpack.c.l.b16 %v2336_v22  ;;  %v1554_v1 = vsel %vm3888_vm5, %v3034_v36, %v1553_v45  ;;  %v2066_v61 = vsel %vm3659_vm2, %v2061_v24, %v2065_v38 }
  0xf7   : > { %v2056_v48 = vsel %vm3659_vm2, %v2051_v57, %v2055_v5  ;;  %v2341_v10 = vrot.slane %v2339_v40, 4  ;;  %v2342_v4 = vrot.slane %v3102_v7, 5  ;;  %v2071_v51 = vshll.u32 %v4410_v55, 16 }
  0xf8   : > { %v1471_v12 = vpop.f32.mrf.mxu0  ;;  %v2401_v63 = vpack.c.b16 %v2389_v62, %v2388_v49  ;;  %v1604_v43 = vunpack.c.l.b16 %v1554_v1  ;;  %v1605_v0 = vunpack.c.l.b16 %v1557_v33  ;;  %v2164_v39 = vunpack.c.l.b16 %v2056_v48  ;;  %v4436_v62 = vld [vmem:[%s3619_s30 + $0x5c] sm:$0x1] }
  0xf9   : > { %v911_v17 = vpop.f32.mrf.mxu2  ;;  %v2165_v52 = vunpack.c.l.b16 %v2066_v61  ;;  %v2340_v7 = vsel %vm3888_vm5, %v3244_v26, %v2339_v40  ;;  %v1560_v24 = vrot.slane %v4107_v14, 5  ;;  %v3035_v33 = vrot.slane %v4104_v29, 9  ;;  %v4447_v26 = vld [vmem:[%s3619_s30 + $0x64] sm:$0xf] }
  0xfa   : > { %v944_v2 = vadd.f32 %v911_v17, %v699_v16  ;;  %v2390_v47 = vunpack.c.l.b16 %v2340_v7 }
  0xfb   : > { %v1117_v6 = vpop.f32.mrf.mxu3  ;;  %v2176_v40 = vpack.c.b16 %v2165_v52, %v2164_v39  ;;  %v1562_v61 = vrot.slane %v1560_v24, 4 }
  0xfc   : > { %v701_v3 = vpop.f32.mrf.mxu1  ;;  %v1150_v27 = vadd.f32 %v1117_v6, %v944_v2  ;;  %v2343_v2 = vsel %vm3888_vm5, %v2341_v10, %v2342_v4 }
  0xfd   : > { %v702_v46 = vadd.f32 %v701_v3, %v4250_v9  ;;  %v4413_v9 = vld [vmem:[%s3619_s30 + $0x58] sm:$0xf]  ;;  %v2391_v57 = vunpack.c.l.b16 %v2343_v2 }
  0xfe   : > { %1905 = vmatmul.bf16.gmra.mxu2 %v3366_v30  ;;  %v4407_v54 = vadd.f32 %v1471_v12, %v1150_v27  ;;  %v2068_v12 = vshrl.u32 %v4410_v55, 16  ;;  %v2077_v22 = vshll.u32 %v4413_v9, 16  ;;  %v2081_v5 = vshrl.u32 %v4413_v9, 16 }
  0xff   : > { %1699 = vmatmul.bf16.gmra.mxu1 %v1615_v60  ;;  %v2073_v30 = vrot.slane %v2071_v51, 5  ;;  %v1616_v27 = vpack.c.b16 %v1605_v0, %v1604_v43  ;;  %v2402_v48 = vpack.c.b16 %v2391_v57, %v2390_v47  ;;  %v2346_v29 = vrot.slane %v4413_v9, 5  ;;  %v3108_v47 = vld [vmem:[%s3619_s30 + $0x68] sm:$0x1] }
 0x100   : > { %2259 = vmatmul.bf16.gmra.mxu3 %v2175_v20  ;;  %v1474_v16 = vpop.f32.mrf.mxu0  ;;  %v2070_v60 = vrot.slane %v2068_v12, 4  ;;  %v2079_v3 = vrot.slane %v2077_v22, 5  ;;  %v2083_v20 = vrot.slane %v2081_v5, 4 }
 0x101   : > { %v914_v35 = vpop.f32.mrf.mxu2 }
 0x102   : > { %v945_v15 = vadd.f32 %v914_v35, %v702_v46  ;;  %v2087_v35 = vshll.u32 %v4436_v62, 16 }
 0x103   : > { %v1120_v53 = vpop.f32.mrf.mxu3  ;;  %2485 = vmatmul.bf16.gmra.mxu0 %v2401_v63  ;;  %v2074_v63 = vor.u32 %v2073_v30, %v2070_v60  ;;  %v3245_v60 = vrot.slane %v4410_v55, 9  ;;  %v2348_v30 = vrot.slane %v2346_v29, 4 }
 0x104   : > { %v703_v41 = vpop.f32.mrf.mxu1  ;;  %v1151_v45 = vadd.f32 %v1120_v53, %v945_v15  ;;  %v1563_v15 = vrot.slane %v4130_v58, 5  ;;  %v4444_v53 = vld [vmem:[%s3619_s30 + $0x60] sm:$0xf]  ;;  %v2089_v4 = vrot.slane %v2087_v35, 5 }
 0x105   : > { %v704_v17 = vadd.f32 %v703_v41, %v4277_v25  ;;  %v2075_v14 = vrot.slane %v2074_v63, 4  ;;  %v2092_v5 = vshrl.u32 %v4444_v53, 16  ;;  %v2095_v58 = vshll.u32 %v4444_v53, 16 }
 0x106   : > { %v4433_v6 = vadd.f32 %v1474_v16, %v1151_v45  ;;  %v2084_v16 = vor.u32 %v2083_v20, %v2079_v3  ;;  %v2101_v45 = vshll.u32 %v4447_v26, 16  ;;  %v1564_v9 = vsel %vm3888_vm5, %v1562_v61, %v1563_v15 }
 0x107   : > { %v2080_v52 = vsel %vm3659_vm2, %v2075_v14, %v2079_v3  ;;  %v2349_v20 = vrot.slane %v4436_v62, 5  ;;  %v2347_v55 = vsel %vm3888_vm5, %v3245_v60, %v2346_v29  ;;  %v1567_v63 = vrot.slane %v4152_v11, 5  ;;  %v3368_v14 = vld [vmem:[%s3619_s30 + $0x54] sm:$0xff] }
 0x108   : > { %v1476_v49 = vpop.f32.mrf.mxu0  ;;  %v2085_v10 = vrot.slane %v2084_v16, 4  ;;  %v2166_v3 = vunpack.c.l.b16 %v2080_v52  ;;  %v3036_v29 = vrot.slane %v4149_v18, 9  ;;  %v1570_v11 = vrot.slane %v4169_v44, 5  ;;  %v4487_v18 = vld [vmem:[%s3619_s30 + $0x70] sm:$0xf] }
 0x109   : > { %v916_v25 = vpop.f32.mrf.mxu2  ;;  %v2350_v62 = vsel %vm3888_vm5, %v2348_v30, %v2349_v20  ;;  %v3246_v30 = vrot.slane %v4444_v53, 9 }
 0x10a   : > { %v946_v46 = vadd.f32 %v916_v25, %v704_v17  ;;  %v2105_v17 = vshrl.u32 %v4447_v26, 16  ;;  %v2090_v7 = vsel %vm3659_vm2, %v2085_v10, %v2089_v4  ;;  %v2097_v25 = vrot.slane %v2095_v58, 5 }
 0x10b   : > { %v1122_v36 = vpop.f32.mrf.mxu3  ;;  %v1568_v44 = vsel %vm3888_vm5, %v3036_v29, %v1567_v63  ;;  %v1574_v29 = vrot.slane %v4191_v19, 5 }
 0x10c   : > { %v706_v38 = vpop.f32.mrf.mxu1  ;;  %v1152_v1 = vadd.f32 %v1122_v36, %v946_v46  ;;  %v2107_v46 = vrot.slane %v2105_v17, 4  ;;  %v2353_v17 = vrot.slane %v4447_v26, 5 }
 0x10d   : > { %v707_v12 = vadd.f32 %v706_v38, %v4223_v13  ;;  %v1561_v13 = vsel %vm3888_vm5, %v3035_v33, %v1560_v24  ;;  %v2167_v24 = vunpack.c.l.b16 %v2090_v7  ;;  %v2111_v33 = vshll.u32 %v3108_v47, 16 }
 0x10e   : > { %1910 = vmatmul.bf16.gmra.mxu2 %v3367_v21  ;;  %v4449_v41 = vadd.f32 %v1476_v49, %v1152_v1  ;;  %v2094_v49 = vrot.slane %v2092_v5, 4  ;;  %v1606_v36 = vunpack.c.l.b16 %v1561_v13  ;;  %v1607_v21 = vunpack.c.l.b16 %v1564_v9  ;;  %v4484_v9 = vld [vmem:[%s3619_s30 + $0x6c] sm:$0xf] }
 0x10f   : > { %1704 = vmatmul.bf16.gmra.mxu1 %v1616_v27  ;;  %v2103_v27 = vrot.slane %v2101_v45, 5  ;;  %v2177_v4 = vpack.c.b16 %v2167_v24, %v2166_v3  ;;  %v2113_v45 = vrot.slane %v2111_v33, 5  ;;  %v2355_v20 = vrot.slane %v2353_v17, 4 }
 0x110   : > { %2264 = vmatmul.bf16.gmra.mxu3 %v2176_v40  ;;  %v1479_v51 = vpop.f32.mrf.mxu0  ;;  %v2098_v35 = vor.u32 %v2097_v25, %v2094_v49  ;;  %v1617_v15 = vpack.c.b16 %v1607_v21, %v1606_v36  ;;  %v2356_v49 = vrot.slane %v3108_v47, 5  ;;  %v2119_v36 = vshll.u32 %v4484_v9, 16 }
 0x111   : > { %v919_v22 = vpop.f32.mrf.mxu2  ;;  %v2108_v1 = vor.u32 %v2107_v46, %v2103_v27  ;;  %v2116_v46 = vshrl.u32 %v4484_v9, 16  ;;  %v2125_v21 = vshll.u32 %v4487_v18, 16  ;;  %v1608_v24 = vunpack.c.l.b16 %v1568_v44 }
 0x112   : > { %v947_v43 = vadd.f32 %v919_v22, %v707_v12  ;;  %v2393_v12 = vunpack.c.l.b16 %v2350_v62  ;;  %v1569_v22 = vrot.slane %v1567_v63, 4  ;;  %v2099_v5 = vrot.slane %v2098_v35, 4 }
 0x113   : > { %v1125_v0 = vpop.f32.mrf.mxu3  ;;  %2490 = vmatmul.bf16.gmra.mxu0 %v2402_v48  ;;  %v2109_v58 = vrot.slane %v2108_v1, 4  ;;  %v2354_v53 = vsel %vm3888_vm5, %v3246_v30, %v2353_v17  ;;  %v2357_v47 = vsel %vm3888_vm5, %v2355_v20, %v2356_v49  ;;  %v2118_v63 = vrot.slane %v2116_v46, 4 }
 0x114   : > { %v708_v39 = vpop.f32.mrf.mxu1  ;;  %v1153_v2 = vadd.f32 %v1125_v0, %v947_v43  ;;  %v1571_v7 = vsel %vm3888_vm5, %v1569_v22, %v1570_v11  ;;  %v2104_v26 = vsel %vm3659_vm2, %v2099_v5, %v2103_v27  ;;  %v2129_v27 = vshrl.u32 %v4487_v18, 16 }
 0x115   : > { %v709_v38 = vadd.f32 %v708_v39, %v4244_v8  ;;  %v2392_v8 = vunpack.c.l.b16 %v2347_v55  ;;  %v2127_v35 = vrot.slane %v2125_v21, 5  ;;  %v2360_v30 = vrot.slane %v4487_v18, 5 }
 0x116   : > { %v4468_v57 = vadd.f32 %v1479_v51, %v1153_v2  ;;  %v2114_v2 = vsel %vm3659_vm2, %v2109_v58, %v2113_v45  ;;  %v2131_v1 = vrot.slane %v2129_v27, 4  ;;  %v3247_v18 = vrot.slane %v4484_v9, 9 }
 0x117   : > { %v2403_v43 = vpack.c.b16 %v2393_v12, %v2392_v8  ;;  %v2169_v55 = vunpack.c.l.b16 %v2114_v2  ;;  %v3369_v8 = vld [vmem:[%s3619_s30 + $0x60] sm:$0xff]  ;;  %v2394_v12 = vunpack.c.l.b16 %v2354_v53  ;;  %v4625_v2 = vld [vmem:[#allocation3_spill] sm:$0xff] }
 0x118   : > { %v1481_v40 = vpop.f32.mrf.mxu0  ;;  %v2132_v58 = vor.u32 %v2131_v1, %v2127_v35 }
 0x119   : > { %v921_v16 = vpop.f32.mrf.mxu2 }
 0x11a   : > { %v948_v48 = vadd.f32 %v921_v16, %v709_v38  ;;  %v1609_v38 = vunpack.c.l.b16 %v1571_v7  ;;  %v2121_v16 = vrot.slane %v2119_v36, 5 }
 0x11b   : > { %v1127_v61 = vpop.f32.mrf.mxu3 }
 0x11c   : > { %v711_v10 = vpop.f32.mrf.mxu1  ;;  %v1154_v51 = vadd.f32 %v1127_v61, %v948_v48  ;;  %v3111_v61 = vld [vmem:[%s3619_s30 + $0x74] sm:$0x1]  ;;  %v2122_v5 = vor.u32 %v2121_v16, %v2118_v63 }
 0x11d   : > { %v712_v39 = vadd.f32 %v711_v10, %v4264_v28  ;;  %v2135_v45 = vshll.u32 %v3111_v61, 16  ;;  %v4626_v16 = vld [vmem:[#allocation4_spill] sm:$0xff] }
 0x11e   : > { %1915 = vmatmul.bf16.gmra.mxu2 %v3368_v14  ;;  %v4480_v0 = vadd.f32 %v1481_v40, %v1154_v51  ;;  %v2168_v40 = vunpack.c.l.b16 %v2104_v26  ;;  %v1618_v14 = vpack.c.b16 %v1609_v38, %v1608_v24  ;;  %v2395_v51 = vunpack.c.l.b16 %v2357_v47 }
 0x11f   : > { %1709 = vmatmul.bf16.gmra.mxu1 %v1617_v15  ;;  %v2123_v7 = vrot.slane %v2122_v5, 4  ;;  %v2133_v26 = vrot.slane %v2132_v58, 4  ;;  %v2137_v19 = vrot.slane %v2135_v45, 5  ;;  %v2362_v24 = vrot.slane %v2360_v30, 4 }
 0x120   : > { %2269 = vmatmul.bf16.gmra.mxu3 %v2177_v4  ;;  %v1484_v13 = vpop.f32.mrf.mxu0  ;;  %v2178_v11 = vpack.c.b16 %v2169_v55, %v2168_v40  ;;  %v2363_v38 = vrot.slane %v3111_v61, 5  ;;  %v3370_v61 = vld [vmem:[%s3619_s30 + $0x6c] sm:$0xff]  ;;  %s2701_s30 = sshll.u32 %s3533_s12, 3 }
 0x121   : > { %v924_v52 = vpop.f32.mrf.mxu2  ;;  %v2128_v21 = vsel %vm3659_vm2, %v2123_v7, %v2127_v35  ;;  %v2138_v27 = vsel %vm3659_vm2, %v2133_v26, %v2137_v19  ;;  %v2361_v35 = vsel %vm3888_vm5, %v3247_v18, %v2360_v30  ;;  %p188_p6 = scmp.lt.s32.totalorder %s2701_s30, 15 }
 0x122   : > { %v949_v60 = vadd.f32 %v924_v52, %v712_v39  ;;  %v1576_v39 = vrot.slane %v1574_v29, 4  ;;  %v4624_v52 = vld [vmem:[#allocation2_spill] sm:$0xff]  ;;  %v2170_v47 = vunpack.c.l.b16 %v2128_v21  ;;  %v2171_v63 = vunpack.c.l.b16 %v2138_v27 }
 0x123   : > { %v1130_v28 = vpop.f32.mrf.mxu3  ;;  %2495 = vmatmul.bf16.gmra.mxu0 %v2403_v43  ;;  %v3037_v43 = vrot.slane %v4188_v56, 9  ;;  %v1577_v44 = vrot.slane %v4624_v52, 5  ;;  %v2364_v31 = vsel %vm3888_vm5, %v2362_v24, %v2363_v38  ;;  %v4628_v52 = vld [vmem:[#allocation6_spill] sm:$0xff]  ;;  %s4642_s30 = smov (!%p188_p6, %s2701_s30), 15 }
 0x124   : > { %v713_v25 = vpop.f32.mrf.mxu1  ;;  %v1155_v3 = vadd.f32 %v1130_v28, %v949_v60  ;;  %v4549_v38 = vld [vmem:[%s4612_s2] ss:$0 sm:$0xff]  ;;  %s2702_s12 = sshll.u32 %s4642_s30, 1 }
 0x125   : > { %v714_v33 = vadd.f32 %v713_v25, %v4290_v32  ;;  %v2404_v32 = vpack.c.b16 %v2395_v51, %v2394_v12  ;;  %v1575_v56 = vsel %vm3888_vm5, %v3037_v43, %v1574_v29  ;;  %v1578_v36 = vsel %vm3888_vm5, %v1576_v39, %v1577_v44  ;;  %s192_s19 = sadd.s32 %s2703_s11, %s2702_s12 }
 0x126   : > { %v4506_v62 = vadd.f32 %v1484_v13, %v1155_v3  ;;  %v1610_v40 = vunpack.c.l.b16 %v1575_v56  ;;  %v1611_v55 = vunpack.c.l.b16 %v1578_v36  ;;  %v2397_v12 = vunpack.c.l.b16 %v2364_v31  ;;  %s2704_s20 = sshll.u32 %s192_s19, 2 }
 0x127   : > { %s4558_s22 = scalar_lea.vmem %s4613_s3, %s2704_s20 }
 0x128   : > { %v1486_v48 = vpop.f32.mrf.mxu0 }
 0x129   : > { %v926_v15 = vpop.f32.mrf.mxu2 }
 0x12a   : > { %v950_v10 = vadd.f32 %v926_v15, %v714_v33 }
 0x12b   : > { %v1132_v4 = vpop.f32.mrf.mxu3 }
 0x12c   : > { %v716_v22 = vpop.f32.mrf.mxu1  ;;  %v1156_v17 = vadd.f32 %v1132_v4, %v950_v10  ;;  %v2179_v4 = vpack.c.b16 %v2171_v63, %v2170_v47 }
 0x12d   : > { %v717_v60 = vadd.f32 %v716_v22, %v4625_v2 }
 0x12e   : > { %1920 = vmatmul.bf16.gmra.mxu2 %v3369_v8  ;;  %v4513_v13 = vadd.f32 %v1486_v48, %v1156_v17  ;;  %v2396_v8 = vunpack.c.l.b16 %v2361_v35 }
 0x12f   : > { %1714 = vmatmul.bf16.gmra.mxu1 %v1618_v14  ;;  %v1619_v14 = vpack.c.b16 %v1611_v55, %v1610_v40 }
 0x130   : > { %2274 = vmatmul.bf16.gmra.mxu3 %v2178_v11  ;;  %v1489_v28 = vpop.f32.mrf.mxu0  ;;  %v2405_v22 = vpack.c.b16 %v2397_v12, %v2396_v8  ;;  %v4627_v11 = vld [vmem:[#allocation5_spill] sm:$0xff] }
 0x131   : > { %v929_v20 = vpop.f32.mrf.mxu2 }
 0x132   : > { %v951_v49 = vadd.f32 %v929_v20, %v717_v60 }
 0x133   : > { %v1135_v25 = vpop.f32.mrf.mxu3  ;;  %2500 = vmatmul.bf16.gmra.mxu0 %v2404_v32 }
 0x134   : > { %v718_v46 = vpop.f32.mrf.mxu1  ;;  %v1157_v3 = vadd.f32 %v1135_v25, %v951_v49 }
 0x135   : > { %v719_v1 = vadd.f32 %v718_v46, %v4626_v16 }
 0x136   : > { %v4527_v53 = vadd.f32 %v1489_v28, %v1157_v3 }
 0x138   : > { %v1491_v33 = vpop.f32.mrf.mxu0 }
 0x139   : > { %v931_v48 = vpop.f32.mrf.mxu2 }
 0x13a   : > { %v952_v9 = vadd.f32 %v931_v48, %v719_v1 }
 0x13b   : > { %v1137_v15 = vpop.f32.mrf.mxu3 }
 0x13c   : > { %v721_v10 = vpop.f32.mrf.mxu1  ;;  %v1158_v51 = vadd.f32 %v1137_v15, %v952_v9 }
 0x13d   : > { %v722_v5 = vadd.f32 %v721_v10, %v4627_v11 }
 0x13e   : > { %1925 = vmatmul.bf16.gmra.mxu2 %v3370_v61  ;;  %v4535_v29 = vadd.f32 %v1491_v33, %v1158_v51 }
 0x13f   : > { %1719 = vmatmul.bf16.gmra.mxu1 %v1619_v14 }
 0x140   : > { %2279 = vmatmul.bf16.gmra.mxu3 %v2179_v4  ;;  %v1494_v23 = vpop.f32.mrf.mxu0 }
 0x141   : > { %v934_v58 = vpop.f32.mrf.mxu2 }
 0x142   : > { %v953_v45 = vadd.f32 %v934_v58, %v722_v5 }
 0x143   : > { %v1140_v17 = vpop.f32.mrf.mxu3  ;;  %2505 = vmatmul.bf16.gmra.mxu0 %v2405_v22 }
 0x144   : > { %v723_v32 = vpop.f32.mrf.mxu1  ;;  %v1159_v43 = vadd.f32 %v1140_v17, %v953_v45 }
 0x145   : > { %v724_v44 = vadd.f32 %v723_v32, %v4628_v52 }
 0x146   : > { %v4538_v39 = vadd.f32 %v1494_v23, %v1159_v43 }
 0x148   : > { %v1496_v7 = vpop.f32.mrf.mxu0 }
 0x149   : > { %v936_v26 = vpop.f32.mrf.mxu2 }
 0x14a   : > { %v954_v19 = vadd.f32 %v936_v26, %v724_v44 }
 0x14b   : > { %v1142_v2 = vpop.f32.mrf.mxu3 }
 0x14c   : > { %v1685_v60 = vpop.f32.mrf.mxu1  ;;  %v1160_v28 = vadd.f32 %v1142_v2, %v954_v19 }
 0x14d   : > { %v1725_v20 = vadd.f32 %v1685_v60, %v4321_v34 }
 0x14e   : > { %v4541_v30 = vadd.f32 %v1496_v7, %v1160_v28 }
 0x150   : > { %v2471_v49 = vpop.f32.mrf.mxu0 }
 0x151   : > { %v1891_v25 = vpop.f32.mrf.mxu2 }
 0x152   : > { %v1931_v46 = vadd.f32 %v1891_v25, %v1725_v20 }
 0x153   : > { %v2245_v56 = vpop.f32.mrf.mxu3 }
 0x154   : > { %v1687_v36 = vpop.f32.mrf.mxu1  ;;  %v2285_v21 = vadd.f32 %v2245_v56, %v1931_v46 }
 0x155   : > { %v1726_v27 = vadd.f32 %v1687_v36, %v4333_v50 }
 0x156   : > { %v2511_v24 = vadd.f32 %v2471_v49, %v2285_v21 }
 0x158   : > { %v2473_v3 = vpop.f32.mrf.mxu0  ;;  %v2531_v63 = vadd.f32 %v4549_v38, %v2511_v24 }
 0x159   : > { %v1893_v18 = vpop.f32.mrf.mxu2 }
 0x15a   : > { %v1932_v34 = vadd.f32 %v1893_v18, %v1726_v27  ;;  %v2547_v31 = vmax.f32 %v2531_v63, 0.0 }
 0x15b   : > { %v2247_v40 = vpop.f32.mrf.mxu3 }
 0x15c   : > { %v1690_v55 = vpop.f32.mrf.mxu1  ;;  %v2286_v47 = vadd.f32 %v2247_v40, %v1932_v34 }
 0x15d   : > { %v1727_v1 = vadd.f32 %v1690_v55, %v4359_v42 }
 0x15e   : > { %v2512_v16 = vadd.f32 %v2473_v3, %v2286_v47 }
 0x160   : > { %v2532_v50 = vadd.f32 %v4549_v38, %v2512_v16  ;;  %v2476_v33 = vpop.f32.mrf.mxu0 }
 0x161   : > { %v1896_v35 = vpop.f32.mrf.mxu2 }
 0x162   : > { %v2548_v48 = vmax.f32 %v2532_v50, 0.0  ;;  %v1933_v9 = vadd.f32 %v1896_v35, %v1727_v1 }
 0x163   : > { %v2250_v15 = vpop.f32.mrf.mxu3 }
 0x164   : > { %v1692_v14 = vpop.f32.mrf.mxu1  ;;  %v3398_v61 = vpack.c.bf16 %v2548_v48, %v2547_v31  ;;  %v2287_v10 = vadd.f32 %v2250_v15, %v1933_v9 }
 0x165   : > { %v1728_v4 = vadd.f32 %v1692_v14, %v4376_v59 }
 0x166   : > { %3399 = vst [vmem:[%s4558_s22] sm:$0xff] %v3398_v61   ;;  %v2513_v12 = vadd.f32 %v2476_v33, %v2287_v10 }
 0x168   : > { %v2478_v8 = vpop.f32.mrf.mxu0  ;;  %v2533_v23 = vadd.f32 %v4549_v38, %v2513_v12 }
 0x169   : > { %v1898_v42 = vpop.f32.mrf.mxu2 }
 0x16a   : > { %v1934_v51 = vadd.f32 %v1898_v42, %v1728_v4  ;;  %v2549_v52 = vmax.f32 %v2533_v23, 0.0 }
 0x16b   : > { %v2252_v22 = vpop.f32.mrf.mxu3 }
 0x16c   : > { %v1695_v11 = vpop.f32.mrf.mxu1  ;;  %v2288_v5 = vadd.f32 %v2252_v22, %v1934_v51 }
 0x16d   : > { %v1729_v17 = vadd.f32 %v1695_v11, %v4395_v37 }
 0x16e   : > { %v2514_v58 = vadd.f32 %v2478_v8, %v2288_v5 }
 0x170   : > { %v2534_v45 = vadd.f32 %v4549_v38, %v2514_v58  ;;  %v2481_v32 = vpop.f32.mrf.mxu0 }
 0x171   : > { %v1901_v43 = vpop.f32.mrf.mxu2 }
 0x172   : > { %v2550_v44 = vmax.f32 %v2534_v45, 0.0  ;;  %v1935_v59 = vadd.f32 %v1901_v43, %v1729_v17 }
 0x173   : > { %v2255_v7 = vpop.f32.mrf.mxu3 }
 0x174   : > { %v1697_v26 = vpop.f32.mrf.mxu1  ;;  %v3403_v19 = vpack.c.bf16 %v2550_v44, %v2549_v52  ;;  %v2289_v2 = vadd.f32 %v2255_v7, %v1935_v59 }
 0x175   : > { %v1730_v60 = vadd.f32 %v1697_v26, %v4407_v54 }
 0x176   : > { %3435 = vst [vmem:[%s4558_s22 + $0x8] sm:$0xff] %v3403_v19   ;;  %v2515_v49 = vadd.f32 %v2481_v32, %v2289_v2 }
 0x178   : > { %v2483_v28 = vpop.f32.mrf.mxu0  ;;  %v2535_v36 = vadd.f32 %v4549_v38, %v2515_v49 }
 0x179   : > { %v1903_v20 = vpop.f32.mrf.mxu2 }
 0x17a   : > { %v1936_v25 = vadd.f32 %v1903_v20, %v1730_v60  ;;  %v2551_v34 = vmax.f32 %v2535_v36, 0.0 }
 0x17b   : > { %v2257_v46 = vpop.f32.mrf.mxu3 }
 0x17c   : > { %v1700_v56 = vpop.f32.mrf.mxu1  ;;  %v2290_v37 = vadd.f32 %v2257_v46, %v1936_v25 }
 0x17d   : > { %v1731_v3 = vadd.f32 %v1700_v56, %v4433_v6 }
 0x17e   : > { %v2516_v21 = vadd.f32 %v2483_v28, %v2290_v37 }
 0x180   : > { %v2536_v27 = vadd.f32 %v4549_v38, %v2516_v21  ;;  %v2486_v18 = vpop.f32.mrf.mxu0 }
 0x181   : > { %v1906_v24 = vpop.f32.mrf.mxu2 }
 0x182   : > { %v2552_v40 = vmax.f32 %v2536_v27, 0.0  ;;  %v1937_v54 = vadd.f32 %v1906_v24, %v1731_v3 }
 0x183   : > { %v2260_v55 = vpop.f32.mrf.mxu3 }
 0x184   : > { %v1702_v47 = vpop.f32.mrf.mxu1  ;;  %v3408_v63 = vpack.c.bf16 %v2552_v40, %v2551_v34  ;;  %v2291_v16 = vadd.f32 %v2260_v55, %v1937_v54 }
 0x185   : > { %v1732_v50 = vadd.f32 %v1702_v47, %v4449_v41 }
 0x186   : > { %3436 = vst [vmem:[%s4558_s22 + $0x10] sm:$0xff] %v3408_v63   ;;  %v2517_v35 = vadd.f32 %v2486_v18, %v2291_v16 }
 0x188   : > { %v2488_v1 = vpop.f32.mrf.mxu0  ;;  %v2537_v15 = vadd.f32 %v4549_v38, %v2517_v35 }
 0x189   : > { %v1908_v33 = vpop.f32.mrf.mxu2 }
 0x18a   : > { %v1938_v31 = vadd.f32 %v1908_v33, %v1732_v50  ;;  %v2553_v42 = vmax.f32 %v2537_v15, 0.0 }
 0x18b   : > { %v2262_v48 = vpop.f32.mrf.mxu3 }
 0x18c   : > { %v1705_v9 = vpop.f32.mrf.mxu1  ;;  %v2292_v6 = vadd.f32 %v2262_v48, %v1938_v31 }
 0x18d   : > { %v1733_v10 = vadd.f32 %v1705_v9, %v4468_v57 }
 0x18e   : > { %v2518_v14 = vadd.f32 %v2488_v1, %v2292_v6 }
 0x190   : > { %v2538_v61 = vadd.f32 %v4549_v38, %v2518_v14  ;;  %v2491_v4 = vpop.f32.mrf.mxu0 }
 0x191   : > { %v1911_v8 = vpop.f32.mrf.mxu2 }
 0x192   : > { %v2554_v12 = vmax.f32 %v2538_v61, 0.0  ;;  %v1939_v41 = vadd.f32 %v1911_v8, %v1733_v10 }
 0x193   : > { %v2265_v51 = vpop.f32.mrf.mxu3 }
 0x194   : > { %v1707_v22 = vpop.f32.mrf.mxu1  ;;  %v3413_v11 = vpack.c.bf16 %v2554_v12, %v2553_v42  ;;  %v2293_v5 = vadd.f32 %v2265_v51, %v1939_v41 }
 0x195   : > { %v1734_v23 = vadd.f32 %v1707_v22, %v4480_v0 }
 0x196   : > { %3437 = vst [vmem:[%s4558_s22 + $0x18] sm:$0xff] %v3413_v11   ;;  %v2519_v17 = vadd.f32 %v2491_v4, %v2293_v5 }
 0x198   : > { %v2493_v58 = vpop.f32.mrf.mxu0  ;;  %v2539_v44 = vadd.f32 %v4549_v38, %v2519_v17 }
 0x199   : > { %v1913_v45 = vpop.f32.mrf.mxu2 }
 0x19a   : > { %v1940_v32 = vadd.f32 %v1913_v45, %v1734_v23  ;;  %v2555_v60 = vmax.f32 %v2539_v44, 0.0 }
 0x19b   : > { %v2267_v43 = vpop.f32.mrf.mxu3 }
 0x19c   : > { %v1710_v52 = vpop.f32.mrf.mxu1  ;;  %v2294_v57 = vadd.f32 %v2267_v43, %v1940_v32 }
 0x19d   : > { %v1735_v26 = vadd.f32 %v1710_v52, %v4506_v62 }
 0x19e   : > { %v2520_v59 = vadd.f32 %v2493_v58, %v2294_v57 }
 0x1a0   : > { %v2540_v7 = vadd.f32 %v4549_v38, %v2520_v59  ;;  %v2496_v19 = vpop.f32.mrf.mxu0 }
 0x1a1   : > { %v1916_v2 = vpop.f32.mrf.mxu2 }
 0x1a2   : > { %v2556_v28 = vmax.f32 %v2540_v7, 0.0  ;;  %v1941_v0 = vadd.f32 %v1916_v2, %v1735_v26 }
 0x1a3   : > { %v2270_v20 = vpop.f32.mrf.mxu3 }
 0x1a4   : > { %v1712_v49 = vpop.f32.mrf.mxu1  ;;  %v3418_v25 = vpack.c.bf16 %v2556_v28, %v2555_v60  ;;  %v2295_v46 = vadd.f32 %v2270_v20, %v1941_v0 }
 0x1a5   : > { %v1736_v56 = vadd.f32 %v1712_v49, %v4513_v13 }
 0x1a6   : > { %3438 = vst [vmem:[%s4558_s22 + $0x20] sm:$0xff] %v3418_v25   ;;  %v2521_v21 = vadd.f32 %v2496_v19, %v2295_v46 }
 0x1a8   : > { %v2498_v37 = vpop.f32.mrf.mxu0  ;;  %v2541_v24 = vadd.f32 %v4549_v38, %v2521_v21 }
 0x1a9   : > { %v1918_v36 = vpop.f32.mrf.mxu2 }
 0x1aa   : > { %v1942_v27 = vadd.f32 %v1918_v36, %v1736_v56  ;;  %v2557_v63 = vmax.f32 %v2541_v24, 0.0 }
 0x1ab   : > { %v2272_v3 = vpop.f32.mrf.mxu3 }
 0x1ac   : > { %v1715_v18 = vpop.f32.mrf.mxu1  ;;  %v2296_v62 = vadd.f32 %v2272_v3, %v1942_v27 }
 0x1ad   : > { %v1737_v54 = vadd.f32 %v1715_v18, %v4527_v53 }
 0x1ae   : > { %v2522_v34 = vadd.f32 %v2498_v37, %v2296_v62 }
 0x1b0   : > { %v2542_v40 = vadd.f32 %v4549_v38, %v2522_v34  ;;  %v2501_v55 = vpop.f32.mrf.mxu0 }
 0x1b1   : > { %v1921_v47 = vpop.f32.mrf.mxu2 }
 0x1b2   : > { %v2558_v16 = vmax.f32 %v2542_v40, 0.0  ;;  %v1943_v13 = vadd.f32 %v1921_v47, %v1737_v54 }
 0x1b3   : > { %v2275_v50 = vpop.f32.mrf.mxu3 }
 0x1b4   : > { %v1717_v1 = vpop.f32.mrf.mxu1  ;;  %v3423_v33 = vpack.c.bf16 %v2558_v16, %v2557_v63  ;;  %v2297_v35 = vadd.f32 %v2275_v50, %v1943_v13 }
 0x1b5   : > { %v1738_v31 = vadd.f32 %v1717_v1, %v4535_v29 }
 0x1b6   : > { %3439 = vst [vmem:[%s4558_s22 + $0x28] sm:$0xff] %v3423_v33   ;;  %v2523_v6 = vadd.f32 %v2501_v55, %v2297_v35 }
 0x1b8   : > { %v2503_v48 = vpop.f32.mrf.mxu0  ;;  %v2543_v10 = vadd.f32 %v4549_v38, %v2523_v6 }
 0x1b9   : > { %v1923_v9 = vpop.f32.mrf.mxu2 }
 0x1ba   : > { %v1944_v15 = vadd.f32 %v1923_v9, %v1738_v31  ;;  %v2559_v41 = vmax.f32 %v2543_v10, 0.0 }
 0x1bb   : > { %v2277_v14 = vpop.f32.mrf.mxu3 }
 0x1bc   : > { %v1720_v61 = vpop.f32.mrf.mxu1  ;;  %v2298_v53 = vadd.f32 %v2277_v14, %v1944_v15 }
 0x1bd   : > { %v1739_v42 = vadd.f32 %v1720_v61, %v4538_v39 }
 0x1be   : > { %v2524_v4 = vadd.f32 %v2503_v48, %v2298_v53 }
 0x1c0   : > { %v2544_v8 = vadd.f32 %v4549_v38, %v2524_v4  ;;  %v2506_v11 = vpop.f32.mrf.mxu0 }
 0x1c1   : > { %v1926_v12 = vpop.f32.mrf.mxu2 }
 0x1c2   : > { %v2560_v51 = vmax.f32 %v2544_v8, 0.0  ;;  %v1945_v22 = vadd.f32 %v1926_v12, %v1739_v42 }
 0x1c3   : > { %v2280_v29 = vpop.f32.mrf.mxu3 }
 0x1c4   : > { %v3428_v5 = vpack.c.bf16 %v2560_v51, %v2559_v41  ;;  %v1722_v23 = vpop.f32.mrf.mxu1  ;;  %v2299_v58 = vadd.f32 %v2280_v29, %v1945_v22 }
 0x1c5   : > { %v1740_v45 = vadd.f32 %v1722_v23, %v4541_v30 }
 0x1c6   : > { %3440 = vst [vmem:[%s4558_s22 + $0x30] sm:$0xff] %v3428_v5   ;;  %v2525_v32 = vadd.f32 %v2506_v11, %v2299_v58 }
 0x1c8   : > { %v2508_v44 = vpop.f32.mrf.mxu0  ;;  %v2545_v39 = vadd.f32 %v4549_v38, %v2525_v32 }
 0x1c9   : > { %v1928_v17 = vpop.f32.mrf.mxu2 }
 0x1ca   : > { %v1946_v43 = vadd.f32 %v1928_v17, %v1740_v45  ;;  %v2561_v26 = vmax.f32 %v2545_v39, 0.0 }
 0x1cb   : > { %v2282_v52 = vpop.f32.mrf.mxu3 }
 0x1cc   : > { %v2300_v57 = vadd.f32 %v2282_v52, %v1946_v43 }
 0x1ce   : > { %v2526_v59 = vadd.f32 %v2508_v44, %v2300_v57 }
 0x1d0   : > { %v2546_v7 = vadd.f32 %v4549_v38, %v2526_v59 }
 0x1d2   : > { %v2562_v19 = vmax.f32 %v2546_v7, 0.0 }
 0x1d4   : > { %v3433_v2 = vpack.c.bf16 %v2562_v19, %v2561_v26 }
 0x1d6   : > { %3441 = vst [vmem:[%s4558_s22 + $0x38] sm:$0xff] %v3433_v2  }
 0x1d7 PF: > { %s13_s16 = sadd.s32 1, %s3549_s16   ;;  %s4629_s12 = smov %s3541_s14 }
 0x1d8   : > { %p10_p7 = scmp.ge.s32.totalorder %s13_s16, 6   ;;  %s4630_s13 = smov %s3545_s15 }
 0x1d9   : > { %s4631_s14 = smov %s4634_s17  ;;  %s4632_s15 = smov %s4638_s18 }
 0x1da   :  { %12 = sbr.rel (!%p10_p7) target bundleno = 3 (0x3), region = 73 }

</bundles_post_ra>
